<compile_context>
chip_gen: v6e
topology: v6e:2x2x1
jax: 0.10.0
libtpu: 0.0.40
codegen_flags: <defaults>
</compile_context>

<pallas_src>
import functools
import math

import jax
import jax.numpy as jnp
from jax.experimental import pallas as pl
from jax.experimental.pallas import tpu as pltpu


# ----------------------------------------------------------------------------
# Fully fused CriticNetwork forward kernel (single invocation, no grid)
# ----------------------------------------------------------------------------
def _critic_kernel(comb_ref, act_ref,
                   wqkv_ref, bqkv_ref, wo_ref, bo_ref,
                   wfc_ref, bfc_ref, w1h_ref, w1a_ref, b1_ref,
                   w2_ref, b2_ref, wqo_ref, bqo_ref,
                   q_ref,
                   scores_scratch, attn_scratch,
                   *, batch, seq, num_heads, head_dim):
    H = num_heads * head_dim
    scale = 1.0 / math.sqrt(head_dim)

    # ---- fused Q/K/V projection over the whole (B*S, Din) row block --------
    comb = comb_ref[...].astype(jnp.bfloat16)                      # (B*S, Din)
    qkv = jnp.dot(comb, wqkv_ref[...],
                  preferred_element_type=jnp.float32) + bqkv_ref[...]   # (B*S, 3H)
    q = qkv[:, :H]
    k = qkv[:, H:2 * H]
    v = qkv[:, 2 * H:]

    # ---- scores for every (batch, head) stacked into one scratch block -----
    for b in range(batch):                        # static unroll, batch small
        qb = q[b * seq:(b + 1) * seq, :]
        kb = k[b * seq:(b + 1) * seq, :]
        for h in range(num_heads):
            lo, hi = h * head_dim, (h + 1) * head_dim
            s_bh = jnp.dot(qb[:, lo:hi], kb[:, lo:hi].T,
                           preferred_element_type=jnp.float32) * scale  # (S, S)
            row = (b * num_heads + h) * seq
            scores_scratch[row:row + seq, :] = s_bh

    # one softmax pass over all (B*num_heads*S, S) rows
    sc = scores_scratch[...]
    sc = sc - jnp.max(sc, axis=-1, keepdims=True)
    p = jnp.exp(sc)
    p = p * pl.reciprocal(jnp.sum(p, axis=-1, keepdims=True), approx=True)

    # ---- weighted values + output projection, stored per batch in VMEM -----
    for b in range(batch):
        vb = v[b * seq:(b + 1) * seq, :]
        acc = jnp.zeros((seq, H), dtype=jnp.float32)
        for h in range(num_heads):
            lo, hi = h * head_dim, (h + 1) * head_dim
            row = (b * num_heads + h) * seq
            p_bh = p[row:row + seq, :]                               # (S, S)
            oh = jnp.dot(p_bh, vb[:, lo:hi],
                         preferred_element_type=jnp.float32)        # (S, hd)
            # concat(heads) @ Wo == sum_h oh_h @ Wo[h-slice]
            acc = acc + jnp.dot(oh.astype(jnp.bfloat16), wo_ref[lo:hi, :],
                                preferred_element_type=jnp.float32)
        attn_scratch[b] = acc + bo_ref[...]                          # (S, H)

    # ---- Attention.fc + ReLU: flat(attn) @ wfc done as a sum over seq ------
    # flat[b, s*H + j] = attn[b, s, j]  =>  hidden[b] = sum_s attn[b,s,:] @ wfc_s
    hidden = jnp.zeros((batch, 2 * H), dtype=jnp.float32)
    for s in range(seq):
        a_s = attn_scratch[:, s, :].astype(jnp.bfloat16)             # (B, H)
        hidden = hidden + jnp.dot(a_s, wfc_ref[s * H:(s + 1) * H, :],
                                  preferred_element_type=jnp.float32)
    hidden = jnp.maximum(hidden + bfc_ref[...], 0.0)                 # (B, 2H)

    # ---- fc1 (concat([attention, action]) folded into split weight) --------
    x1 = (jnp.dot(hidden.astype(jnp.bfloat16), w1h_ref[...],
                  preferred_element_type=jnp.float32)
          + jnp.dot(act_ref[...].astype(jnp.bfloat16), w1a_ref[...],
                    preferred_element_type=jnp.float32)
          + b1_ref[...])
    x1 = jnp.maximum(x1, 0.0)

    # ---- fc2 + ReLU, final q head -------------------------------------------
    x2 = jnp.maximum(
        jnp.dot(x1.astype(jnp.bfloat16), w2_ref[...],
                preferred_element_type=jnp.float32) + b2_ref[...], 0.0)
    qv = jnp.dot(x2, wqo_ref[...],
                 preferred_element_type=jnp.float32) + bqo_ref[...]
    q_ref[...] = qv.astype(q_ref.dtype)


# ----------------------------------------------------------------------------
# Wrapper: layout plumbing + bf16 weight casts, one pallas_call
# ----------------------------------------------------------------------------
def critic_forward(params, state, seq_actions, action, *, num_heads):
    B, S, _ = state.shape
    H = params['wo'].shape[0]
    head_dim = H // num_heads

    # Layout plumbing (cheap, keeps the kernel lane-dense):
    acts = jnp.pad(seq_actions, ((0, 0), (0, 1), (0, 0)))    # F.pad(actions,(0,0,0,1))
    comb = jnp.concatenate([state, acts], axis=-1)           # (B, S, Din)
    Din = comb.shape[-1]
    comb_flat = comb.reshape(B * S, Din)

    bf16 = jnp.bfloat16
    # Fused QKV weight (Din, 3H); biases stay f32.
    wqkv = jnp.concatenate([params['wq'], params['wk'], params['wv']],
                           axis=1).astype(bf16)
    bqkv = jnp.concatenate([params['bq'], params['bk'], params['bv']], axis=1)
    wo = params['wo'].astype(bf16)
    wfc = params['wfc'].astype(bf16)
    # Split fc1's weight so the [attention, action] concat never materializes.
    w1h = params['w1'][: 2 * H, :].astype(bf16)
    w1a = params['w1'][2 * H:, :].astype(bf16)
    w2 = params['w2'].astype(bf16)

    vmem = pl.BlockSpec(memory_space=pltpu.MemorySpace.VMEM)
    kernel = functools.partial(_critic_kernel, batch=B, seq=S,
                               num_heads=num_heads, head_dim=head_dim)
    q = pl.pallas_call(
        kernel,
        out_shape=jax.ShapeDtypeStruct((B, 1), jnp.float32),
        in_specs=[vmem] * 15,
        out_specs=vmem,
        scratch_shapes=[
            pltpu.VMEM((B * num_heads * S, S), jnp.float32),   # stacked scores
            pltpu.VMEM((B, S, H), jnp.float32),                # attention output
        ],
    )(comb_flat, action, wqkv, bqkv, wo, params['bo'],
      wfc, params['bfc'], w1h, w1a, params['b1'],
      w2, params['b2'], params['wq_out'], params['bq_out'])
    return q


# ----------------------------------------------------------------------------
# Parameters (deterministic, PyTorch-Linear-style fan-in init, x @ W layout)
# ----------------------------------------------------------------------------
def init_params(key, obs_dims, n_actions, seq_len, hidden_dim):
    din = obs_dims + n_actions

    def linear(k, fan_in, fan_out):
        kw, kb = jax.random.split(k)
        bound = 1.0 / math.sqrt(fan_in)
        w = jax.random.uniform(kw, (fan_in, fan_out), jnp.float32, -bound, bound)
        b = jax.random.uniform(kb, (1, fan_out), jnp.float32, -bound, bound)
        return w, b

    ks = jax.random.split(key, 8)
    wq, bq = linear(ks[0], din, hidden_dim)
    wk, bk = linear(ks[1], din, hidden_dim)
    wv, bv = linear(ks[2], din, hidden_dim)
    wo, bo = linear(ks[3], hidden_dim, hidden_dim)
    wfc, bfc = linear(ks[4], hidden_dim * seq_len, hidden_dim * 2)
    w1, b1 = linear(ks[5], hidden_dim * 2 + n_actions, hidden_dim)
    w2, b2 = linear(ks[6], hidden_dim, hidden_dim)
    wq_out, bq_out = linear(ks[7], hidden_dim, 1)
    return dict(wq=wq, bq=bq, wk=wk, bk=bk, wv=wv, bv=bv, wo=wo, bo=bo,
                wfc=wfc, bfc=bfc, w1=w1, b1=b1, w2=w2, b2=b2,
                wq_out=wq_out, bq_out=bq_out)


# ----------------------------------------------------------------------------
# Pure-JAX reference of CriticNetwork.forward (f32 weights, for correctness)
# ----------------------------------------------------------------------------
def critic_forward_reference(params, state, seq_actions, action, *, num_heads):
    B, S, _ = state.shape
    H = params['wo'].shape[0]
    hd = H // num_heads
    acts = jnp.pad(seq_actions, ((0, 0), (0, 1), (0, 0)))
    comb = jnp.concatenate([state, acts], axis=-1)
    q = comb @ params['wq'] + params['bq']
    k = comb @ params['wk'] + params['bk']
    v = comb @ params['wv'] + params['bv']

    def split(x):
        return x.reshape(B, S, num_heads, hd).transpose(0, 2, 1, 3)

    qh, kh, vh = split(q), split(k), split(v)
    scores = jnp.einsum('bnqd,bnkd->bnqk', qh, kh) * (1.0 / math.sqrt(hd))
    scores = jax.nn.softmax(scores, axis=-1)
    wvals = jnp.einsum('bnqk,bnkd->bnqd', scores, vh)
    wvals = wvals.transpose(0, 2, 1, 3).reshape(B, S, H)
    attn = wvals @ params['wo'] + params['bo']
    flat = attn.reshape(B, S * H)
    hidden = jax.nn.relu(flat @ params['wfc'] + params['bfc'])
    x1 = jax.nn.relu(jnp.concatenate([hidden, action], axis=1) @ params['w1'] + params['b1'])
    x2 = jax.nn.relu(x1 @ params['w2'] + params['b2'])
    return x2 @ params['wq_out'] + params['bq_out']


if __name__ == "__main__":
    B, S = 2, 8                    # batch, seq_len
    OBS_DIMS, N_ACTIONS, NUM_HEADS = 16, 4, 4
    HIDDEN = 256                   # hard-coded in CriticNetwork

    key = jax.random.PRNGKey(0)
    kp, kst, ksa, kac = jax.random.split(key, 4)
    params = init_params(kp, OBS_DIMS, N_ACTIONS, S, HIDDEN)
    state = jax.random.normal(kst, (B, S, OBS_DIMS), dtype=jnp.float32)
    seq_actions = jax.random.normal(ksa, (B, S - 1, N_ACTIONS), dtype=jnp.float32)
    action = jax.random.normal(kac, (B, N_ACTIONS), dtype=jnp.float32)

    q = critic_forward(params, state, seq_actions, action, num_heads=NUM_HEADS)
    q = jax.block_until_ready(q)

    ref = critic_forward_reference(params, state, seq_actions, action,
                                   num_heads=NUM_HEADS)
    assert q.shape == (B, 1)
    # bf16 weights in the kernel vs f32 reference -> loosened tolerance.
    assert jnp.allclose(q, ref, atol=2e-2, rtol=2e-2), "mismatch vs reference"

    print("KERNEL_OK")
</pallas_src>

<mosaic_0001>
module attributes {stable_mosaic.version = 11 : i64} {
  func.func @_critic_kernel(%arg0: memref<16x20xf32, #tpu.memory_space<vmem>>, %arg1: memref<2x4xf32, #tpu.memory_space<vmem>>, %arg2: memref<20x768xbf16, #tpu.memory_space<vmem>>, %arg3: memref<1x768xf32, #tpu.memory_space<vmem>>, %arg4: memref<256x256xbf16, #tpu.memory_space<vmem>>, %arg5: memref<1x256xf32, #tpu.memory_space<vmem>>, %arg6: memref<2048x512xbf16, #tpu.memory_space<vmem>>, %arg7: memref<1x512xf32, #tpu.memory_space<vmem>>, %arg8: memref<512x256xbf16, #tpu.memory_space<vmem>>, %arg9: memref<4x256xbf16, #tpu.memory_space<vmem>>, %arg10: memref<1x256xf32, #tpu.memory_space<vmem>>, %arg11: memref<256x256xbf16, #tpu.memory_space<vmem>>, %arg12: memref<1x256xf32, #tpu.memory_space<vmem>>, %arg13: memref<256x1xf32, #tpu.memory_space<vmem>>, %arg14: memref<1x1xf32, #tpu.memory_space<vmem>>, %arg15: memref<2x1xf32, #tpu.memory_space<vmem>>, %arg16: memref<64x8xf32, #tpu.memory_space<vmem>>, %arg17: memref<2x8x256xf32, #tpu.memory_space<vmem>>) attributes {dimension_semantics = [], scalar_prefetch = 0 : i64, scratch_operands = 2 : i64, tpu.core_type = #tpu.core_type<tc>} {
    %c0 = arith.constant 0 : index
    %c0_0 = arith.constant 0 : index
    %0 = vector.load %arg0[%c0, %c0_0] : memref<16x20xf32, #tpu.memory_space<vmem>>, vector<16x20xf32>
    %1 = arith.truncf %0 : vector<16x20xf32> to vector<16x20xbf16>
    %c0_1 = arith.constant 0 : index
    %c0_2 = arith.constant 0 : index
    %2 = vector.load %arg2[%c0_1, %c0_2] : memref<20x768xbf16, #tpu.memory_space<vmem>>, vector<20x768xbf16>
    %cst = arith.constant dense<0.000000e+00> : vector<16x768xf32>
    %3 = tpu.matmul %1, %2, %cst {dimension_numbers = #tpu.dot_dimension_numbers<[1], [0], [0], [1], [0, 0, 1, 1], [], []>} : vector<16x20xbf16>, vector<20x768xbf16>, vector<16x768xf32> -> vector<16x768xf32>
    %c0_3 = arith.constant 0 : index
    %c0_4 = arith.constant 0 : index
    %4 = vector.load %arg3[%c0_3, %c0_4] : memref<1x768xf32, #tpu.memory_space<vmem>>, vector<1x768xf32>
    %5 = vector.broadcast %4 : vector<1x768xf32> to vector<16x768xf32>
    %6 = arith.addf %3, %5 : vector<16x768xf32>
    %7 = vector.extract_strided_slice %6 {offsets = [0, 0], sizes = [16, 256], strides = [1, 1]} : vector<16x768xf32> to vector<16x256xf32>
    %8 = vector.extract_strided_slice %6 {offsets = [0, 256], sizes = [16, 256], strides = [1, 1]} : vector<16x768xf32> to vector<16x256xf32>
    %9 = vector.extract_strided_slice %6 {offsets = [0, 512], sizes = [16, 256], strides = [1, 1]} : vector<16x768xf32> to vector<16x256xf32>
    %10 = vector.extract_strided_slice %7 {offsets = [0, 0], sizes = [8, 256], strides = [1, 1]} : vector<16x256xf32> to vector<8x256xf32>
    %11 = vector.extract_strided_slice %8 {offsets = [0, 0], sizes = [8, 256], strides = [1, 1]} : vector<16x256xf32> to vector<8x256xf32>
    %12 = vector.extract_strided_slice %10 {offsets = [0, 0], sizes = [8, 64], strides = [1, 1]} : vector<8x256xf32> to vector<8x64xf32>
    %13 = vector.extract_strided_slice %11 {offsets = [0, 0], sizes = [8, 64], strides = [1, 1]} : vector<8x256xf32> to vector<8x64xf32>
    %14 = tpu.transpose %13, [1, 0] : vector<8x64xf32> -> vector<64x8xf32>
    %cst_5 = arith.constant dense<0.000000e+00> : vector<8x8xf32>
    %15 = tpu.matmul %12, %14, %cst_5 {dimension_numbers = #tpu.dot_dimension_numbers<[1], [0], [0], [1], [0, 0, 1, 1], [], []>} : vector<8x64xf32>, vector<64x8xf32>, vector<8x8xf32> -> vector<8x8xf32>
    %cst_6 = arith.constant 1.250000e-01 : f32
    %16 = vector.broadcast %cst_6 : f32 to vector<8x8xf32>
    %17 = arith.mulf %15, %16 : vector<8x8xf32>
    %c0_7 = arith.constant 0 : index
    %c0_8 = arith.constant 0 : index
    %18 = vector.load %arg16[%c0_7, %c0_8] : memref<64x8xf32, #tpu.memory_space<vmem>>, vector<8x8xf32>
    tpu.vector_store %arg16[%c0_7, %c0_8], %17 {strides = array<i32>} : memref<64x8xf32, #tpu.memory_space<vmem>>, vector<8x8xf32>,
    %19 = vector.extract_strided_slice %10 {offsets = [0, 64], sizes = [8, 64], strides = [1, 1]} : vector<8x256xf32> to vector<8x64xf32>
    %20 = vector.extract_strided_slice %11 {offsets = [0, 64], sizes = [8, 64], strides = [1, 1]} : vector<8x256xf32> to vector<8x64xf32>
    %21 = tpu.transpose %20, [1, 0] : vector<8x64xf32> -> vector<64x8xf32>
    %cst_9 = arith.constant dense<0.000000e+00> : vector<8x8xf32>
    %22 = tpu.matmul %19, %21, %cst_9 {dimension_numbers = #tpu.dot_dimension_numbers<[1], [0], [0], [1], [0, 0, 1, 1], [], []>} : vector<8x64xf32>, vector<64x8xf32>, vector<8x8xf32> -> vector<8x8xf32>
    %cst_10 = arith.constant 1.250000e-01 : f32
    %23 = vector.broadcast %cst_10 : f32 to vector<8x8xf32>
    %24 = arith.mulf %22, %23 : vector<8x8xf32>
    %c8 = arith.constant 8 : index
    %c0_11 = arith.constant 0 : index
    %25 = vector.load %arg16[%c8, %c0_11] : memref<64x8xf32, #tpu.memory_space<vmem>>, vector<8x8xf32>
    tpu.vector_store %arg16[%c8, %c0_11], %24 {strides = array<i32>} : memref<64x8xf32, #tpu.memory_space<vmem>>, vector<8x8xf32>,
    %26 = vector.extract_strided_slice %10 {offsets = [0, 128], sizes = [8, 64], strides = [1, 1]} : vector<8x256xf32> to vector<8x64xf32>
    %27 = vector.extract_strided_slice %11 {offsets = [0, 128], sizes = [8, 64], strides = [1, 1]} : vector<8x256xf32> to vector<8x64xf32>
    %28 = tpu.transpose %27, [1, 0] : vector<8x64xf32> -> vector<64x8xf32>
    %cst_12 = arith.constant dense<0.000000e+00> : vector<8x8xf32>
    %29 = tpu.matmul %26, %28, %cst_12 {dimension_numbers = #tpu.dot_dimension_numbers<[1], [0], [0], [1], [0, 0, 1, 1], [], []>} : vector<8x64xf32>, vector<64x8xf32>, vector<8x8xf32> -> vector<8x8xf32>
    %cst_13 = arith.constant 1.250000e-01 : f32
    %30 = vector.broadcast %cst_13 : f32 to vector<8x8xf32>
    %31 = arith.mulf %29, %30 : vector<8x8xf32>
    %c16 = arith.constant 16 : index
    %c0_14 = arith.constant 0 : index
    %32 = vector.load %arg16[%c16, %c0_14] : memref<64x8xf32, #tpu.memory_space<vmem>>, vector<8x8xf32>
    tpu.vector_store %arg16[%c16, %c0_14], %31 {strides = array<i32>} : memref<64x8xf32, #tpu.memory_space<vmem>>, vector<8x8xf32>,
    %33 = vector.extract_strided_slice %10 {offsets = [0, 192], sizes = [8, 64], strides = [1, 1]} : vector<8x256xf32> to vector<8x64xf32>
    %34 = vector.extract_strided_slice %11 {offsets = [0, 192], sizes = [8, 64], strides = [1, 1]} : vector<8x256xf32> to vector<8x64xf32>
    %35 = tpu.transpose %34, [1, 0] : vector<8x64xf32> -> vector<64x8xf32>
    %cst_15 = arith.constant dense<0.000000e+00> : vector<8x8xf32>
    %36 = tpu.matmul %33, %35, %cst_15 {dimension_numbers = #tpu.dot_dimension_numbers<[1], [0], [0], [1], [0, 0, 1, 1], [], []>} : vector<8x64xf32>, vector<64x8xf32>, vector<8x8xf32> -> vector<8x8xf32>
    %cst_16 = arith.constant 1.250000e-01 : f32
    %37 = vector.broadcast %cst_16 : f32 to vector<8x8xf32>
    %38 = arith.mulf %36, %37 : vector<8x8xf32>
    %c24 = arith.constant 24 : index
    %c0_17 = arith.constant 0 : index
    %39 = vector.load %arg16[%c24, %c0_17] : memref<64x8xf32, #tpu.memory_space<vmem>>, vector<8x8xf32>
    tpu.vector_store %arg16[%c24, %c0_17], %38 {strides = array<i32>} : memref<64x8xf32, #tpu.memory_space<vmem>>, vector<8x8xf32>,
    %40 = vector.extract_strided_slice %7 {offsets = [8, 0], sizes = [8, 256], strides = [1, 1]} : vector<16x256xf32> to vector<8x256xf32>
    %41 = vector.extract_strided_slice %8 {offsets = [8, 0], sizes = [8, 256], strides = [1, 1]} : vector<16x256xf32> to vector<8x256xf32>
    %42 = vector.extract_strided_slice %40 {offsets = [0, 0], sizes = [8, 64], strides = [1, 1]} : vector<8x256xf32> to vector<8x64xf32>
    %43 = vector.extract_strided_slice %41 {offsets = [0, 0], sizes = [8, 64], strides = [1, 1]} : vector<8x256xf32> to vector<8x64xf32>
    %44 = tpu.transpose %43, [1, 0] : vector<8x64xf32> -> vector<64x8xf32>
    %cst_18 = arith.constant dense<0.000000e+00> : vector<8x8xf32>
    %45 = tpu.matmul %42, %44, %cst_18 {dimension_numbers = #tpu.dot_dimension_numbers<[1], [0], [0], [1], [0, 0, 1, 1], [], []>} : vector<8x64xf32>, vector<64x8xf32>, vector<8x8xf32> -> vector<8x8xf32>
    %cst_19 = arith.constant 1.250000e-01 : f32
    %46 = vector.broadcast %cst_19 : f32 to vector<8x8xf32>
    %47 = arith.mulf %45, %46 : vector<8x8xf32>
    %c32 = arith.constant 32 : index
    %c0_20 = arith.constant 0 : index
    %48 = vector.load %arg16[%c32, %c0_20] : memref<64x8xf32, #tpu.memory_space<vmem>>, vector<8x8xf32>
    tpu.vector_store %arg16[%c32, %c0_20], %47 {strides = array<i32>} : memref<64x8xf32, #tpu.memory_space<vmem>>, vector<8x8xf32>,
    %49 = vector.extract_strided_slice %40 {offsets = [0, 64], sizes = [8, 64], strides = [1, 1]} : vector<8x256xf32> to vector<8x64xf32>
    %50 = vector.extract_strided_slice %41 {offsets = [0, 64], sizes = [8, 64], strides = [1, 1]} : vector<8x256xf32> to vector<8x64xf32>
    %51 = tpu.transpose %50, [1, 0] : vector<8x64xf32> -> vector<64x8xf32>
    %cst_21 = arith.constant dense<0.000000e+00> : vector<8x8xf32>
    %52 = tpu.matmul %49, %51, %cst_21 {dimension_numbers = #tpu.dot_dimension_numbers<[1], [0], [0], [1], [0, 0, 1, 1], [], []>} : vector<8x64xf32>, vector<64x8xf32>, vector<8x8xf32> -> vector<8x8xf32>
    %cst_22 = arith.constant 1.250000e-01 : f32
    %53 = vector.broadcast %cst_22 : f32 to vector<8x8xf32>
    %54 = arith.mulf %52, %53 : vector<8x8xf32>
    %c40 = arith.constant 40 : index
    %c0_23 = arith.constant 0 : index
    %55 = vector.load %arg16[%c40, %c0_23] : memref<64x8xf32, #tpu.memory_space<vmem>>, vector<8x8xf32>
    tpu.vector_store %arg16[%c40, %c0_23], %54 {strides = array<i32>} : memref<64x8xf32, #tpu.memory_space<vmem>>, vector<8x8xf32>,
    %56 = vector.extract_strided_slice %40 {offsets = [0, 128], sizes = [8, 64], strides = [1, 1]} : vector<8x256xf32> to vector<8x64xf32>
    %57 = vector.extract_strided_slice %41 {offsets = [0, 128], sizes = [8, 64], strides = [1, 1]} : vector<8x256xf32> to vector<8x64xf32>
    %58 = tpu.transpose %57, [1, 0] : vector<8x64xf32> -> vector<64x8xf32>
    %cst_24 = arith.constant dense<0.000000e+00> : vector<8x8xf32>
    %59 = tpu.matmul %56, %58, %cst_24 {dimension_numbers = #tpu.dot_dimension_numbers<[1], [0], [0], [1], [0, 0, 1, 1], [], []>} : vector<8x64xf32>, vector<64x8xf32>, vector<8x8xf32> -> vector<8x8xf32>
    %cst_25 = arith.constant 1.250000e-01 : f32
    %60 = vector.broadcast %cst_25 : f32 to vector<8x8xf32>
    %61 = arith.mulf %59, %60 : vector<8x8xf32>
    %c48 = arith.constant 48 : index
    %c0_26 = arith.constant 0 : index
    %62 = vector.load %arg16[%c48, %c0_26] : memref<64x8xf32, #tpu.memory_space<vmem>>, vector<8x8xf32>
    tpu.vector_store %arg16[%c48, %c0_26], %61 {strides = array<i32>} : memref<64x8xf32, #tpu.memory_space<vmem>>, vector<8x8xf32>,
    %63 = vector.extract_strided_slice %40 {offsets = [0, 192], sizes = [8, 64], strides = [1, 1]} : vector<8x256xf32> to vector<8x64xf32>
    %64 = vector.extract_strided_slice %41 {offsets = [0, 192], sizes = [8, 64], strides = [1, 1]} : vector<8x256xf32> to vector<8x64xf32>
    %65 = tpu.transpose %64, [1, 0] : vector<8x64xf32> -> vector<64x8xf32>
    %cst_27 = arith.constant dense<0.000000e+00> : vector<8x8xf32>
    %66 = tpu.matmul %63, %65, %cst_27 {dimension_numbers = #tpu.dot_dimension_numbers<[1], [0], [0], [1], [0, 0, 1, 1], [], []>} : vector<8x64xf32>, vector<64x8xf32>, vector<8x8xf32> -> vector<8x8xf32>
    %cst_28 = arith.constant 1.250000e-01 : f32
    %67 = vector.broadcast %cst_28 : f32 to vector<8x8xf32>
    %68 = arith.mulf %66, %67 : vector<8x8xf32>
    %c56 = arith.constant 56 : index
    %c0_29 = arith.constant 0 : index
    %69 = vector.load %arg16[%c56, %c0_29] : memref<64x8xf32, #tpu.memory_space<vmem>>, vector<8x8xf32>
    tpu.vector_store %arg16[%c56, %c0_29], %68 {strides = array<i32>} : memref<64x8xf32, #tpu.memory_space<vmem>>, vector<8x8xf32>,
    %c0_30 = arith.constant 0 : index
    %c0_31 = arith.constant 0 : index
    %70 = vector.load %arg16[%c0_30, %c0_31] : memref<64x8xf32, #tpu.memory_space<vmem>>, vector<64x8xf32>
    %cst_32 = arith.constant dense<0xFF800000> : vector<64xf32>
    %71 = vector.multi_reduction <maximumf>, %70, %cst_32 [1] : vector<64x8xf32> to vector<64xf32>
    %72 = vector.shape_cast %71 : vector<64xf32> to vector<64x1xf32>
    %73 = vector.broadcast %72 : vector<64x1xf32> to vector<64x8xf32>
    %74 = arith.subf %70, %73 : vector<64x8xf32>
    %75 = math.exp %74 : vector<64x8xf32>
    %cst_33 = arith.constant dense<0.000000e+00> : vector<64xf32>
    %76 = vector.multi_reduction <add>, %75, %cst_33 [1] : vector<64x8xf32> to vector<64xf32>
    %77 = vector.shape_cast %76 : vector<64xf32> to vector<64x1xf32>
    %78 = tpu.reciprocal %77 {approx = true} : vector<64x1xf32> -> vector<64x1xf32>
    %79 = vector.broadcast %78 : vector<64x1xf32> to vector<64x8xf32>
    %80 = arith.mulf %75, %79 : vector<64x8xf32>
    %81 = vector.extract_strided_slice %9 {offsets = [0, 0], sizes = [8, 256], strides = [1, 1]} : vector<16x256xf32> to vector<8x256xf32>
    %cst_34 = arith.constant 0.000000e+00 : f32
    %82 = vector.broadcast %cst_34 : f32 to vector<8x256xf32>
    %83 = vector.extract_strided_slice %80 {offsets = [0, 0], sizes = [8, 8], strides = [1, 1]} : vector<64x8xf32> to vector<8x8xf32>
    %84 = vector.extract_strided_slice %81 {offsets = [0, 0], sizes = [8, 64], strides = [1, 1]} : vector<8x256xf32> to vector<8x64xf32>
    %cst_35 = arith.constant dense<0.000000e+00> : vector<8x64xf32>
    %85 = tpu.matmul %83, %84, %cst_35 {dimension_numbers = #tpu.dot_dimension_numbers<[1], [0], [0], [1], [0, 0, 1, 1], [], []>} : vector<8x8xf32>, vector<8x64xf32>, vector<8x64xf32> -> vector<8x64xf32>
    %86 = arith.truncf %85 : vector<8x64xf32> to vector<8x64xbf16>
    %c0_36 = arith.constant 0 : index
    %c0_37 = arith.constant 0 : index
    %87 = vector.load %arg4[%c0_36, %c0_37] : memref<256x256xbf16, #tpu.memory_space<vmem>>, vector<64x256xbf16>
    %cst_38 = arith.constant dense<0.000000e+00> : vector<8x256xf32>
    %88 = tpu.matmul %86, %87, %cst_38 {dimension_numbers = #tpu.dot_dimension_numbers<[1], [0], [0], [1], [0, 0, 1, 1], [], []>} : vector<8x64xbf16>, vector<64x256xbf16>, vector<8x256xf32> -> vector<8x256xf32>
    %89 = arith.addf %82, %88 : vector<8x256xf32>
    %90 = vector.extract_strided_slice %80 {offsets = [8, 0], sizes = [8, 8], strides = [1, 1]} : vector<64x8xf32> to vector<8x8xf32>
    %91 = vector.extract_strided_slice %81 {offsets = [0, 64], sizes = [8, 64], strides = [1, 1]} : vector<8x256xf32> to vector<8x64xf32>
    %cst_39 = arith.constant dense<0.000000e+00> : vector<8x64xf32>
    %92 = tpu.matmul %90, %91, %cst_39 {dimension_numbers = #tpu.dot_dimension_numbers<[1], [0], [0], [1], [0, 0, 1, 1], [], []>} : vector<8x8xf32>, vector<8x64xf32>, vector<8x64xf32> -> vector<8x64xf32>
    %93 = arith.truncf %92 : vector<8x64xf32> to vector<8x64xbf16>
    %c64 = arith.constant 64 : index
    %c0_40 = arith.constant 0 : index
    %94 = vector.load %arg4[%c64, %c0_40] : memref<256x256xbf16, #tpu.memory_space<vmem>>, vector<64x256xbf16>
    %cst_41 = arith.constant dense<0.000000e+00> : vector<8x256xf32>
    %95 = tpu.matmul %93, %94, %cst_41 {dimension_numbers = #tpu.dot_dimension_numbers<[1], [0], [0], [1], [0, 0, 1, 1], [], []>} : vector<8x64xbf16>, vector<64x256xbf16>, vector<8x256xf32> -> vector<8x256xf32>
    %96 = arith.addf %89, %95 : vector<8x256xf32>
    %97 = vector.extract_strided_slice %80 {offsets = [16, 0], sizes = [8, 8], strides = [1, 1]} : vector<64x8xf32> to vector<8x8xf32>
    %98 = vector.extract_strided_slice %81 {offsets = [0, 128], sizes = [8, 64], strides = [1, 1]} : vector<8x256xf32> to vector<8x64xf32>
    %cst_42 = arith.constant dense<0.000000e+00> : vector<8x64xf32>
    %99 = tpu.matmul %97, %98, %cst_42 {dimension_numbers = #tpu.dot_dimension_numbers<[1], [0], [0], [1], [0, 0, 1, 1], [], []>} : vector<8x8xf32>, vector<8x64xf32>, vector<8x64xf32> -> vector<8x64xf32>
    %100 = arith.truncf %99 : vector<8x64xf32> to vector<8x64xbf16>
    %c128 = arith.constant 128 : index
    %c0_43 = arith.constant 0 : index
    %101 = vector.load %arg4[%c128, %c0_43] : memref<256x256xbf16, #tpu.memory_space<vmem>>, vector<64x256xbf16>
    %cst_44 = arith.constant dense<0.000000e+00> : vector<8x256xf32>
    %102 = tpu.matmul %100, %101, %cst_44 {dimension_numbers = #tpu.dot_dimension_numbers<[1], [0], [0], [1], [0, 0, 1, 1], [], []>} : vector<8x64xbf16>, vector<64x256xbf16>, vector<8x256xf32> -> vector<8x256xf32>
    %103 = arith.addf %96, %102 : vector<8x256xf32>
    %104 = vector.extract_strided_slice %80 {offsets = [24, 0], sizes = [8, 8], strides = [1, 1]} : vector<64x8xf32> to vector<8x8xf32>
    %105 = vector.extract_strided_slice %81 {offsets = [0, 192], sizes = [8, 64], strides = [1, 1]} : vector<8x256xf32> to vector<8x64xf32>
    %cst_45 = arith.constant dense<0.000000e+00> : vector<8x64xf32>
    %106 = tpu.matmul %104, %105, %cst_45 {dimension_numbers = #tpu.dot_dimension_numbers<[1], [0], [0], [1], [0, 0, 1, 1], [], []>} : vector<8x8xf32>, vector<8x64xf32>, vector<8x64xf32> -> vector<8x64xf32>
    %107 = arith.truncf %106 : vector<8x64xf32> to vector<8x64xbf16>
    %c192 = arith.constant 192 : index
    %c0_46 = arith.constant 0 : index
    %108 = vector.load %arg4[%c192, %c0_46] : memref<256x256xbf16, #tpu.memory_space<vmem>>, vector<64x256xbf16>
    %cst_47 = arith.constant dense<0.000000e+00> : vector<8x256xf32>
    %109 = tpu.matmul %107, %108, %cst_47 {dimension_numbers = #tpu.dot_dimension_numbers<[1], [0], [0], [1], [0, 0, 1, 1], [], []>} : vector<8x64xbf16>, vector<64x256xbf16>, vector<8x256xf32> -> vector<8x256xf32>
    %110 = arith.addf %103, %109 : vector<8x256xf32>
    %c0_48 = arith.constant 0 : index
    %c0_49 = arith.constant 0 : index
    %111 = vector.load %arg5[%c0_48, %c0_49] : memref<1x256xf32, #tpu.memory_space<vmem>>, vector<1x256xf32>
    %112 = vector.broadcast %111 : vector<1x256xf32> to vector<8x256xf32>
    %113 = arith.addf %110, %112 : vector<8x256xf32>
    %c0_50 = arith.constant 0 : index
    %c0_51 = arith.constant 0 : index
    %c0_52 = arith.constant 0 : index
    %114 = vector.load %arg17[%c0_50, %c0_51, %c0_52] : memref<2x8x256xf32, #tpu.memory_space<vmem>>, vector<1x8x256xf32>
    %115 = vector.shape_cast %114 : vector<1x8x256xf32> to vector<8x256xf32>
    %116 = vector.shape_cast %113 : vector<8x256xf32> to vector<1x8x256xf32>
    tpu.vector_store %arg17[%c0_50, %c0_51, %c0_52], %116 {strides = array<i32>} : memref<2x8x256xf32, #tpu.memory_space<vmem>>, vector<1x8x256xf32>,
    %117 = vector.extract_strided_slice %9 {offsets = [8, 0], sizes = [8, 256], strides = [1, 1]} : vector<16x256xf32> to vector<8x256xf32>
    %cst_53 = arith.constant 0.000000e+00 : f32
    %118 = vector.broadcast %cst_53 : f32 to vector<8x256xf32>
    %119 = vector.extract_strided_slice %80 {offsets = [32, 0], sizes = [8, 8], strides = [1, 1]} : vector<64x8xf32> to vector<8x8xf32>
    %120 = vector.extract_strided_slice %117 {offsets = [0, 0], sizes = [8, 64], strides = [1, 1]} : vector<8x256xf32> to vector<8x64xf32>
    %cst_54 = arith.constant dense<0.000000e+00> : vector<8x64xf32>
    %121 = tpu.matmul %119, %120, %cst_54 {dimension_numbers = #tpu.dot_dimension_numbers<[1], [0], [0], [1], [0, 0, 1, 1], [], []>} : vector<8x8xf32>, vector<8x64xf32>, vector<8x64xf32> -> vector<8x64xf32>
    %122 = arith.truncf %121 : vector<8x64xf32> to vector<8x64xbf16>
    %c0_55 = arith.constant 0 : index
    %c0_56 = arith.constant 0 : index
    %123 = vector.load %arg4[%c0_55, %c0_56] : memref<256x256xbf16, #tpu.memory_space<vmem>>, vector<64x256xbf16>
    %cst_57 = arith.constant dense<0.000000e+00> : vector<8x256xf32>
    %124 = tpu.matmul %122, %123, %cst_57 {dimension_numbers = #tpu.dot_dimension_numbers<[1], [0], [0], [1], [0, 0, 1, 1], [], []>} : vector<8x64xbf16>, vector<64x256xbf16>, vector<8x256xf32> -> vector<8x256xf32>
    %125 = arith.addf %118, %124 : vector<8x256xf32>
    %126 = vector.extract_strided_slice %80 {offsets = [40, 0], sizes = [8, 8], strides = [1, 1]} : vector<64x8xf32> to vector<8x8xf32>
    %127 = vector.extract_strided_slice %117 {offsets = [0, 64], sizes = [8, 64], strides = [1, 1]} : vector<8x256xf32> to vector<8x64xf32>
    %cst_58 = arith.constant dense<0.000000e+00> : vector<8x64xf32>
    %128 = tpu.matmul %126, %127, %cst_58 {dimension_numbers = #tpu.dot_dimension_numbers<[1], [0], [0], [1], [0, 0, 1, 1], [], []>} : vector<8x8xf32>, vector<8x64xf32>, vector<8x64xf32> -> vector<8x64xf32>
    %129 = arith.truncf %128 : vector<8x64xf32> to vector<8x64xbf16>
    %c64_59 = arith.constant 64 : index
    %c0_60 = arith.constant 0 : index
    %130 = vector.load %arg4[%c64_59, %c0_60] : memref<256x256xbf16, #tpu.memory_space<vmem>>, vector<64x256xbf16>
    %cst_61 = arith.constant dense<0.000000e+00> : vector<8x256xf32>
    %131 = tpu.matmul %129, %130, %cst_61 {dimension_numbers = #tpu.dot_dimension_numbers<[1], [0], [0], [1], [0, 0, 1, 1], [], []>} : vector<8x64xbf16>, vector<64x256xbf16>, vector<8x256xf32> -> vector<8x256xf32>
    %132 = arith.addf %125, %131 : vector<8x256xf32>
    %133 = vector.extract_strided_slice %80 {offsets = [48, 0], sizes = [8, 8], strides = [1, 1]} : vector<64x8xf32> to vector<8x8xf32>
    %134 = vector.extract_strided_slice %117 {offsets = [0, 128], sizes = [8, 64], strides = [1, 1]} : vector<8x256xf32> to vector<8x64xf32>
    %cst_62 = arith.constant dense<0.000000e+00> : vector<8x64xf32>
    %135 = tpu.matmul %133, %134, %cst_62 {dimension_numbers = #tpu.dot_dimension_numbers<[1], [0], [0], [1], [0, 0, 1, 1], [], []>} : vector<8x8xf32>, vector<8x64xf32>, vector<8x64xf32> -> vector<8x64xf32>
    %136 = arith.truncf %135 : vector<8x64xf32> to vector<8x64xbf16>
    %c128_63 = arith.constant 128 : index
    %c0_64 = arith.constant 0 : index
    %137 = vector.load %arg4[%c128_63, %c0_64] : memref<256x256xbf16, #tpu.memory_space<vmem>>, vector<64x256xbf16>
    %cst_65 = arith.constant dense<0.000000e+00> : vector<8x256xf32>
    %138 = tpu.matmul %136, %137, %cst_65 {dimension_numbers = #tpu.dot_dimension_numbers<[1], [0], [0], [1], [0, 0, 1, 1], [], []>} : vector<8x64xbf16>, vector<64x256xbf16>, vector<8x256xf32> -> vector<8x256xf32>
    %139 = arith.addf %132, %138 : vector<8x256xf32>
    %140 = vector.extract_strided_slice %80 {offsets = [56, 0], sizes = [8, 8], strides = [1, 1]} : vector<64x8xf32> to vector<8x8xf32>
    %141 = vector.extract_strided_slice %117 {offsets = [0, 192], sizes = [8, 64], strides = [1, 1]} : vector<8x256xf32> to vector<8x64xf32>
    %cst_66 = arith.constant dense<0.000000e+00> : vector<8x64xf32>
    %142 = tpu.matmul %140, %141, %cst_66 {dimension_numbers = #tpu.dot_dimension_numbers<[1], [0], [0], [1], [0, 0, 1, 1], [], []>} : vector<8x8xf32>, vector<8x64xf32>, vector<8x64xf32> -> vector<8x64xf32>
    %143 = arith.truncf %142 : vector<8x64xf32> to vector<8x64xbf16>
    %c192_67 = arith.constant 192 : index
    %c0_68 = arith.constant 0 : index
    %144 = vector.load %arg4[%c192_67, %c0_68] : memref<256x256xbf16, #tpu.memory_space<vmem>>, vector<64x256xbf16>
    %cst_69 = arith.constant dense<0.000000e+00> : vector<8x256xf32>
    %145 = tpu.matmul %143, %144, %cst_69 {dimension_numbers = #tpu.dot_dimension_numbers<[1], [0], [0], [1], [0, 0, 1, 1], [], []>} : vector<8x64xbf16>, vector<64x256xbf16>, vector<8x256xf32> -> vector<8x256xf32>
    %146 = arith.addf %139, %145 : vector<8x256xf32>
    %c0_70 = arith.constant 0 : index
    %c0_71 = arith.constant 0 : index
    %147 = vector.load %arg5[%c0_70, %c0_71] : memref<1x256xf32, #tpu.memory_space<vmem>>, vector<1x256xf32>
    %148 = vector.broadcast %147 : vector<1x256xf32> to vector<8x256xf32>
    %149 = arith.addf %146, %148 : vector<8x256xf32>
    %c1 = arith.constant 1 : index
    %c0_72 = arith.constant 0 : index
    %c0_73 = arith.constant 0 : index
    %150 = vector.load %arg17[%c1, %c0_72, %c0_73] : memref<2x8x256xf32, #tpu.memory_space<vmem>>, vector<1x8x256xf32>
    %151 = vector.shape_cast %150 : vector<1x8x256xf32> to vector<8x256xf32>
    %152 = vector.shape_cast %149 : vector<8x256xf32> to vector<1x8x256xf32>
    tpu.vector_store %arg17[%c1, %c0_72, %c0_73], %152 {strides = array<i32>} : memref<2x8x256xf32, #tpu.memory_space<vmem>>, vector<1x8x256xf32>,
    %cst_74 = arith.constant 0.000000e+00 : f32
    %153 = vector.broadcast %cst_74 : f32 to vector<2x512xf32>
    %c0_75 = arith.constant 0 : index
    %c0_76 = arith.constant 0 : index
    %c0_77 = arith.constant 0 : index
    %154 = vector.load %arg17[%c0_75, %c0_76, %c0_77] : memref<2x8x256xf32, #tpu.memory_space<vmem>>, vector<2x1x256xf32>
    %155 = vector.shape_cast %154 : vector<2x1x256xf32> to vector<2x256xf32>
    %156 = arith.truncf %155 : vector<2x256xf32> to vector<2x256xbf16>
    %c0_78 = arith.constant 0 : index
    %c0_79 = arith.constant 0 : index
    %157 = vector.load %arg6[%c0_78, %c0_79] : memref<2048x512xbf16, #tpu.memory_space<vmem>>, vector<256x512xbf16>
    %cst_80 = arith.constant dense<0.000000e+00> : vector<2x512xf32>
    %158 = tpu.matmul %156, %157, %cst_80 {dimension_numbers = #tpu.dot_dimension_numbers<[1], [0], [0], [1], [0, 0, 1, 1], [], []>} : vector<2x256xbf16>, vector<256x512xbf16>, vector<2x512xf32> -> vector<2x512xf32>
    %159 = arith.addf %153, %158 : vector<2x512xf32>
    %c0_81 = arith.constant 0 : index
    %c1_82 = arith.constant 1 : index
    %c0_83 = arith.constant 0 : index
    %160 = vector.load %arg17[%c0_81, %c1_82, %c0_83] : memref<2x8x256xf32, #tpu.memory_space<vmem>>, vector<2x1x256xf32>
    %161 = vector.shape_cast %160 : vector<2x1x256xf32> to vector<2x256xf32>
    %162 = arith.truncf %161 : vector<2x256xf32> to vector<2x256xbf16>
    %c256 = arith.constant 256 : index
    %c0_84 = arith.constant 0 : index
    %163 = vector.load %arg6[%c256, %c0_84] : memref<2048x512xbf16, #tpu.memory_space<vmem>>, vector<256x512xbf16>
    %cst_85 = arith.constant dense<0.000000e+00> : vector<2x512xf32>
    %164 = tpu.matmul %162, %163, %cst_85 {dimension_numbers = #tpu.dot_dimension_numbers<[1], [0], [0], [1], [0, 0, 1, 1], [], []>} : vector<2x256xbf16>, vector<256x512xbf16>, vector<2x512xf32> -> vector<2x512xf32>
    %165 = arith.addf %159, %164 : vector<2x512xf32>
    %c0_86 = arith.constant 0 : index
    %c2 = arith.constant 2 : index
    %c0_87 = arith.constant 0 : index
    %166 = vector.load %arg17[%c0_86, %c2, %c0_87] : memref<2x8x256xf32, #tpu.memory_space<vmem>>, vector<2x1x256xf32>
    %167 = vector.shape_cast %166 : vector<2x1x256xf32> to vector<2x256xf32>
    %168 = arith.truncf %167 : vector<2x256xf32> to vector<2x256xbf16>
    %c512 = arith.constant 512 : index
    %c0_88 = arith.constant 0 : index
    %169 = vector.load %arg6[%c512, %c0_88] : memref<2048x512xbf16, #tpu.memory_space<vmem>>, vector<256x512xbf16>
    %cst_89 = arith.constant dense<0.000000e+00> : vector<2x512xf32>
    %170 = tpu.matmul %168, %169, %cst_89 {dimension_numbers = #tpu.dot_dimension_numbers<[1], [0], [0], [1], [0, 0, 1, 1], [], []>} : vector<2x256xbf16>, vector<256x512xbf16>, vector<2x512xf32> -> vector<2x512xf32>
    %171 = arith.addf %165, %170 : vector<2x512xf32>
    %c0_90 = arith.constant 0 : index
    %c3 = arith.constant 3 : index
    %c0_91 = arith.constant 0 : index
    %172 = vector.load %arg17[%c0_90, %c3, %c0_91] : memref<2x8x256xf32, #tpu.memory_space<vmem>>, vector<2x1x256xf32>
    %173 = vector.shape_cast %172 : vector<2x1x256xf32> to vector<2x256xf32>
    %174 = arith.truncf %173 : vector<2x256xf32> to vector<2x256xbf16>
    %c768 = arith.constant 768 : index
    %c0_92 = arith.constant 0 : index
    %175 = vector.load %arg6[%c768, %c0_92] : memref<2048x512xbf16, #tpu.memory_space<vmem>>, vector<256x512xbf16>
    %cst_93 = arith.constant dense<0.000000e+00> : vector<2x512xf32>
    %176 = tpu.matmul %174, %175, %cst_93 {dimension_numbers = #tpu.dot_dimension_numbers<[1], [0], [0], [1], [0, 0, 1, 1], [], []>} : vector<2x256xbf16>, vector<256x512xbf16>, vector<2x512xf32> -> vector<2x512xf32>
    %177 = arith.addf %171, %176 : vector<2x512xf32>
    %c0_94 = arith.constant 0 : index
    %c4 = arith.constant 4 : index
    %c0_95 = arith.constant 0 : index
    %178 = vector.load %arg17[%c0_94, %c4, %c0_95] : memref<2x8x256xf32, #tpu.memory_space<vmem>>, vector<2x1x256xf32>
    %179 = vector.shape_cast %178 : vector<2x1x256xf32> to vector<2x256xf32>
    %180 = arith.truncf %179 : vector<2x256xf32> to vector<2x256xbf16>
    %c1024 = arith.constant 1024 : index
    %c0_96 = arith.constant 0 : index
    %181 = vector.load %arg6[%c1024, %c0_96] : memref<2048x512xbf16, #tpu.memory_space<vmem>>, vector<256x512xbf16>
    %cst_97 = arith.constant dense<0.000000e+00> : vector<2x512xf32>
    %182 = tpu.matmul %180, %181, %cst_97 {dimension_numbers = #tpu.dot_dimension_numbers<[1], [0], [0], [1], [0, 0, 1, 1], [], []>} : vector<2x256xbf16>, vector<256x512xbf16>, vector<2x512xf32> -> vector<2x512xf32>
    %183 = arith.addf %177, %182 : vector<2x512xf32>
    %c0_98 = arith.constant 0 : index
    %c5 = arith.constant 5 : index
    %c0_99 = arith.constant 0 : index
    %184 = vector.load %arg17[%c0_98, %c5, %c0_99] : memref<2x8x256xf32, #tpu.memory_space<vmem>>, vector<2x1x256xf32>
    %185 = vector.shape_cast %184 : vector<2x1x256xf32> to vector<2x256xf32>
    %186 = arith.truncf %185 : vector<2x256xf32> to vector<2x256xbf16>
    %c1280 = arith.constant 1280 : index
    %c0_100 = arith.constant 0 : index
    %187 = vector.load %arg6[%c1280, %c0_100] : memref<2048x512xbf16, #tpu.memory_space<vmem>>, vector<256x512xbf16>
    %cst_101 = arith.constant dense<0.000000e+00> : vector<2x512xf32>
    %188 = tpu.matmul %186, %187, %cst_101 {dimension_numbers = #tpu.dot_dimension_numbers<[1], [0], [0], [1], [0, 0, 1, 1], [], []>} : vector<2x256xbf16>, vector<256x512xbf16>, vector<2x512xf32> -> vector<2x512xf32>
    %189 = arith.addf %183, %188 : vector<2x512xf32>
    %c0_102 = arith.constant 0 : index
    %c6 = arith.constant 6 : index
    %c0_103 = arith.constant 0 : index
    %190 = vector.load %arg17[%c0_102, %c6, %c0_103] : memref<2x8x256xf32, #tpu.memory_space<vmem>>, vector<2x1x256xf32>
    %191 = vector.shape_cast %190 : vector<2x1x256xf32> to vector<2x256xf32>
    %192 = arith.truncf %191 : vector<2x256xf32> to vector<2x256xbf16>
    %c1536 = arith.constant 1536 : index
    %c0_104 = arith.constant 0 : index
    %193 = vector.load %arg6[%c1536, %c0_104] : memref<2048x512xbf16, #tpu.memory_space<vmem>>, vector<256x512xbf16>
    %cst_105 = arith.constant dense<0.000000e+00> : vector<2x512xf32>
    %194 = tpu.matmul %192, %193, %cst_105 {dimension_numbers = #tpu.dot_dimension_numbers<[1], [0], [0], [1], [0, 0, 1, 1], [], []>} : vector<2x256xbf16>, vector<256x512xbf16>, vector<2x512xf32> -> vector<2x512xf32>
    %195 = arith.addf %189, %194 : vector<2x512xf32>
    %c0_106 = arith.constant 0 : index
    %c7 = arith.constant 7 : index
    %c0_107 = arith.constant 0 : index
    %196 = vector.load %arg17[%c0_106, %c7, %c0_107] : memref<2x8x256xf32, #tpu.memory_space<vmem>>, vector<2x1x256xf32>
    %197 = vector.shape_cast %196 : vector<2x1x256xf32> to vector<2x256xf32>
    %198 = arith.truncf %197 : vector<2x256xf32> to vector<2x256xbf16>
    %c1792 = arith.constant 1792 : index
    %c0_108 = arith.constant 0 : index
    %199 = vector.load %arg6[%c1792, %c0_108] : memref<2048x512xbf16, #tpu.memory_space<vmem>>, vector<256x512xbf16>
    %cst_109 = arith.constant dense<0.000000e+00> : vector<2x512xf32>
    %200 = tpu.matmul %198, %199, %cst_109 {dimension_numbers = #tpu.dot_dimension_numbers<[1], [0], [0], [1], [0, 0, 1, 1], [], []>} : vector<2x256xbf16>, vector<256x512xbf16>, vector<2x512xf32> -> vector<2x512xf32>
    %201 = arith.addf %195, %200 : vector<2x512xf32>
    %c0_110 = arith.constant 0 : index
    %c0_111 = arith.constant 0 : index
    %202 = vector.load %arg7[%c0_110, %c0_111] : memref<1x512xf32, #tpu.memory_space<vmem>>, vector<1x512xf32>
    %203 = vector.broadcast %202 : vector<1x512xf32> to vector<2x512xf32>
    %204 = arith.addf %201, %203 : vector<2x512xf32>
    %cst_112 = arith.constant 0.000000e+00 : f32
    %205 = vector.broadcast %cst_112 : f32 to vector<2x512xf32>
    %206 = arith.maximumf %204, %205 : vector<2x512xf32>
    %207 = arith.truncf %206 : vector<2x512xf32> to vector<2x512xbf16>
    %c0_113 = arith.constant 0 : index
    %c0_114 = arith.constant 0 : index
    %208 = vector.load %arg8[%c0_113, %c0_114] : memref<512x256xbf16, #tpu.memory_space<vmem>>, vector<512x256xbf16>
    %cst_115 = arith.constant dense<0.000000e+00> : vector<2x256xf32>
    %209 = tpu.matmul %207, %208, %cst_115 {dimension_numbers = #tpu.dot_dimension_numbers<[1], [0], [0], [1], [0, 0, 1, 1], [], []>} : vector<2x512xbf16>, vector<512x256xbf16>, vector<2x256xf32> -> vector<2x256xf32>
    %c0_116 = arith.constant 0 : index
    %c0_117 = arith.constant 0 : index
    %210 = vector.load %arg1[%c0_116, %c0_117] : memref<2x4xf32, #tpu.memory_space<vmem>>, vector<2x4xf32>
    %211 = arith.truncf %210 : vector<2x4xf32> to vector<2x4xbf16>
    %c0_118 = arith.constant 0 : index
    %c0_119 = arith.constant 0 : index
    %212 = vector.load %arg9[%c0_118, %c0_119] : memref<4x256xbf16, #tpu.memory_space<vmem>>, vector<4x256xbf16>
    %cst_120 = arith.constant dense<0.000000e+00> : vector<2x256xf32>
    %213 = tpu.matmul %211, %212, %cst_120 {dimension_numbers = #tpu.dot_dimension_numbers<[1], [0], [0], [1], [0, 0, 1, 1], [], []>} : vector<2x4xbf16>, vector<4x256xbf16>, vector<2x256xf32> -> vector<2x256xf32>
    %214 = arith.addf %209, %213 : vector<2x256xf32>
    %c0_121 = arith.constant 0 : index
    %c0_122 = arith.constant 0 : index
    %215 = vector.load %arg10[%c0_121, %c0_122] : memref<1x256xf32, #tpu.memory_space<vmem>>, vector<1x256xf32>
    %216 = vector.broadcast %215 : vector<1x256xf32> to vector<2x256xf32>
    %217 = arith.addf %214, %216 : vector<2x256xf32>
    %cst_123 = arith.constant 0.000000e+00 : f32
    %218 = vector.broadcast %cst_123 : f32 to vector<2x256xf32>
    %219 = arith.maximumf %217, %218 : vector<2x256xf32>
    %220 = arith.truncf %219 : vector<2x256xf32> to vector<2x256xbf16>
    %c0_124 = arith.constant 0 : index
    %c0_125 = arith.constant 0 : index
    %221 = vector.load %arg11[%c0_124, %c0_125] : memref<256x256xbf16, #tpu.memory_space<vmem>>, vector<256x256xbf16>
    %cst_126 = arith.constant dense<0.000000e+00> : vector<2x256xf32>
    %222 = tpu.matmul %220, %221, %cst_126 {dimension_numbers = #tpu.dot_dimension_numbers<[1], [0], [0], [1], [0, 0, 1, 1], [], []>} : vector<2x256xbf16>, vector<256x256xbf16>, vector<2x256xf32> -> vector<2x256xf32>
    %c0_127 = arith.constant 0 : index
    %c0_128 = arith.constant 0 : index
    %223 = vector.load %arg12[%c0_127, %c0_128] : memref<1x256xf32, #tpu.memory_space<vmem>>, vector<1x256xf32>
    %224 = vector.broadcast %223 : vector<1x256xf32> to vector<2x256xf32>
    %225 = arith.addf %222, %224 : vector<2x256xf32>
    %cst_129 = arith.constant 0.000000e+00 : f32
    %226 = vector.broadcast %cst_129 : f32 to vector<2x256xf32>
    %227 = arith.maximumf %225, %226 : vector<2x256xf32>
    %c0_130 = arith.constant 0 : index
    %c0_131 = arith.constant 0 : index
    %228 = vector.load %arg13[%c0_130, %c0_131] : memref<256x1xf32, #tpu.memory_space<vmem>>, vector<256x1xf32>
    %cst_132 = arith.constant dense<0.000000e+00> : vector<2x1xf32>
    %229 = tpu.matmul %227, %228, %cst_132 {dimension_numbers = #tpu.dot_dimension_numbers<[1], [0], [0], [1], [0, 0, 1, 1], [], []>} : vector<2x256xf32>, vector<256x1xf32>, vector<2x1xf32> -> vector<2x1xf32>
    %c0_133 = arith.constant 0 : index
    %c0_134 = arith.constant 0 : index
    %230 = vector.load %arg14[%c0_133, %c0_134] : memref<1x1xf32, #tpu.memory_space<vmem>>, vector<1x1xf32>
    %231 = vector.broadcast %230 : vector<1x1xf32> to vector<2x1xf32>
    %232 = arith.addf %229, %231 : vector<2x1xf32>
    %c0_135 = arith.constant 0 : index
    %c0_136 = arith.constant 0 : index
    %233 = vector.load %arg15[%c0_135, %c0_136] : memref<2x1xf32, #tpu.memory_space<vmem>>, vector<2x1xf32>
    tpu.vector_store %arg15[%c0_135, %c0_136], %232 {strides = array<i32>} : memref<2x1xf32, #tpu.memory_space<vmem>>, vector<2x1xf32>,
    return
  }
}

</mosaic_0001>

<bundles_post_ra>
// kernel: tpu_custom_call.1
= control target key start
LH: loop header
LB: loop body
LE: loop exit
PB: predicated region body
PF: predicated region fallthrough
CT: control target
= control target key end

     0   :  { %s10620_s0 = inlined_call_operand.hbm [shape: f32[16,20], index: 0, kind: input, shape index: {}]   ;;  %s10621_s1 = inlined_call_operand.hbm [shape: f32[2,4], index: 1, kind: input, shape index: {}]   ;;  %s10622_s2 = inlined_call_operand.hbm [shape: bf16[20,768], index: 2, kind: input, shape index: {}]   ;;  %s10623_s3 = inlined_call_operand.hbm [shape: f32[1,768], index: 3, kind: input, shape index: {}]   ;;  %s10624_s4 = inlined_call_operand.hbm [shape: bf16[256,256], index: 4, kind: input, shape index: {}]   ;;  %s10625_s5 = inlined_call_operand.hbm [shape: f32[1,256], index: 5, kind: input, shape index: {}]   ;;  %s10626_s6 = inlined_call_operand.hbm [shape: bf16[2048,512], index: 6, kind: input, shape index: {}]   ;;  %s10627_s7 = inlined_call_operand.hbm [shape: f32[1,512], index: 7, kind: input, shape index: {}]   ;;  %s10628_s8 = inlined_call_operand.hbm [shape: bf16[512,256], index: 8, kind: input, shape index: {}]   ;;  %s10629_s9 = inlined_call_operand.hbm [shape: bf16[4,256], index: 9, kind: input, shape index: {}]   ;;  %s10630_s10 = inlined_call_operand.hbm [shape: f32[1,256], index: 10, kind: input, shape index: {}]   ;;  %s10631_s11 = inlined_call_operand.hbm [shape: bf16[256,256], index: 11, kind: input, shape index: {}]   ;;  %s10632_s12 = inlined_call_operand.hbm [shape: f32[1,256], index: 12, kind: input, shape index: {}]   ;;  %s10633_s13 = inlined_call_operand.vmem [shape: f32[256,1], index: 13, kind: input, shape index: {}]   ;;  %s10634_s14 = inlined_call_operand.<no memory space> [shape: f32[1,1], index: 14, kind: input, shape index: {}]   ;;  %s10635_s15 = inlined_call_operand.vmem [shape: f32[2,1], index: 15, kind: output, shape index: {}]  }
   0x1   :  { %v20_v0 = vstv %s10634_s14 }
   0x2   :  { %21 = vst [vmem:[#allocation4] sm:$0x1] %v20_v0 }
   0x3   :  { %22 = vsyncpa [#allocation6], 0 }
   0x4   :  { %23 = vsyncpa [#allocation8], 0 }
   0x5   :  { %24 = vsyncpa [#allocation11], 0 }
   0x6   :  { %25 = vsyncpa [#allocation14], 0 }
   0x7   :  { %26 = vsyncpa [#allocation17], 0 }
   0x8   :  { %27 = vsyncpa [#allocation20], 0 }
   0x9   :  { %28 = vsyncpa [#allocation23], 0  ;;  %s9818_s20 = smov [#allocation7]   ;;  %s9819_s22 = smov [#allocation10]  }
   0xa   :  { %s47_s21 = sshll.u32 %s9818_s20, 4  ;;  %s69_s23 = sshll.u32 %s9819_s22, 4  ;;  %s48_s21 = int_to_ptr.vmem [resolvable:$true] %s47_s21  ;;  %s70_s23 = int_to_ptr.vmem [resolvable:$true] %s69_s23 }
   0xb   :  { %s9552_s24 = scalar_lea.vmem %s48_s21, 32  ;;  %p9557_p1 = scmp.lt.s32.totalorder %s48_s21, %s48_s21 }
   0xc   :  { %p9553_p0 = scmp.ne.s32.totalorder %s48_s21, %s9552_s24  ;;  %p9558_p2 = scmp.lt.s32.totalorder %s9552_s24, %s9552_s24 }
   0xe   :  { %p9559_p3 = por %p9558_p2, %p9557_p1 }
  0x10   :  { %p9560_p4 = pnand %p9559_p3, %p9553_p0 }
  0x12   :  { %9563 = shalt.err (!%p9560_p4)
}
  0x13   :  { %50 = dma.hbm_to_vmem [thread:$0]  %s10621_s1, 32, %s48_s21, [#allocation8]  }
  0x14   :  { %s9572_s26 = scalar_lea.vmem %s70_s23, 96  ;;  %p9577_p6 = scmp.lt.s32.totalorder %s70_s23, %s70_s23 }
  0x15   :  { %p9573_p5 = scmp.ne.s32.totalorder %s70_s23, %s9572_s26  ;;  %p9578_p7 = scmp.lt.s32.totalorder %s9572_s26, %s9572_s26 }
  0x17   :  { %p9579_p8 = por %p9578_p7, %p9577_p6 }
  0x19   :  { %p9580_p9 = pnand %p9579_p8, %p9573_p5 }
  0x1b   :  { %9583 = shalt.err (!%p9580_p9)
}
  0x1c   :  { %72 = dma.hbm_to_vmem [thread:$0]  %s10623_s3, 96, %s70_s23, [#allocation11]  }
  0x1d   :  { %s9820_s29 = smov [#allocation13]   ;;  %s9821_s16 = smov [#allocation16]  }
  0x1e   :  { %s91_s30 = sshll.u32 %s9820_s29, 4  ;;  %s113_s17 = sshll.u32 %s9821_s16, 4  ;;  %s92_s30 = int_to_ptr.vmem [resolvable:$true] %s91_s30  ;;  %s114_s17 = int_to_ptr.vmem [resolvable:$true] %s113_s17 }
  0x1f   :  { %s9592_s18 = scalar_lea.vmem %s92_s30, 32  ;;  %p9597_p11 = scmp.lt.s32.totalorder %s92_s30, %s92_s30 }
  0x20   :  { %p9593_p10 = scmp.ne.s32.totalorder %s92_s30, %s9592_s18  ;;  %p9598_p12 = scmp.lt.s32.totalorder %s9592_s18, %s9592_s18 }
  0x22   :  { %p9599_p13 = por %p9598_p12, %p9597_p11 }
  0x24   :  { %p9600_p0 = pnand %p9599_p13, %p9593_p10 }
  0x26   :  { %9603 = shalt.err (!%p9600_p0)
}
  0x27   :  { %94 = dma.hbm_to_vmem [thread:$0]  %s10625_s5, 32, %s92_s30, [#allocation14]  }
  0x28   :  { %s9612_s20 = scalar_lea.vmem %s114_s17, 64  ;;  %p9617_p2 = scmp.lt.s32.totalorder %s114_s17, %s114_s17 }
  0x29   :  { %p9613_p1 = scmp.ne.s32.totalorder %s114_s17, %s9612_s20  ;;  %p9618_p3 = scmp.lt.s32.totalorder %s9612_s20, %s9612_s20 }
  0x2b   :  { %p9619_p4 = por %p9618_p3, %p9617_p2 }
  0x2d   :  { %p9620_p5 = pnand %p9619_p4, %p9613_p1 }
  0x2f   :  { %9623 = shalt.err (!%p9620_p5)
}
  0x30   :  { %116 = dma.hbm_to_vmem [thread:$0]  %s10627_s7, 64, %s114_s17, [#allocation17]  }
  0x31   :  { %s9822_s22 = smov [#allocation19]  }
  0x32   :  { %s135_s23 = sshll.u32 %s9822_s22, 4  ;;  %s136_s23 = int_to_ptr.vmem [resolvable:$true] %s135_s23 }
  0x33   :  { %s9632_s24 = scalar_lea.vmem %s136_s23, 64  ;;  %p9637_p7 = scmp.lt.s32.totalorder %s136_s23, %s136_s23 }
  0x34   :  { %p9633_p6 = scmp.ne.s32.totalorder %s136_s23, %s9632_s24  ;;  %p9638_p8 = scmp.lt.s32.totalorder %s9632_s24, %s9632_s24 }
  0x36   :  { %p9639_p9 = por %p9638_p8, %p9637_p7 }
  0x38   :  { %p9640_p10 = pnand %p9639_p9, %p9633_p6 }
  0x3a   :  { %9643 = shalt.err (!%p9640_p10)
}
  0x3b   :  { %138 = dma.hbm_to_vmem [thread:$0]  %s10629_s9, 64, %s136_s23, [#allocation20]  }
  0x3c   :  { %s9823_s25 = smov [#allocation22]   ;;  %s9824_s27 = smov [#allocation5]  }
  0x3d   :  { %s154_s26 = sshll.u32 %s9823_s25, 4  ;;  %s34_s28 = sshll.u32 %s9824_s27, 4  ;;  %s155_s26 = int_to_ptr.vmem [resolvable:$true] %s154_s26  ;;  %s35_s28 = int_to_ptr.vmem [resolvable:$true] %s34_s28 }
  0x3e   :  { %s9652_s7 = scalar_lea.vmem %s155_s26, 4096  ;;  %p9657_p12 = scmp.lt.s32.totalorder %s155_s26, %s155_s26 }
  0x3f   :  { %p9653_p11 = scmp.ne.s32.totalorder %s155_s26, %s9652_s7  ;;  %p9658_p13 = scmp.lt.s32.totalorder %s9652_s7, %s9652_s7 }
  0x41   :  { %p9659_p0 = por %p9658_p13, %p9657_p12 }
  0x43   :  { %p9660_p1 = pnand %p9659_p0, %p9653_p11 }
  0x45   :  { %9663 = shalt.err (!%p9660_p1)
}
  0x46   :  { %s9825_s29 = smov 128   ;;  %s9826_s30 = smov 8  }
  0x47   :  { %160 = dma.hbm_to_vmem [thread:$0]  %s10631_s11, 4096, %s155_s26, [#allocation23], %s9825_s29, %s9825_s29, %s9826_s30  }
  0x48   :  { %s9672_s9 = scalar_lea.vmem %s35_s28, 256  ;;  %p9677_p3 = scmp.lt.s32.totalorder %s35_s28, %s35_s28 }
  0x49   :  { %p9673_p2 = scmp.ne.s32.totalorder %s35_s28, %s9672_s9  ;;  %p9678_p4 = scmp.lt.s32.totalorder %s9672_s9, %s9672_s9 }
  0x4b   :  { %p9679_p5 = por %p9678_p4, %p9677_p3 }
  0x4d   :  { %p9680_p6 = pnand %p9679_p5, %p9673_p2 }
  0x4f   :  { %9683 = shalt.err (!%p9680_p6)
}
  0x50   :  { %40 = dma.hbm_to_vmem [thread:$0]  %s10620_s0, 256, %s35_s28, [#allocation6], %s9825_s29, %s9825_s29, %s9826_s30  }
  0x51   :  { %s9827_s19 = smov [#allocation9]  }
  0x52   :  { %s56_s20 = sshll.u32 %s9827_s19, 4  ;;  %s57_s20 = int_to_ptr.vmem [resolvable:$true] %s56_s20 }
  0x53   :  { %s9692_s3 = scalar_lea.vmem %s57_s20, 1152  ;;  %p9697_p8 = scmp.lt.s32.totalorder %s57_s20, %s57_s20 }
  0x54   :  { %p9693_p7 = scmp.ne.s32.totalorder %s57_s20, %s9692_s3  ;;  %p9698_p9 = scmp.lt.s32.totalorder %s9692_s3, %s9692_s3 }
  0x56   :  { %p9699_p10 = por %p9698_p9, %p9697_p8 }
  0x58   :  { %p9700_p11 = pnand %p9699_p10, %p9693_p7 }
  0x5a   :  { %9703 = shalt.err (!%p9700_p11)
}
  0x5b   :  { %s9828_s11 = smov 384   ;;  %s9829_s21 = smov 24  }
  0x5c   :  { %62 = dma.hbm_to_vmem [thread:$0]  %s10622_s2, 1152, %s57_s20, [#allocation8], %s9828_s11, %s9828_s11, %s9829_s21  }
  0x5d   :  { %s9830_s24 = smov [#allocation12]   ;;  %s9831_s14 = smov [#allocation15]  }
  0x5e   :  { %s78_s5 = sshll.u32 %s9830_s24, 4  ;;  %s100_s0 = sshll.u32 %s9831_s14, 4  ;;  %s79_s5 = int_to_ptr.vmem [resolvable:$true] %s78_s5  ;;  %s101_s0 = int_to_ptr.vmem [resolvable:$true] %s100_s0 }
  0x5f   :  { %s9712_s25 = scalar_lea.vmem %s79_s5, 4096  ;;  %p9717_p13 = scmp.lt.s32.totalorder %s79_s5, %s79_s5 }
  0x60   :  { %p9713_p12 = scmp.ne.s32.totalorder %s79_s5, %s9712_s25  ;;  %p9718_p0 = scmp.lt.s32.totalorder %s9712_s25, %s9712_s25 }
  0x62   :  { %p9719_p1 = por %p9718_p0, %p9717_p13 }
  0x64   :  { %p9720_p2 = pnand %p9719_p1, %p9713_p12 }
  0x66   :  { %9723 = shalt.err (!%p9720_p2)
}
  0x67   :  { %84 = dma.hbm_to_vmem [thread:$0]  %s10624_s4, 4096, %s79_s5, [#allocation11], %s9825_s29, %s9825_s29, %s9826_s30  }
  0x68   :  { %s9732_s2 = scalar_lea.vmem %s101_s0, 65536  ;;  %p9737_p4 = scmp.lt.s32.totalorder %s101_s0, %s101_s0 }
  0x69   :  { %p9733_p3 = scmp.ne.s32.totalorder %s101_s0, %s9732_s2  ;;  %p9738_p5 = scmp.lt.s32.totalorder %s9732_s2, %s9732_s2 }
  0x6b   :  { %p9739_p6 = por %p9738_p5, %p9737_p4 }
  0x6d   :  { %p9740_p7 = pnand %p9739_p6, %p9733_p3 }
  0x6f   :  { %9743 = shalt.err (!%p9740_p7)
}
  0x70   :  { %s9832_s28 = smov 256   ;;  %s9833_s7 = smov 16  }
  0x71   :  { %106 = dma.hbm_to_vmem [thread:$0]  %s10626_s6, 65536, %s101_s0, [#allocation14], %s9832_s28, %s9832_s28, %s9833_s7  }
  0x72   :  { %s9834_s9 = smov [#allocation18]   ;;  %s9835_s1 = smov [#allocation21]  }
  0x73   :  { %s122_s18 = sshll.u32 %s9834_s9, 4  ;;  %s145_s19 = sshll.u32 %s9835_s1, 4  ;;  %s123_s18 = int_to_ptr.vmem [resolvable:$true] %s122_s18  ;;  %s146_s19 = int_to_ptr.vmem [resolvable:$true] %s145_s19 }
  0x74   :  { %s9752_s4 = scalar_lea.vmem %s123_s18, 8192  ;;  %p9757_p9 = scmp.lt.s32.totalorder %s123_s18, %s123_s18 }
  0x75   :  { %p9753_p8 = scmp.ne.s32.totalorder %s123_s18, %s9752_s4  ;;  %p9758_p10 = scmp.lt.s32.totalorder %s9752_s4, %s9752_s4 }
  0x77   :  { %p9759_p11 = por %p9758_p10, %p9757_p9 }
  0x79   :  { %p9760_p12 = pnand %p9759_p11, %p9753_p8 }
  0x7b   :  { %9763 = shalt.err (!%p9760_p12)
}
  0x7c   :  { %128 = dma.hbm_to_vmem [thread:$0]  %s10628_s8, 8192, %s123_s18, [#allocation17], %s9825_s29, %s9825_s29, %s9826_s30  }
  0x7d   :  { %s9772_s6 = scalar_lea.vmem %s146_s19, 32  ;;  %p9777_p0 = scmp.lt.s32.totalorder %s146_s19, %s146_s19 }
  0x7e   :  { %p9773_p13 = scmp.ne.s32.totalorder %s146_s19, %s9772_s6  ;;  %p9778_p1 = scmp.lt.s32.totalorder %s9772_s6, %s9772_s6 }
  0x80   :  { %p9779_p2 = por %p9778_p1, %p9777_p0 }
  0x82   :  { %p9780_p3 = pnand %p9779_p2, %p9773_p13 }
  0x84   :  { %9783 = shalt.err (!%p9780_p3)
}
  0x85   :  { %148 = dma.hbm_to_vmem [thread:$0]  %s10630_s10, 32, %s146_s19, [#allocation20]  }
  0x86   :  { %s9836_s22 = smov [#allocation24]  }
  0x87   :  { %s167_s23 = sshll.u32 %s9836_s22, 4  ;;  %s168_s23 = int_to_ptr.vmem [resolvable:$true] %s167_s23 }
  0x88   :  { %s9792_s24 = scalar_lea.vmem %s168_s23, 32  ;;  %p9797_p5 = scmp.lt.s32.totalorder %s168_s23, %s168_s23 }
  0x89   :  { %p9793_p4 = scmp.ne.s32.totalorder %s168_s23, %s9792_s24  ;;  %p9798_p6 = scmp.lt.s32.totalorder %s9792_s24, %s9792_s24 }
  0x8b   :  { %p9799_p7 = por %p9798_p6, %p9797_p5 }
  0x8d   :  { %p9800_p8 = pnand %p9799_p7, %p9793_p4 }
  0x8f   :  { %9803 = shalt.err (!%p9800_p8)
}
  0x90   :  { %170 = dma.hbm_to_vmem [thread:$0]  %s10632_s12, 32, %s168_s23, [#allocation23]  }
  0x91   :  { %9804 = dma.done.wait [#allocation6], 256  }
  0x92   :  { %9805 = vsyncadd [#allocation6], 4294967040 }
  0x93   :  { %9806 = dma.done.wait [#allocation8], 1184  }
  0x94   :  { %9807 = vsyncadd [#allocation8], 4294966112 }
  0x95   :  { %9808 = dma.done.wait [#allocation11], 4192  }
  0x96   :  { %9809 = vsyncadd [#allocation11], 4294963104 }
  0x97   :  { %9810 = dma.done.wait [#allocation14], 65568  }
  0x98   :  { %9811 = vsyncadd [#allocation14], 4294901728 }
  0x99   :  { %9812 = dma.done.wait [#allocation17], 8256  }
  0x9a   :  { %9813 = vsyncadd [#allocation17], 4294959040 }
  0x9b   :  { %9814 = dma.done.wait [#allocation20], 96  }
  0x9c   :  { %9815 = vsyncadd [#allocation20], 4294967200 }
  0x9d   :  { %9816 = dma.done.wait [#allocation23], 4128  }
  0x9e   :  { %9817 = vsyncadd [#allocation23], 4294963168  ;;  %v9837_v1 = vmov 0   ;;  %v224_v2 = vld [vmem:[#allocation9 + $0x30] sm:$0x33]  ;;  %vm308_vm0 = vcmask 1041408   ;;  %v229_v24 = vlaneseq }
  0x9f   :  { %359 = vmatprep.mubr.bf16.mxu0 %v9837_v1  ;;  %402 = vmatprep.mubr.bf16.mxu1 %v9837_v1  ;;  %v225_v3 = vld [vmem:[#allocation9 + $0x38] sm:$0x33]  ;;  %v7648_v4 = vcombine.high %v224_v2, %v224_v2  ;;  %v7647_v6 = vcombine.low %v224_v2, %v224_v2  ;;  %v8543_v9 = vld [vmem:[#allocation9 + $0xc] ss:$24 sps:$4 sm:$0xff]   ;;  %v8546_v13 = vld [vmem:[#allocation9 + $0x8] ss:$24 sps:$4 sm:$0xff]  }
  0xa0   :  { %v7650_v5 = vcombine.high %v225_v3, %v225_v3  ;;  %v7649_v7 = vcombine.low %v225_v3, %v225_v3  ;;  %v8541_v8 = vld [vmem:[#allocation9 + $0x4] ss:$24 sps:$4 sm:$0xff]   ;;  %v8545_v10 = vld [vmem:[#allocation9] ss:$24 sps:$4 sm:$0xff]   ;;  %v215_v14 = vld [vmem:[#allocation5] sm:$0xff]  ;;  %vm304_vm1 = vcmask 162816  }
  0xa1   :  { %7653 = vmatprep.subr.msk.bf16.mxu0 %vm308_vm0, %v7648_v4  ;;  %v310_v11 = vsel %vm308_vm0, %v7647_v6, 0  ;;  %v216_v15 = vld [vmem:[#allocation5 + $0x8] sm:$0xff]  ;;  %v226_v16 = vld [vmem:[#allocation9 + $0x40] sm:$0x33]  ;;  %v8549_v22 = vld [vmem:[#allocation9 + $0x10] ss:$24 sps:$4 sm:$0xff]  }
  0xa2   :  { %7655 = vmatprep.subr.msk.bf16.mxu1 %vm308_vm0, %v7650_v5  ;;  %v316_v12 = vsel %vm308_vm0, %v7649_v7, 0  ;;  %340 = vmatpush1.bf16.msra.mxu0 %v310_v11  ;;  %v7652_v17 = vcombine.high %v226_v16, %v226_v16  ;;  %v7651_v18 = vcombine.low %v226_v16, %v226_v16  ;;  %v217_v19 = vpack.c.bf16 %v216_v15, %v215_v14  ;;  %v8551_v20 = vld [vmem:[#allocation9 + $0x14] ss:$24 sps:$4 sm:$0xff]   ;;  %s9840_s10 = smov 64  }
  0xa3   :  { %383 = vmatpush1.bf16.msra.mxu1 %v316_v12  ;;  %341 = vmatprep.subr.bf16.mxu0 %v8541_v8  ;;  %v9838_v23 = vmov 0.0   ;;  %vm9839_vm2 = vmmov 0   ;;  %v9990_v25 = vshrl.u32 %v229_v24, 7  ;;  %v9992_v26 = vld [vmem:[#allocation10] sm:$0x3f]  ;;  %vm456_vm3 = vcmask 523264  }
  0xa4   :  { %384 = vmatprep.subr.bf16.mxu1 %v8543_v9  ;;  %v322_v21 = vsel %vm308_vm0, %v7651_v18, 0  ;;  %vm534_vm4 = vcmask 64512   ;;  %vm2767_vm5 = vcmask 1041409   ;;  %vm6801_vm6 = vcmask 31744  }
  0xa5   :  { %v239_v27 = vsub.s32 2, %v9990_v25  ;;  %v9996_v28 = vsub.s32 0, %v9990_v25  ;;  %v243_v29 = vsub.s32 3, %v9990_v25  ;;  %v10000_v30 = vsub.s32 1, %v9990_v25 }
  0xa6   :  { %342 = vmatpush1.bf16.msra.mxu0 %v8545_v10  ;;  %v247_v48 = vsub.s32 4, %v9990_v25  ;;  %vm7628_vm7 = vcmask 1024  }
  0xa7   :  { %385 = vmatpush1.bf16.msra.mxu1 %v8546_v13  ;;  %7657 = vmatprep.subr.msk.bf16.mxu0 %vm308_vm0, %v7652_v17  ;;  %v240_v31 = vrot.slane %v9992_v26, %v239_v27  ;;  %v232_v32 = vrot.slane %v9992_v26, %v9996_v28  ;;  %v244_v33 = vrot.slane %v9992_v26, %v243_v29 }
  0xa8   :  { %8434 = vmatprep.subr.mxu1 %v9838_v23  ;;  %v236_v36 = vrot.slane %v9992_v26, %v10000_v30  ;;  %v248_v52 = vrot.slane %v9992_v26, %v247_v48 }
  0xa9   :  { %7654 = vmatmul.mubr.msk.bf16.vlgmr.msra.gmra.mxu0 %vm304_vm1, %v217_v19 }
  0xaa   :  { %7656 = vmatmul.mubr.msk.bf16.vlgmr.msra.gmra.mxu1 %vm304_vm1, %v217_v19  ;;  %426 = vmatpush1.bf16.msra.mxu0 %v322_v21 }
  0xab   :  { %445 = vmatprep.mubr.bf16.mxu0 %v9837_v1  ;;  %427 = vmatprep.subr.bf16.mxu0 %v8551_v20 }
  0xac   :  { %8436 = vmatprep.mubr.msk.f32.mxu1 %vm9839_vm2, %v9838_v23 }
  0xae   :  { %428 = vmatpush1.bf16.msra.mxu0 %v8549_v22 }
  0xaf   :  { %8444 = vmatprep.subr.mxu0 %v9838_v23 }
  0xb1   :  { %7658 = vmatmul.mubr.msk.bf16.vlgmr.msra.gmra.mxu0 %vm304_vm1, %v217_v19 }
  0xb2   :  { %8446 = vmatprep.mubr.msk.f32.mxu0 %vm9839_vm2, %v9838_v23 }
 0x169   :  { %v361_v34 = vpop.f32.mrf.mxu0 }
 0x16a   :  { %v404_v35 = vpop.f32.mrf.mxu1  ;;  %v362_v38 = vadd.f32 %v361_v34, %v232_v32 }
 0x16b   :  { %v405_v37 = vadd.f32 %v404_v35, %v240_v31  ;;  %v363_v39 = vpop.f32.mrf.mxu0 }
 0x16c   :  { %v406_v40 = vpop.f32.mrf.mxu1  ;;  %v364_v42 = vadd.f32 %v363_v39, %v236_v36  ;;  %v10083_v39 = vld [vmem:[#allocation12 + $0x74] ss:$8 sps:$4 sm:$0xff]  }
 0x16d   :  { %v10012_v41 = vadd.f32 %v406_v40, %v244_v33  ;;  %538 = vrot.lane.b32.xlu0 %v405_v37, %s9840_s10  ;;  %8435 = vmatpush3.xpose.msk.msra.mxu1 %vm456_vm3, %v405_v37  ;;  %v365_v43 = vpop.f32.mrf.mxu0 }
 0x16e   :  { %v408_v44 = vpop.f32.mrf.mxu1  ;;  %8439 = vmatprep.subr.mxu1 %v9838_v23  ;;  %v10029_v50 = vadd.f32 %v365_v43, %v232_v32 }
 0x16f   :  { %8445 = vmatpush3.xpose.msk.msra.mxu0 %vm456_vm3, %v10012_v41  ;;  %v409_v45 = vadd.f32 %v408_v44, %v240_v31  ;;  %v367_v46 = vpop.f32.mrf.mxu0 }
 0x170   :  { %8437 = vmatmul.mubr.msk.f32.vlgmr.msra.gmra.mxu1 %vm456_vm3, %v362_v38  ;;  %8454 = vmatprep.subr.mxu0 %v9838_v23  ;;  %v410_v47 = vpop.f32.mrf.mxu1  ;;  %v368_v55 = vadd.f32 %v367_v46, %v236_v36 }
 0x171   :  { %536 = vrot.lane.b32.xlu0 %v362_v38, %s9840_s10  ;;  %8441 = vmatprep.mubr.msk.f32.mxu1 %vm9839_vm2, %v9838_v23  ;;  %v447_v49 = vpop.f32.mrf.mxu0  ;;  %v411_v51 = vadd.f32 %v410_v47, %v244_v33 }
 0x172   :  { %8447 = vmatmul.mubr.msk.f32.vlgmr.msra.gmra.mxu0 %vm456_vm3, %v364_v42  ;;  %v10045_v57 = vadd.f32 %v447_v49, %v248_v52  ;;  %v10095_v49 = vld [vmem:[#allocation12 + $0x70] ss:$8 sps:$4 sm:$0xff]  }
 0x173   :  { %8455 = vmatpush3.xpose.msk.msra.mxu0 %vm456_vm3, %v409_v45  ;;  %8456 = vmatprep.mubr.msk.f32.mxu0 %vm9839_vm2, %v9838_v23  ;;  %v10034_v53 = vpop.f32.mrf.mxu0 }
 0x174   :  { %8464 = vmatprep.subr.mxu0 %v9838_v23 }
 0x175   :  { %694 = vrot.lane.b32.xlu0 %v364_v42, %s9840_s10  ;;  %v451_v54 = vpop.f32.mrf.mxu0 }
 0x176   :  { %8457 = vmatmul.mubr.msk.f32.vlgmr.msra.gmra.mxu0 %vm456_vm3, %v10029_v50  ;;  %v10041_v56 = vadd.f32 %v451_v54, %v248_v52 }
 0x177   :  { %8465 = vmatpush3.xpose.msk.msra.mxu0 %vm456_vm3, %v411_v51  ;;  %8466 = vmatprep.mubr.msk.f32.mxu0 %vm9839_vm2, %v9838_v23  ;;  %v10058_v60 = vpop.f32.mrf.mxu0 }
 0x178   :  { %8474 = vmatprep.subr.mxu0 %v9838_v23 }
 0x179   :  { %854 = vrot.lane.b32.xlu0 %v409_v45, %s9840_s10 }
 0x17a   :  { %8467 = vmatmul.mubr.msk.f32.vlgmr.msra.gmra.mxu0 %vm456_vm3, %v368_v55 }
 0x17b   :  { %8475 = vmatpush3.msra.mxu0 %v10045_v57  ;;  %8476 = vmatprep.mubr.msk.f32.mxu0 %vm9839_vm2, %v9838_v23 }
 0x17c   :  { %1405 = vmatprep.subr.bf16.mxu0 %v10083_v39 }
 0x17d   :  { %1012 = vrot.lane.b32.xlu0 %v411_v51, %s9840_s10 }
 0x181   :  { %1010 = vrot.lane.b32.xlu0 %v368_v55, %s9840_s10 }
 0x1df   :  { %v539_v58 = vpop.permute.xlu0 %538 }
 0x1e0   :  { %8440 = vmatpush3.xpose.msk.msra.mxu1 %vm456_vm3, %v539_v58 }
 0x1e1   :  { %8449 = vmatprep.subr.mxu1 %v9838_v23 }
 0x1e3   :  { %v537_v59 = vpop.permute.xlu0 %536 }
 0x1e4   :  { %8442 = vmatmul.mubr.msk.f32.vlgmr.msra.gmra.mxu1 %vm456_vm3, %v537_v59 }
 0x1e5   :  { %8451 = vmatprep.mubr.msk.f32.mxu1 %vm9839_vm2, %v9838_v23 }
 0x1e7   :  { %v695_v22 = vpop.permute.xlu0 %694 }
 0x1eb   :  { %v855_v32 = vpop.permute.xlu0 %854 }
 0x1ef   :  { %v1013_v40 = vpop.permute.xlu0 %1012 }
 0x230   :  { %v529_v61 = vpop.f32.mrf.mxu1 }
 0x231   :  { %v533_v62 = vmul.f32 0.125, %v529_v61 }
 0x232   :  { %v8438_v63 = vpop.f32.mrf.mxu1  ;;  %v688_v0 = vpop.f32.mrf.mxu0 }
 0x233   :  { %535 = vst.msk [vmem:[#allocation2] sm:$0xff] %vm534_vm4, %v533_v62  ;;  %v692_v2 = vmul.f32 0.125, %v688_v0  ;;  %v10104_v0 = vld [vmem:[#allocation12 + $0x64] ss:$8 sps:$4 sm:$0xff]  }
 0x234   :  { %v8448_v3 = vpop.f32.mrf.mxu0 }
 0x235   :  { %693 = vst.msk [vmem:[#allocation2 + $0x10] sm:$0xff] %vm534_vm4, %v692_v2  ;;  %v10108_v3 = vld [vmem:[#allocation12 + $0x60] ss:$8 sps:$4 sm:$0xff]  }
 0x236   :  { %v846_v4 = vpop.f32.mrf.mxu0 }
 0x237   :  { %v850_v5 = vmul.f32 0.125, %v846_v4 }
 0x238   :  { %v8458_v6 = vpop.f32.mrf.mxu0 }
 0x239   :  { %851 = vst.msk [vmem:[#allocation2 + $0x20] sm:$0xff] %vm534_vm4, %v850_v5  ;;  %v10114_v5 = vld [vmem:[#allocation12 + $0x54] ss:$8 sps:$4 sm:$0xff]   ;;  %v10116_v6 = vld [vmem:[#allocation12 + $0x50] ss:$8 sps:$4 sm:$0xff]  }
 0x23a   :  { %v1004_v7 = vpop.f32.mrf.mxu0  ;;  %v1090_v15 = vld [vmem:[#allocation2] sm:$0xff] }
 0x23b   :  { %v1008_v8 = vmul.f32 0.125, %v1004_v7  ;;  %v1098_v16 = vsel %vm534_vm4, %v1090_v15, -inf  ;;  %v10120_v7 = vld [vmem:[#allocation12 + $0x44] ss:$8 sps:$4 sm:$0xff]  }
 0x23c   :  { %v8468_v9 = vpop.f32.mrf.mxu0  ;;  %v1092_v37 = vld [vmem:[#allocation2 + $0x10] sm:$0xff] }
 0x23d   :  { %1009 = vst.msk [vmem:[#allocation2 + $0x30] sm:$0xff] %vm534_vm4, %v1008_v8  ;;  %v1104_v38 = vsel %vm534_vm4, %v1092_v37, -inf  ;;  %v10122_v8 = vld [vmem:[#allocation12 + $0x40] ss:$8 sps:$4 sm:$0xff]   ;;  %v10126_v9 = vld [vmem:[#allocation12 + $0x34] ss:$8 sps:$4 sm:$0xff]  }
 0x240   :  { %v1094_v62 = vld [vmem:[#allocation2 + $0x20] sm:$0xff] }
 0x241   :  { %v1110_v63 = vsel %vm534_vm4, %v1094_v62, -inf }
 0x2a4   :  { %v610_v10 = vpop.f32.mrf.mxu1 }
 0x2a5   :  { %v614_v11 = vmul.f32 0.125, %v610_v10 }
 0x2a6   :  { %v8443_v12 = vpop.f32.mrf.mxu1 }
 0x2a7   :  { %615 = vst.msk [vmem:[#allocation2 + $0x8] sm:$0xff] %vm534_vm4, %v614_v11 }
 0x2ae   :  { %v1091_v13 = vld [vmem:[#allocation2 + $0x8] sm:$0xff] }
 0x2af   :  { %v1101_v14 = vsel %vm534_vm4, %v1091_v13, -inf }
 0x2b0   :  { %1102 = vmax.xlane.f32.xlu1 %v1101_v14 }
 0x2b4   :  { %1099 = vmax.xlane.f32.xlu1 %v1098_v16 }
 0x2c5   :  { %696 = vrot.lane.b32.xlu1 %v10012_v41, %s9840_s10  ;;  %v1011_v41 = vpop.permute.xlu0 %1010 }
 0x339   :  { %v1103_v17 = vpop.xlane.xlu1 %1102 }
 0x33a   :  { %v1123_v18 = vsub.f32 %v1091_v13, %v1103_v17 }
 0x33c   :  { %v1132_v19 = vmul.f32 1.442695, %v1123_v18 }
 0x33d   :  { %v1100_v20 = vpop.xlane.xlu1 %1099 }
 0x33e   :  { %9512 = vpow2.f32 %v1132_v19  ;;  %v1122_v21 = vsub.f32 %v1090_v15, %v1100_v20 }
 0x340   :  { %v1130_v24 = vmul.f32 1.442695, %v1122_v21 }
 0x341   :  { %v697_v31 = vpop.permute.xlu1 %696 }
 0x342   :  { %9514 = vpow2.f32 %v1130_v24  ;;  %8450 = vmatpush3.xpose.msk.msra.mxu1 %vm456_vm3, %v697_v31  ;;  %v10131_v24 = vld [vmem:[#allocation12 + $0x30] ss:$8 sps:$4 sm:$0xff]  }
 0x343   :  { %8459 = vmatprep.subr.mxu1 %v9838_v23 }
 0x345   :  { %8452 = vmatmul.mubr.msk.f32.vlgmr.msra.gmra.mxu1 %vm456_vm3, %v695_v22 }
 0x346   :  { %8460 = vmatpush3.xpose.msk.msra.mxu1 %vm456_vm3, %v855_v32  ;;  %8461 = vmatprep.mubr.msk.f32.mxu1 %vm9839_vm2, %v9838_v23  ;;  %v10133_v32 = vld [vmem:[#allocation12 + $0x24] ss:$8 sps:$4 sm:$0xff]  }
 0x347   :  { %8469 = vmatprep.subr.mxu1 %v9838_v23 }
 0x34b   :  { %v9513_v33 = vpop.eup %9512 }
 0x34c   :  { %v1149_v34 = vsel %vm534_vm4, %v9513_v33, 0.0 }
 0x34d   :  { %1150 = vadd.xlane.f32.xlu0 %v1149_v34 }
 0x34f   :  { %v9515_v35 = vpop.eup %9514 }
 0x350   :  { %v1146_v36 = vsel %vm534_vm4, %v9515_v35, 0.0 }
 0x351   :  { %1147 = vadd.xlane.f32.xlu1 %v1146_v36 }
 0x362   :  { %852 = vrot.lane.b32.xlu1 %v10029_v50, %s9840_s10 }
 0x363   :  { %1269 = vrot.lane.b32.xlu0 %v10045_v57, %s9840_s10 }
 0x382   :  { %1105 = vmax.xlane.f32.xlu0 %v1104_v38 }
 0x3d6   :  { %v1151_v42 = vpop.xlane.xlu0 %1150 }
 0x3d7   :  { %9516 = vrcp.f32 %v1151_v42 }
 0x3da   :  { %v1148_v43 = vpop.xlane.xlu1 %1147  ;;  %v1270_v45 = vpop.permute.xlu0 %1269 }
 0x3db   :  { %9518 = vrcp.f32 %v1148_v43 }
 0x3de   :  { %v853_v44 = vpop.permute.xlu1 %852 }
 0x3df   :  { %8462 = vmatmul.mubr.msk.f32.vlgmr.msra.gmra.mxu1 %vm456_vm3, %v853_v44  ;;  %v10152_v44 = vld [vmem:[#allocation12 + $0x10] ss:$8 sps:$4 sm:$0xff]  }
 0x3e0   :  { %8470 = vmatpush3.xpose.msk.msra.mxu1 %vm456_vm3, %v1013_v40  ;;  %8471 = vmatprep.mubr.msk.f32.mxu1 %vm9839_vm2, %v9838_v23  ;;  %v10146_v40 = vld [vmem:[#allocation12 + $0x14] ss:$8 sps:$4 sm:$0xff]  }
 0x3e1   :  { %8479 = vmatprep.subr.mxu1 %v9838_v23 }
 0x3e3   :  { %8472 = vmatmul.mubr.msk.f32.vlgmr.msra.gmra.mxu1 %vm456_vm3, %v1011_v41 }
 0x3e4   :  { %v9517_v46 = vpop.eup %9516  ;;  %8480 = vmatpush3.msra.mxu1 %v1270_v45  ;;  %8481 = vmatprep.mubr.msk.f32.mxu1 %vm9839_vm2, %v9838_v23 }
 0x3e5   :  { %v1179_v47 = vmul.f32 %v9517_v46, %v9513_v33  ;;  %v10157_v46 = vld [vmem:[#allocation12 + $0x4] ss:$8 sps:$4 sm:$0xff]  }
 0x3e7   :  { %8482 = vmatmul.mubr.msk.f32.vlgmr.msra.gmra.mxu1 %vm534_vm4, %v1179_v47  ;;  %v251_v47 = vsub.s32 5, %v9990_v25 }
 0x3e8   :  { %v9519_v48 = vpop.eup %9518  ;;  %1679 = vmatprep.mubr.bf16.mxu1 %v9837_v1 }
 0x3e9   :  { %v1178_v50 = vmul.f32 %v9519_v48, %v9515_v35 }
 0x3eb   :  { %8477 = vmatmul.mubr.msk.f32.vlgmr.msra.gmra.mxu0 %vm534_vm4, %v1178_v50  ;;  %v10163_v50 = vld [vmem:[#allocation12] ss:$8 sps:$4 sm:$0xff]  }
 0x3ec   :  { %1406 = vmatpush1.bf16.msra.mxu0 %v10095_v49  ;;  %1429 = vmatprep.mubr.bf16.mxu0 %v9837_v1 }
 0x3ed   :  { %1407 = vmatprep.subr.bf16.mxu0 %v10104_v0 }
 0x3f0   :  { %1408 = vmatpush1.bf16.msra.mxu0 %v10108_v3 }
 0x3f1   :  { %1409 = vmatprep.subr.bf16.mxu0 %v10114_v5 }
 0x3f4   :  { %1410 = vmatpush1.bf16.msra.mxu0 %v10116_v6 }
 0x3f5   :  { %1411 = vmatprep.subr.bf16.mxu0 %v10120_v7 }
 0x3f8   :  { %1412 = vmatpush1.bf16.msra.mxu0 %v10122_v8 }
 0x3f9   :  { %1489 = vmatprep.subr.bf16.mxu0 %v10126_v9 }
 0x405   :  { %v768_v51 = vpop.f32.mrf.mxu1 }
 0x406   :  { %v772_v52 = vmul.f32 0.125, %v768_v51  ;;  %v10167_v51 = vrot.slane %v9992_v26, %v251_v47 }
 0x407   :  { %v8453_v54 = vpop.f32.mrf.mxu1 }
 0x408   :  { %773 = vst.msk [vmem:[#allocation2 + $0x18] sm:$0xff] %vm534_vm4, %v772_v52  ;;  %v450_v54 = vadd.f32 %v10034_v53, %v10167_v51 }
 0x40b   :  { %v1106_v55 = vpop.xlane.xlu0 %1105 }
 0x40c   :  { %v1124_v57 = vsub.f32 %v1092_v37, %v1106_v55  ;;  %v10141_v37 = vld [vmem:[#allocation12 + $0x20] ss:$8 sps:$4 sm:$0xff]  }
 0x40e   :  { %v1134_v58 = vmul.f32 1.442695, %v1124_v57  ;;  %v1096_v57 = vld [vmem:[#allocation2 + $0x30] sm:$0xff] }
 0x40f   :  { %v1093_v59 = vld [vmem:[#allocation2 + $0x18] sm:$0xff]  ;;  %v1116_v53 = vsel %vm534_vm4, %v1096_v57, -inf }
 0x410   :  { %9520 = vpow2.f32 %v1134_v58  ;;  %v1107_v61 = vsel %vm534_vm4, %v1093_v59, -inf  ;;  %v10183_v58 = vld [vmem:[#allocation12 + $0xb4] ss:$8 sps:$4 sm:$0xff]  }
 0x411   :  { %1108 = vmax.xlane.f32.xlu0 %v1107_v61  ;;  %1655 = vmatprep.subr.bf16.mxu1 %v10183_v58  ;;  %v10189_v61 = vld [vmem:[#allocation12 + $0xa0] ss:$8 sps:$4 sm:$0xff]  }
 0x415   :  { %1111 = vmax.xlane.f32.xlu0 %v1110_v63  ;;  %v10195_v63 = vld [vmem:[#allocation12 + $0x94] ss:$8 sps:$4 sm:$0xff]  }
 0x41d   :  { %v10106_v2 = vpop.eup %9520 }
 0x41e   :  { %v1152_v4 = vsel %vm534_vm4, %v10106_v2, 0.0 }
 0x41f   :  { %1153 = vadd.xlane.f32.xlu1 %v1152_v4  ;;  %v10201_v4 = vld [vmem:[#allocation12 + $0x84] ss:$8 sps:$4 sm:$0xff]  }
 0x49a   :  { %v1109_v10 = vpop.xlane.xlu0 %1108 }
 0x49b   :  { %v1125_v11 = vsub.f32 %v1093_v59, %v1109_v10  ;;  %v10185_v59 = vld [vmem:[#allocation12 + $0xb0] ss:$8 sps:$4 sm:$0xff]   ;;  %v10203_v10 = vld [vmem:[#allocation12 + $0x80] ss:$8 sps:$4 sm:$0xff]  }
 0x49c   :  { %1656 = vmatpush1.bf16.msra.mxu1 %v10185_v59 }
 0x49d   :  { %v1136_v12 = vmul.f32 1.442695, %v1125_v11 }
 0x49e   :  { %v1112_v13 = vpop.xlane.xlu0 %1111 }
 0x49f   :  { %9522 = vpow2.f32 %v1136_v12  ;;  %v1126_v14 = vsub.f32 %v1094_v62, %v1112_v13  ;;  %v926_v15 = vpop.f32.mrf.mxu1  ;;  %v10191_v62 = vld [vmem:[#allocation12 + $0xa4] ss:$8 sps:$4 sm:$0xff]  }
 0x4a0   :  { %v930_v16 = vmul.f32 0.125, %v926_v15  ;;  %1657 = vmatprep.subr.bf16.mxu1 %v10191_v62 }
 0x4a1   :  { %v1138_v17 = vmul.f32 1.442695, %v1126_v14  ;;  %v8463_v18 = vpop.f32.mrf.mxu1  ;;  %1658 = vmatpush1.bf16.msra.mxu1 %v10189_v61 }
 0x4a2   :  { %931 = vst.msk [vmem:[#allocation2 + $0x28] sm:$0xff] %vm534_vm4, %v930_v16  ;;  %1659 = vmatprep.subr.bf16.mxu1 %v10195_v63 }
 0x4a3   :  { %9524 = vpow2.f32 %v1138_v17  ;;  %v1084_v19 = vpop.f32.mrf.mxu1 }
 0x4a4   :  { %v1088_v20 = vmul.f32 0.125, %v1084_v19 }
 0x4a5   :  { %v8473_v21 = vpop.f32.mrf.mxu1 }
 0x4a6   :  { %1089 = vst.msk [vmem:[#allocation2 + $0x38] sm:$0xff] %vm534_vm4, %v1088_v20  ;;  %v10218_v21 = vld [vmem:[#allocation12 + $0xf0] ss:$8 sps:$4 sm:$0xff]  }
 0x4a7   :  { %v1341_v22 = vpop.f32.mrf.mxu1 }
 0x4a8   :  { %v1345_v31 = vpack.c.bf16 %v1341_v22, %v1341_v22  ;;  %v1154_v41 = vpop.xlane.xlu1 %1153  ;;  %v10220_v22 = vld [vmem:[#allocation12 + $0xf4] ss:$8 sps:$4 sm:$0xff]  }
 0x4a9   :  { %v8483_v33 = vpop.f32.mrf.mxu1  ;;  %v10135_v34 = vld [vmem:[#allocation2 + $0x28] sm:$0xff]  ;;  %9526 = vrcp.f32 %v1154_v41 }
 0x4aa   :  { %7685 = vmatmul.mubr.msk.bf16.vlgmr.msra.gmra.mxu0 %vm456_vm3, %v1345_v31  ;;  %v1113_v35 = vsel %vm534_vm4, %v10135_v34, -inf  ;;  %v10222_v31 = vld [vmem:[#allocation12 + $0xe4] ss:$8 sps:$4 sm:$0xff]   ;;  %v10226_v33 = vld [vmem:[#allocation12 + $0xe0] ss:$8 sps:$4 sm:$0xff]  }
 0x4ab   :  { %1490 = vmatpush1.bf16.msra.mxu0 %v10131_v24  ;;  %v1255_v36 = vpop.f32.mrf.mxu0  ;;  %1114 = vmax.xlane.f32.xlu1 %v1113_v35  ;;  %v10232_v35 = vld [vmem:[#allocation12 + $0xd0] ss:$8 sps:$4 sm:$0xff]  }
 0x4ac   :  { %v10143_v38 = vpop.eup %9522  ;;  %1491 = vmatprep.subr.bf16.mxu0 %v10133_v32  ;;  %1513 = vmatprep.mubr.bf16.mxu0 %v9837_v1  ;;  %v1259_v52 = vpack.c.bf16 %v1255_v36, %v1255_v36 }
 0x4ad   :  { %v8478_v42 = vpop.f32.mrf.mxu0  ;;  %v1155_v43 = vsel %vm534_vm4, %v10143_v38, 0.0 }
 0x4ae   :  { %1156 = vadd.xlane.f32.xlu0 %v1155_v43 }
 0x4af   :  { %1492 = vmatpush1.bf16.msra.mxu0 %v10141_v37 }
 0x4b0   :  { %v10154_v45 = vpop.eup %9524  ;;  %1493 = vmatprep.subr.bf16.mxu0 %v10146_v40 }
 0x4b1   :  { %v1158_v48 = vsel %vm534_vm4, %v10154_v45, 0.0 }
 0x4b2   :  { %1159 = vadd.xlane.f32.xlu1 %v1158_v48 }
 0x4b3   :  { %1494 = vmatpush1.bf16.msra.mxu0 %v10152_v44 }
 0x4b4   :  { %1495 = vmatprep.subr.bf16.mxu0 %v10157_v46 }
 0x4b6   :  { %v9527_v55 = vpop.eup %9526 }
 0x4b7   :  { %1496 = vmatpush1.bf16.msra.mxu0 %v10163_v50  ;;  %v1180_v26 = vmul.f32 %v9527_v55, %v10106_v2  ;;  %v10197_v2 = vld [vmem:[#allocation12 + $0x90] ss:$8 sps:$4 sm:$0xff]  }
 0x4b8   :  { %8484 = vmatprep.subr.mxu0 %v9838_v23  ;;  %1660 = vmatpush1.bf16.msra.mxu1 %v10197_v2 }
 0x4b9   :  { %1661 = vmatprep.subr.bf16.mxu1 %v10201_v4 }
 0x4ba   :  { %7694 = vmatmul.mubr.msk.bf16.vlgmr.msra.gmra.mxu0 %vm456_vm3, %v1259_v52  ;;  %v1097_v52 = vld [vmem:[#allocation2 + $0x38] sm:$0xff] }
 0x4bb   :  { %8485 = vmatpush3.msra.mxu0 %v450_v54  ;;  %8486 = vmatprep.mubr.msk.f32.mxu0 %vm9839_vm2, %v9838_v23 }
 0x4bc   :  { %8489 = vmatprep.subr.mxu0 %v9838_v23  ;;  %1662 = vmatpush1.bf16.msra.mxu1 %v10203_v10 }
 0x4bd   :  { %8494 = vmatprep.subr.mxu1 %v9838_v23 }
 0x4c2   :  { %8487 = vmatmul.mubr.msk.f32.vlgmr.msra.gmra.mxu0 %vm534_vm4, %v1180_v26 }
 0x4c3   :  { %1691 = vrot.lane.b32.xlu1 %v450_v54, %s9840_s10  ;;  %8491 = vmatprep.mubr.msk.f32.mxu0 %vm9839_vm2, %v9838_v23 }
 0x4e7   :  { %1117 = vmax.xlane.f32.xlu1 %v1116_v53  ;;  %v1119_v53 = vsel %vm534_vm4, %v1097_v52, -inf }
 0x534   :  { %v1115_v11 = vpop.xlane.xlu1 %1114 }
 0x535   :  { %v1127_v12 = vsub.f32 %v10135_v34, %v1115_v11  ;;  %v10229_v34 = vld [vmem:[#allocation12 + $0xd4] ss:$8 sps:$4 sm:$0xff]  }
 0x537   :  { %v1140_v13 = vmul.f32 1.442695, %v1127_v12  ;;  %v1157_v14 = vpop.xlane.xlu0 %1156 }
 0x538   :  { %9528 = vrcp.f32 %v1157_v14 }
 0x539   :  { %9530 = vpow2.f32 %v1140_v13 }
 0x53b   :  { %v1160_v15 = vpop.xlane.xlu1 %1159 }
 0x53f   :  { %v1692_v16 = vpop.permute.xlu1 %1691 }
 0x540   :  { %8490 = vmatpush3.msra.mxu0 %v1692_v16 }
 0x541   :  { %1827 = vmatprep.subr.bf16.mxu0 %v10220_v22 }
 0x545   :  { %v9529_v17 = vpop.eup %9528 }
 0x546   :  { %v10209_v18 = vpop.eup %9530  ;;  %v1181_v19 = vmul.f32 %v9529_v17, %v10143_v38 }
 0x547   :  { %v1161_v20 = vsel %vm534_vm4, %v10209_v18, 0.0 }
 0x548   :  { %1162 = vadd.xlane.f32.xlu0 %v1161_v20  ;;  %8492 = vmatmul.mubr.msk.f32.vlgmr.msra.gmra.mxu0 %vm534_vm4, %v1181_v19 }
 0x549   :  { %1851 = vmatprep.mubr.bf16.mxu0 %v9837_v1  ;;  %1828 = vmatpush1.bf16.msra.mxu0 %v10218_v21 }
 0x54a   :  { %1829 = vmatprep.subr.bf16.mxu0 %v10222_v31 }
 0x54d   :  { %1830 = vmatpush1.bf16.msra.mxu0 %v10226_v33 }
 0x54e   :  { %1831 = vmatprep.subr.bf16.mxu0 %v10229_v34 }
 0x551   :  { %1832 = vmatpush1.bf16.msra.mxu0 %v10232_v35 }
 0x55e   :  { %1961 = vrot.lane.b32.xlu0 %v10041_v56, %s9840_s10 }
 0x56a   :  { %v1431_v36 = vpop.f32.mrf.mxu0 }
 0x56c   :  { %v1433_v38 = vpop.f32.mrf.mxu0 }
 0x56e   :  { %v1435_v41 = vpop.f32.mrf.mxu0 }
 0x570   :  { %v1118_v42 = vpop.xlane.xlu1 %1117  ;;  %v1436_v43 = vpop.f32.mrf.mxu0 }
 0x571   :  { %v1128_v47 = vsub.f32 %v1096_v57, %v1118_v42 }
 0x573   :  { %v1142_v48 = vmul.f32 1.442695, %v1128_v47 }
 0x575   :  { %9532 = vpow2.f32 %v1142_v48 }
 0x576   :  { %9534 = vrcp.f32 %v1160_v15  ;;  %v10250_v15 = vld [vmem:[#allocation12 + $0xc4] ss:$8 sps:$4 sm:$0xff]  }
 0x577   :  { %1833 = vmatprep.subr.bf16.mxu0 %v10250_v15 }
 0x57a   :  { %v1515_v54 = vpop.f32.mrf.mxu0 }
 0x57b   :  { %v10236_v55 = vadd.f32 %v1515_v54, %v1431_v36  ;;  %v10252_v36 = vld [vmem:[#allocation12 + $0xc0] ss:$8 sps:$4 sm:$0xff]  }
 0x57c   :  { %v1517_v26 = vpop.f32.mrf.mxu0  ;;  %1834 = vmatpush1.bf16.msra.mxu0 %v10252_v36 }
 0x57d   :  { %v10239_v11 = vadd.f32 %v1517_v26, %v1433_v38  ;;  %1120 = vmax.xlane.f32.xlu0 %v1119_v53  ;;  %2097 = vmatprep.subr.bf16.mxu0 %v10083_v39  ;;  %v8605_v26 = vld [vmem:[#allocation15 + $0x2ec] ss:$16 sps:$4 sm:$0xff]  }
 0x57e   :  { %v1519_v12 = vpop.f32.mrf.mxu0 }
 0x580   :  { %v1520_v13 = vpop.f32.mrf.mxu0 }
 0x582   :  { %v10241_v14 = vpop.eup %9532  ;;  %v1591_v16 = vpop.f32.mrf.mxu0 }
 0x583   :  { %v1595_v17 = vpack.c.bf16 %v1591_v16, %v1591_v16  ;;  %v1164_v57 = vsel %vm534_vm4, %v10241_v14, 0.0  ;;  %v9535_v20 = vpop.eup %9534 }
 0x584   :  { %v8488_v19 = vpop.f32.mrf.mxu0  ;;  %1165 = vadd.xlane.f32.xlu1 %v1164_v57  ;;  %v1182_v38 = vmul.f32 %v9535_v20, %v10154_v45 }
 0x585   :  { %7704 = vmatmul.mubr.msk.bf16.vlgmr.msra.gmra.mxu1 %vm456_vm3, %v1595_v17 }
 0x586   :  { %8495 = vmatpush3.msra.mxu1 %v10041_v56  ;;  %8496 = vmatprep.mubr.msk.f32.mxu1 %vm9839_vm2, %v9838_v23  ;;  %v10263_v56 = vadd.f32 %v10058_v60, %v10167_v51 }
 0x587   :  { %8499 = vmatprep.subr.mxu1 %v9838_v23 }
 0x58d   :  { %8497 = vmatmul.mubr.msk.f32.vlgmr.msra.gmra.mxu1 %vm534_vm4, %v1182_v38 }
 0x58e   :  { %8501 = vmatprep.mubr.msk.f32.mxu1 %vm9839_vm2, %v9838_v23 }
 0x595   :  { %2383 = vrot.lane.b32.xlu1 %v10263_v56, %s9840_s10 }
 0x5d1   :  { %v1163_v41 = vpop.xlane.xlu0 %1162 }
 0x5d2   :  { %9536 = vrcp.f32 %v1163_v41  ;;  %v8614_v41 = vld [vmem:[#allocation15 + $0x2a4] ss:$16 sps:$4 sm:$0xff]  }
 0x5d5   :  { %v1962_v42 = vpop.permute.xlu0 %1961 }
 0x5d6   :  { %8500 = vmatpush3.msra.mxu1 %v1962_v42 }
 0x5d7   :  { %2181 = vmatprep.subr.bf16.mxu1 %v10126_v9 }
 0x5df   :  { %v9537_v45 = vpop.eup %9536 }
 0x5e0   :  { %v1183_v39 = vmul.f32 %v9537_v45, %v10209_v18  ;;  %v8603_v45 = vld [vmem:[#allocation15 + $0x2e8] ss:$16 sps:$4 sm:$0xff]  }
 0x5e2   :  { %8502 = vmatmul.mubr.msk.f32.vlgmr.msra.gmra.mxu1 %vm534_vm4, %v1183_v39 }
 0x5e3   :  { %2182 = vmatpush1.bf16.msra.mxu1 %v10131_v24  ;;  %2205 = vmatprep.mubr.bf16.mxu1 %v9837_v1 }
 0x5e4   :  { %2183 = vmatprep.subr.bf16.mxu1 %v10133_v32 }
 0x5e7   :  { %2184 = vmatpush1.bf16.msra.mxu1 %v10141_v37 }
 0x5e8   :  { %2185 = vmatprep.subr.bf16.mxu1 %v10146_v40 }
 0x5eb   :  { %2186 = vmatpush1.bf16.msra.mxu1 %v10152_v44 }
 0x5ec   :  { %2187 = vmatprep.subr.bf16.mxu1 %v10157_v46 }
 0x5ef   :  { %2188 = vmatpush1.bf16.msra.mxu1 %v10163_v50 }
 0x5f0   :  { %2347 = vmatprep.subr.bf16.mxu1 %v10183_v58 }
 0x606   :  { %v1121_v60 = vpop.xlane.xlu0 %1120 }
 0x607   :  { %v1129_v9 = vsub.f32 %v1097_v52, %v1121_v60  ;;  %v8611_v60 = vld [vmem:[#allocation15 + $0x2cc] ss:$16 sps:$4 sm:$0xff]  }
 0x608   :  { %v1763_v51 = vpop.f32.mrf.mxu0 }
 0x609   :  { %v1144_v24 = vmul.f32 1.442695, %v1129_v9  ;;  %v1767_v18 = vpack.c.bf16 %v1763_v51, %v1763_v51  ;;  %v8612_v9 = vld [vmem:[#allocation15 + $0x2a0] ss:$16 sps:$4 sm:$0xff]  }
 0x60a   :  { %v8493_v43 = vpop.f32.mrf.mxu0 }
 0x60b   :  { %9538 = vpow2.f32 %v1144_v24  ;;  %7714 = vmatmul.mubr.msk.bf16.vlgmr.msra.gmra.mxu0 %vm456_vm3, %v1767_v18  ;;  %v8620_v24 = vld [vmem:[#allocation15 + $0x284] ss:$16 sps:$4 sm:$0xff]   ;;  %v8609_v18 = vld [vmem:[#allocation15 + $0x2c8] ss:$16 sps:$4 sm:$0xff]   ;;  %v8617_v43 = vld [vmem:[#allocation15 + $0x2ac] ss:$16 sps:$4 sm:$0xff]  }
 0x60c   :  { %2098 = vmatpush1.bf16.msra.mxu0 %v10095_v49  ;;  %2121 = vmatprep.mubr.bf16.mxu0 %v9837_v1 }
 0x60d   :  { %2099 = vmatprep.subr.bf16.mxu0 %v10104_v0 }
 0x610   :  { %2100 = vmatpush1.bf16.msra.mxu0 %v10108_v3 }
 0x611   :  { %2101 = vmatprep.subr.bf16.mxu0 %v10114_v5 }
 0x614   :  { %2102 = vmatpush1.bf16.msra.mxu0 %v10116_v6 }
 0x615   :  { %2103 = vmatprep.subr.bf16.mxu0 %v10120_v7  ;;  %v1166_v7 = vpop.xlane.xlu1 %1165 }
 0x616   :  { %9540 = vrcp.f32 %v1166_v7  ;;  %v8635_v7 = vld [vmem:[#allocation15 + $0x24c] ss:$16 sps:$4 sm:$0xff]  }
 0x618   :  { %v9539_v32 = vpop.eup %9538  ;;  %2104 = vmatpush1.bf16.msra.mxu0 %v10122_v8 }
 0x619   :  { %v1167_v37 = vsel %vm534_vm4, %v9539_v32, 0.0  ;;  %8504 = vmatprep.subr.mxu0 %v9838_v23 }
 0x61a   :  { %1168 = vadd.xlane.f32.xlu0 %v1167_v37  ;;  %v8626_v37 = vld [vmem:[#allocation15 + $0x264] ss:$16 sps:$4 sm:$0xff]  }
 0x645   :  { %v1681_v49 = vpop.f32.mrf.mxu1 }
 0x646   :  { %v1688_v40 = vadd.f32 %v1681_v49, %v10236_v55  ;;  %v8615_v49 = vld [vmem:[#allocation15 + $0x2a8] ss:$16 sps:$4 sm:$0xff]  }
 0x647   :  { %v1683_v0 = vpop.f32.mrf.mxu1 }
 0x648   :  { %v1689_v3 = vadd.f32 %v1683_v0, %v10239_v11  ;;  %v8624_v0 = vld [vmem:[#allocation15 + $0x260] ss:$16 sps:$4 sm:$0xff]  }
 0x649   :  { %v1685_v44 = vpop.f32.mrf.mxu1 }
 0x64a   :  { %v8621_v44 = vld [vmem:[#allocation15 + $0x288] ss:$16 sps:$4 sm:$0xff]  }
 0x64b   :  { %v1686_v5 = vpop.f32.mrf.mxu1 }
 0x64c   :  { %v8629_v5 = vld [vmem:[#allocation15 + $0x26c] ss:$16 sps:$4 sm:$0xff]  }
 0x64d   :  { %v1947_v46 = vpop.f32.mrf.mxu1 }
 0x64e   :  { %v1951_v6 = vpack.c.bf16 %v1947_v46, %v1947_v46  ;;  %v8630_v46 = vld [vmem:[#allocation15 + $0x240] ss:$16 sps:$4 sm:$0xff]  }
 0x64f   :  { %v8498_v50 = vpop.f32.mrf.mxu1 }
 0x650   :  { %7734 = vmatmul.mubr.msk.bf16.vlgmr.msra.gmra.mxu1 %vm456_vm3, %v1951_v6  ;;  %v8638_v6 = vld [vmem:[#allocation15 + $0x224] ss:$16 sps:$4 sm:$0xff]   ;;  %v8627_v50 = vld [vmem:[#allocation15 + $0x268] ss:$16 sps:$4 sm:$0xff]  }
 0x651   :  { %2348 = vmatpush1.bf16.msra.mxu1 %v10185_v59  ;;  %2371 = vmatprep.mubr.bf16.mxu1 %v9837_v1 }
 0x652   :  { %2349 = vmatprep.subr.bf16.mxu1 %v10191_v62 }
 0x655   :  { %2350 = vmatpush1.bf16.msra.mxu1 %v10189_v61  ;;  %v9541_v61 = vpop.eup %9540 }
 0x656   :  { %2351 = vmatprep.subr.bf16.mxu1 %v10195_v63  ;;  %v1184_v62 = vmul.f32 %v9541_v61, %v10241_v14  ;;  %v2384_v63 = vpop.permute.xlu1 %2383  ;;  %v8642_v61 = vld [vmem:[#allocation15 + $0x200] ss:$16 sps:$4 sm:$0xff]  }
 0x659   :  { %2352 = vmatpush1.bf16.msra.mxu1 %v10197_v2 }
 0x65a   :  { %2353 = vmatprep.subr.bf16.mxu1 %v10201_v4 }
 0x65d   :  { %2354 = vmatpush1.bf16.msra.mxu1 %v10203_v10 }
 0x6a2   :  { %v2033_v8 = vpop.f32.mrf.mxu1 }
 0x6a3   :  { %v2037_v58 = vpack.c.bf16 %v2033_v8, %v2033_v8  ;;  %v1169_v47 = vpop.xlane.xlu0 %1168  ;;  %v8636_v8 = vld [vmem:[#allocation15 + $0x220] ss:$16 sps:$4 sm:$0xff]  }
 0x6a4   :  { %9542 = vrcp.f32 %v1169_v47  ;;  %v8503_v59 = vpop.f32.mrf.mxu1  ;;  %v8633_v47 = vld [vmem:[#allocation15 + $0x248] ss:$16 sps:$4 sm:$0xff]  }
 0x6a5   :  { %7725 = vmatmul.mubr.msk.bf16.vlgmr.msra.gmra.mxu0 %vm456_vm3, %v2037_v58  ;;  %v8644_v58 = vld [vmem:[#allocation15 + $0x204] ss:$16 sps:$4 sm:$0xff]   ;;  %v8641_v59 = vld [vmem:[#allocation15 + $0x22c] ss:$16 sps:$4 sm:$0xff]  }
 0x6a6   :  { %8505 = vmatpush3.msra.mxu0 %v10263_v56  ;;  %8506 = vmatprep.mubr.msk.f32.mxu0 %vm9839_vm2, %v9838_v23  ;;  %v8606_v56 = vld [vmem:[#allocation15 + $0x2c0] ss:$16 sps:$4 sm:$0xff]  }
 0x6a7   :  { %8509 = vmatprep.subr.mxu0 %v9838_v23 }
 0x6ad   :  { %8507 = vmatmul.mubr.msk.f32.vlgmr.msra.gmra.mxu0 %vm534_vm4, %v1184_v62  ;;  %v8639_v62 = vld [vmem:[#allocation15 + $0x228] ss:$16 sps:$4 sm:$0xff]  }
 0x6ae   :  { %8510 = vmatpush3.msra.mxu0 %v2384_v63  ;;  %8511 = vmatprep.mubr.msk.f32.mxu0 %vm9839_vm2, %v9838_v23  ;;  %v1862_v23 = vld [vmem:[#allocation13] sm:$0x3] }
 0x6af   :  { %2519 = vmatprep.subr.bf16.mxu0 %v10220_v22  ;;  %v1867_v10 = vrot.slane %v1862_v23, %v9996_v28  ;;  %v8647_v63 = vld [vmem:[#allocation15 + $0x20c] ss:$16 sps:$4 sm:$0xff]  }
 0x6b1   :  { %v9543_v2 = vpop.eup %9542 }
 0x6b2   :  { %v1185_v4 = vmul.f32 %v9543_v2, %v9539_v32  ;;  %v8618_v32 = vld [vmem:[#allocation15 + $0x280] ss:$16 sps:$4 sm:$0xff]   ;;  %v8645_v2 = vld [vmem:[#allocation15 + $0x208] ss:$16 sps:$4 sm:$0xff]  }
 0x6b4   :  { %8512 = vmatmul.mubr.msk.f32.vlgmr.msra.gmra.mxu0 %vm534_vm4, %v1185_v4  ;;  %v8648_v4 = vld [vmem:[#allocation15 + $0x3e0] ss:$16 sps:$4 sm:$0xff]  }
 0x6b5   :  { %2520 = vmatpush1.bf16.msra.mxu0 %v10218_v21  ;;  %2543 = vmatprep.mubr.bf16.mxu0 %v9837_v1  ;;  %v1871_v21 = vrot.slane %v1862_v23, %v10000_v30  ;;  %v8650_v23 = vld [vmem:[#allocation15 + $0x3e4] ss:$16 sps:$4 sm:$0xff]  }
 0x6b6   :  { %2521 = vmatprep.subr.bf16.mxu0 %v10222_v31 }
 0x6b9   :  { %2522 = vmatpush1.bf16.msra.mxu0 %v10226_v33 }
 0x6ba   :  { %2523 = vmatprep.subr.bf16.mxu0 %v10229_v34 }
 0x6bd   :  { %2524 = vmatpush1.bf16.msra.mxu0 %v10232_v35  ;;  %v8602_v35 = vld [vmem:[#allocation15 + $0x2e4] ss:$16 sps:$4 sm:$0xff]  }
 0x6be   :  { %2525 = vmatprep.subr.bf16.mxu0 %v10250_v15  ;;  %3095 = vmatprep.subr.bf16.mxu1 %v8602_v35  ;;  %v8600_v15 = vld [vmem:[#allocation15 + $0x2e0] ss:$16 sps:$4 sm:$0xff]   ;;  %v8668_v35 = vld [vmem:[#allocation15 + $0x384] ss:$16 sps:$4 sm:$0xff]  }
 0x6c1   :  { %2526 = vmatpush1.bf16.msra.mxu0 %v10252_v36  ;;  %v8608_v36 = vld [vmem:[#allocation15 + $0x2c4] ss:$16 sps:$4 sm:$0xff]  }
 0x6c2   :  { %3136 = vmatprep.subr.bf16.mxu0 %v8605_v26  ;;  %v8671_v26 = vld [vmem:[#allocation15 + $0x38c] ss:$16 sps:$4 sm:$0xff]  }
 0x6cb   :  { %v1853_v22 = vpop.f32.mrf.mxu0 }
 0x6cc   :  { %v1860_v48 = vadd.f32 %v1853_v22, %v1688_v40  ;;  %v8623_v40 = vld [vmem:[#allocation15 + $0x28c] ss:$16 sps:$4 sm:$0xff]  }
 0x6cd   :  { %v1855_v52 = vpop.f32.mrf.mxu0  ;;  %v8653_v22 = vld [vmem:[#allocation15 + $0x3ec] ss:$16 sps:$4 sm:$0xff]  }
 0x6ce   :  { %v1874_v54 = vadd.f32 %v1867_v10, %v1860_v48  ;;  %v1861_v31 = vadd.f32 %v1855_v52, %v1689_v3  ;;  %v8632_v3 = vld [vmem:[#allocation15 + $0x244] ss:$16 sps:$4 sm:$0xff]   ;;  %v8651_v10 = vld [vmem:[#allocation15 + $0x3e8] ss:$16 sps:$4 sm:$0xff]   ;;  %v8654_v48 = vld [vmem:[#allocation15 + $0x3c0] ss:$16 sps:$4 sm:$0xff]  }
 0x6cf   :  { %v1857_v55 = vpop.f32.mrf.mxu0  ;;  %v8657_v52 = vld [vmem:[#allocation15 + $0x3c8] ss:$16 sps:$4 sm:$0xff]  }
 0x6d0   :  { %1876 = vst [vmem:[#allocation3] sm:$0xff] %v1874_v54  ;;  %v1875_v33 = vadd.f32 %v1871_v21, %v1861_v31  ;;  %v8656_v21 = vld [vmem:[#allocation15 + $0x3c4] ss:$16 sps:$4 sm:$0xff]   ;;  %v8659_v54 = vld [vmem:[#allocation15 + $0x3cc] ss:$16 sps:$4 sm:$0xff]  }
 0x6d1   :  { %v1858_v34 = vpop.f32.mrf.mxu0  ;;  %v8662_v31 = vld [vmem:[#allocation15 + $0x3a4] ss:$16 sps:$4 sm:$0xff]   ;;  %v8665_v55 = vld [vmem:[#allocation15 + $0x3ac] ss:$16 sps:$4 sm:$0xff]  }
 0x6d2   :  { %1877 = vst [vmem:[#allocation3 + $0x8] sm:$0xff] %v1875_v33  ;;  %v8660_v33 = vld [vmem:[#allocation15 + $0x3a0] ss:$16 sps:$4 sm:$0xff]   ;;  %v8663_v34 = vld [vmem:[#allocation15 + $0x3a8] ss:$16 sps:$4 sm:$0xff]  }
 0x710   :  { %v10322_v53 = vpop.f32.mrf.mxu1 }
 0x712   :  { %v10324_v11 = vpop.f32.mrf.mxu1 }
 0x714   :  { %v2211_v12 = vpop.f32.mrf.mxu1 }
 0x715   :  { %v8666_v12 = vld [vmem:[#allocation15 + $0x380] ss:$16 sps:$4 sm:$0xff]  }
 0x716   :  { %v2212_v13 = vpop.f32.mrf.mxu1 }
 0x717   :  { %v8669_v13 = vld [vmem:[#allocation15 + $0x388] ss:$16 sps:$4 sm:$0xff]  }
 0x765   :  { %v10326_v14 = vpop.f32.mrf.mxu0 }
 0x767   :  { %v10328_v16 = vpop.f32.mrf.mxu0 }
 0x769   :  { %v2127_v17 = vpop.f32.mrf.mxu0 }
 0x76a   :  { %v8674_v17 = vld [vmem:[#allocation15 + $0x364] ss:$16 sps:$4 sm:$0xff]  }
 0x76b   :  { %v2128_v57 = vpop.f32.mrf.mxu0 }
 0x76c   :  { %v8677_v57 = vld [vmem:[#allocation15 + $0x36c] ss:$16 sps:$4 sm:$0xff]  }
 0x76d   :  { %v2283_v19 = vpop.f32.mrf.mxu0 }
 0x76e   :  { %v2287_v20 = vpack.c.bf16 %v2283_v19, %v2283_v19  ;;  %v8672_v19 = vld [vmem:[#allocation15 + $0x360] ss:$16 sps:$4 sm:$0xff]  }
 0x76f   :  { %v8508_v38 = vpop.f32.mrf.mxu0 }
 0x770   :  { %7744 = vmatmul.mubr.msk.bf16.vlgmr.msra.gmra.mxu1 %vm456_vm3, %v2287_v20  ;;  %v8680_v20 = vld [vmem:[#allocation15 + $0x344] ss:$16 sps:$4 sm:$0xff]   ;;  %v8678_v38 = vld [vmem:[#allocation15 + $0x340] ss:$16 sps:$4 sm:$0xff]  }
 0x771   :  { %3096 = vmatpush1.bf16.msra.mxu1 %v8600_v15  ;;  %v8675_v15 = vld [vmem:[#allocation15 + $0x368] ss:$16 sps:$4 sm:$0xff]  }
 0x772   :  { %3097 = vmatprep.subr.bf16.mxu1 %v8608_v36  ;;  %v8683_v36 = vld [vmem:[#allocation15 + $0x34c] ss:$16 sps:$4 sm:$0xff]  }
 0x774   :  { %v2455_v42 = vpop.f32.mrf.mxu0 }
 0x775   :  { %v2459_v39 = vpack.c.bf16 %v2455_v42, %v2455_v42  ;;  %3098 = vmatpush1.bf16.msra.mxu1 %v8606_v56  ;;  %v8681_v56 = vld [vmem:[#allocation15 + $0x348] ss:$16 sps:$4 sm:$0xff]   ;;  %v8689_v42 = vld [vmem:[#allocation15 + $0x32c] ss:$16 sps:$4 sm:$0xff]  }
 0x776   :  { %v8513_v51 = vpop.f32.mrf.mxu0  ;;  %3099 = vmatprep.subr.bf16.mxu1 %v8614_v41  ;;  %v8686_v41 = vld [vmem:[#allocation15 + $0x324] ss:$16 sps:$4 sm:$0xff]  }
 0x777   :  { %7754 = vmatmul.mubr.msk.bf16.vlgmr.msra.gmra.mxu0 %vm456_vm3, %v2459_v39  ;;  %v8687_v39 = vld [vmem:[#allocation15 + $0x328] ss:$16 sps:$4 sm:$0xff]   ;;  %v8690_v51 = vld [vmem:[#allocation15 + $0x300] ss:$16 sps:$4 sm:$0xff]  }
 0x778   :  { %3137 = vmatpush1.bf16.msra.mxu0 %v8603_v45  ;;  %v8684_v45 = vld [vmem:[#allocation15 + $0x320] ss:$16 sps:$4 sm:$0xff]  }
 0x779   :  { %3138 = vmatprep.subr.bf16.mxu0 %v8611_v60  ;;  %3100 = vmatpush1.bf16.msra.mxu1 %v8612_v9  ;;  %v8692_v60 = vld [vmem:[#allocation15 + $0x304] ss:$16 sps:$4 sm:$0xff]   ;;  %v8695_v9 = vld [vmem:[#allocation15 + $0x30c] ss:$16 sps:$4 sm:$0xff]  }
 0x77a   :  { %3101 = vmatprep.subr.bf16.mxu1 %v8620_v24  ;;  %v8693_v24 = vld [vmem:[#allocation15 + $0x308] ss:$16 sps:$4 sm:$0xff]  }
 0x77c   :  { %3139 = vmatpush1.bf16.msra.mxu0 %v8609_v18  ;;  %v8698_v18 = vld [vmem:[#allocation15 + $0xe4] ss:$16 sps:$4 sm:$0xff]  }
 0x77d   :  { %3140 = vmatprep.subr.bf16.mxu0 %v8617_v43  ;;  %3102 = vmatpush1.bf16.msra.mxu1 %v8618_v32  ;;  %v8701_v43 = vld [vmem:[#allocation15 + $0xec] ss:$16 sps:$4 sm:$0xff]  }
 0x77e   :  { %3103 = vmatprep.subr.bf16.mxu1 %v8626_v37 }
 0x780   :  { %3141 = vmatpush1.bf16.msra.mxu0 %v8615_v49  ;;  %v2554_v49 = vld [vmem:[#allocation13] sm:$0x3] }
 0x781   :  { %3142 = vmatprep.subr.bf16.mxu0 %v8623_v40  ;;  %3104 = vmatpush1.bf16.msra.mxu1 %v8624_v0  ;;  %v2208_v40 = vadd.f32 %v10322_v53, %v10326_v14  ;;  %v2665_v14 = vld [vmem:[#allocation3 + $0x1] ss:$8 sm:$0x3] }
 0x782   :  { %3105 = vmatprep.subr.bf16.mxu1 %v8632_v3  ;;  %v2210_v3 = vadd.f32 %v10324_v11, %v10328_v16  ;;  %v2677_v11 = vrot.slane %v2665_v14, %v10000_v30  ;;  %v2673_v16 = vrot.slane %v2665_v14, %v9996_v28  ;;  %v8743_v14 = vld [vmem:[#allocation15 + $0xc] ss:$16 sps:$4 sm:$0xff]  }
 0x784   :  { %3143 = vmatpush1.bf16.msra.mxu0 %v8621_v44 }
 0x785   :  { %3144 = vmatprep.subr.bf16.mxu0 %v8629_v5  ;;  %3106 = vmatpush1.bf16.msra.mxu1 %v8630_v46  ;;  %v2559_v46 = vrot.slane %v2554_v49, %v9996_v28 }
 0x786   :  { %3107 = vmatprep.subr.bf16.mxu1 %v8638_v6 }
 0x788   :  { %3145 = vmatpush1.bf16.msra.mxu0 %v8627_v50 }
 0x789   :  { %3146 = vmatprep.subr.bf16.mxu0 %v8635_v7  ;;  %3108 = vmatpush1.bf16.msra.mxu1 %v8636_v8  ;;  %v2563_v8 = vrot.slane %v2554_v49, %v10000_v30  ;;  %v8716_v49 = vld [vmem:[#allocation15 + $0x84] ss:$16 sps:$4 sm:$0xff]  }
 0x78a   :  { %3109 = vmatprep.subr.bf16.mxu1 %v8644_v58 }
 0x78c   :  { %3147 = vmatpush1.bf16.msra.mxu0 %v8633_v47 }
 0x78d   :  { %3148 = vmatprep.subr.bf16.mxu0 %v8641_v59  ;;  %3110 = vmatpush1.bf16.msra.mxu1 %v8642_v61 }
 0x78e   :  { %3111 = vmatprep.subr.bf16.mxu1 %v8650_v23 }
 0x790   :  { %3149 = vmatpush1.bf16.msra.mxu0 %v8639_v62 }
 0x791   :  { %3150 = vmatprep.subr.bf16.mxu0 %v8647_v63  ;;  %3112 = vmatpush2.bf16.msra.mxu1 %v8648_v4  ;;  %v10338_v63 = vld [vmem:[#allocation3] ss:$8 sm:$0x3] }
 0x792   :  { %3113 = vmatprep.subr.bf16.mxu1 %v8656_v21  ;;  %v2583_v23 = vrot.slane %v10338_v63, %v10000_v30  ;;  %v2691_v21 = vpack.c.bf16 %v2677_v11, %v2677_v11  ;;  %v8738_v11 = vld [vmem:[#allocation15] ss:$16 sps:$4 sm:$0xff]  }
 0x794   :  { %3151 = vmatpush1.bf16.msra.mxu0 %v8645_v2 }
 0x795   :  { %3152 = vmatprep.subr.bf16.mxu0 %v8653_v22  ;;  %3114 = vmatpush2.bf16.msra.mxu1 %v8654_v48 }
 0x796   :  { %3115 = vmatprep.subr.bf16.mxu1 %v8662_v31 }
 0x798   :  { %3153 = vmatpush2.bf16.msra.mxu0 %v8651_v10 }
 0x799   :  { %3154 = vmatprep.subr.bf16.mxu0 %v8659_v54  ;;  %3116 = vmatpush2.bf16.msra.mxu1 %v8660_v33  ;;  %v2597_v33 = vpack.c.bf16 %v2583_v23, %v2583_v23  ;;  %v8749_v23 = vld [vmem:[#allocation15 + $0x1ec] ss:$16 sps:$4 sm:$0xff]  }
 0x79a   :  { %3117 = vmatprep.subr.bf16.mxu1 %v8668_v35 }
 0x79c   :  { %3155 = vmatpush2.bf16.msra.mxu0 %v8657_v52  ;;  %v2690_v52 = vpack.c.bf16 %v2673_v16, %v2673_v16  ;;  %v8741_v16 = vld [vmem:[#allocation15 + $0x8] ss:$16 sps:$4 sm:$0xff]  }
 0x79d   :  { %3156 = vmatprep.subr.bf16.mxu0 %v8665_v55  ;;  %3118 = vmatpush2.bf16.msra.mxu1 %v8666_v12  ;;  %v2763_v12 = vunpack.c.l.b16 %v2691_v21  ;;  %v8755_v21 = vld [vmem:[#allocation15 + $0x1cc] ss:$16 sps:$4 sm:$0xff]  }
 0x79e   :  { %3119 = vmatprep.subr.bf16.mxu1 %v8674_v17  ;;  %v2762_v17 = vunpack.c.l.b16 %v2690_v52  ;;  %v8750_v52 = vld [vmem:[#allocation15 + $0x1c0] ss:$16 sps:$4 sm:$0xff]  }
 0x7a0   :  { %3157 = vmatpush2.bf16.msra.mxu0 %v8663_v34 }
 0x7a1   :  { %3158 = vmatprep.subr.bf16.mxu0 %v8671_v26  ;;  %3120 = vmatpush2.bf16.msra.mxu1 %v8672_v19 }
 0x7a2   :  { %3121 = vmatprep.subr.bf16.mxu1 %v8680_v20 }
 0x7a4   :  { %3159 = vmatpush2.bf16.msra.mxu0 %v8669_v13 }
 0x7a5   :  { %3160 = vmatprep.subr.bf16.mxu0 %v8677_v57  ;;  %3122 = vmatpush2.bf16.msra.mxu1 %v8678_v38 }
 0x7a6   :  { %3123 = vmatprep.subr.bf16.mxu1 %v8686_v41  ;;  %v8699_v41 = vld [vmem:[#allocation15 + $0xe8] ss:$16 sps:$4 sm:$0xff]  }
 0x7a8   :  { %3161 = vmatpush2.bf16.msra.mxu0 %v8675_v15  ;;  %v3182_v15 = vunpack.c.l.b16 %v2597_v33  ;;  %v8756_v33 = vld [vmem:[#allocation15 + $0x1a0] ss:$16 sps:$4 sm:$0xff]  }
 0x7a9   :  { %3162 = vmatprep.subr.bf16.mxu0 %v8683_v36  ;;  %3124 = vmatpush2.bf16.msra.mxu1 %v8684_v45 }
 0x7aa   :  { %3125 = vmatprep.subr.bf16.mxu1 %v8692_v60  ;;  %v8707_v60 = vld [vmem:[#allocation15 + $0xcc] ss:$16 sps:$4 sm:$0xff]  }
 0x7ac   :  { %3163 = vmatpush2.bf16.msra.mxu0 %v8681_v56  ;;  %v8696_v56 = vld [vmem:[#allocation15 + $0xe0] ss:$16 sps:$4 sm:$0xff]  }
 0x7ad   :  { %3164 = vmatprep.subr.bf16.mxu0 %v8689_v42  ;;  %3126 = vmatpush2.bf16.msra.mxu1 %v8690_v51  ;;  %v8702_v51 = vld [vmem:[#allocation15 + $0xc0] ss:$16 sps:$4 sm:$0xff]  }
 0x7ae   :  { %3513 = vmatprep.subr.bf16.mxu1 %v8698_v18  ;;  %v8710_v18 = vld [vmem:[#allocation15 + $0xa4] ss:$16 sps:$4 sm:$0xff]  }
 0x7b0   :  { %3165 = vmatpush2.bf16.msra.mxu0 %v8687_v39  ;;  %v8704_v39 = vld [vmem:[#allocation15 + $0xc4] ss:$16 sps:$4 sm:$0xff]  }
 0x7b1   :  { %3166 = vmatprep.subr.bf16.mxu0 %v8695_v9 }
 0x7b4   :  { %3167 = vmatpush2.bf16.msra.mxu0 %v8693_v24  ;;  %v8705_v24 = vld [vmem:[#allocation15 + $0xc8] ss:$16 sps:$4 sm:$0xff]  }
 0x7b5   :  { %3554 = vmatprep.subr.bf16.mxu0 %v8701_v43  ;;  %v8713_v43 = vld [vmem:[#allocation15 + $0xac] ss:$16 sps:$4 sm:$0xff]  }
 0x830   :  { %v2373_v32 = vpop.f32.mrf.mxu1 }
 0x831   :  { %v2380_v44 = vadd.f32 %v2373_v32, %v2208_v40  ;;  %v8708_v32 = vld [vmem:[#allocation15 + $0xa0] ss:$16 sps:$4 sm:$0xff]   ;;  %v8719_v40 = vld [vmem:[#allocation15 + $0x8c] ss:$16 sps:$4 sm:$0xff]  }
 0x832   :  { %v2375_v37 = vpop.f32.mrf.mxu1 }
 0x833   :  { %v2381_v50 = vadd.f32 %v2375_v37, %v2210_v3  ;;  %v8711_v37 = vld [vmem:[#allocation15 + $0xa8] ss:$16 sps:$4 sm:$0xff]  }
 0x834   :  { %v2377_v0 = vpop.f32.mrf.mxu1  ;;  %v8717_v3 = vld [vmem:[#allocation15 + $0x88] ss:$16 sps:$4 sm:$0xff]  }
 0x835   :  { %v8714_v0 = vld [vmem:[#allocation15 + $0x80] ss:$16 sps:$4 sm:$0xff]  }
 0x836   :  { %v2378_v5 = vpop.f32.mrf.mxu1 }
 0x837   :  { %v2545_v6 = vpop.f32.mrf.mxu0  ;;  %v8725_v5 = vld [vmem:[#allocation15 + $0x6c] ss:$16 sps:$4 sm:$0xff]  }
 0x838   :  { %v2552_v7 = vadd.f32 %v2545_v6, %v2380_v44  ;;  %v8722_v44 = vld [vmem:[#allocation15 + $0x64] ss:$16 sps:$4 sm:$0xff]   ;;  %v8723_v6 = vld [vmem:[#allocation15 + $0x68] ss:$16 sps:$4 sm:$0xff]  }
 0x839   :  { %v2547_v58 = vpop.f32.mrf.mxu0 }
 0x83a   :  { %v2566_v47 = vadd.f32 %v2559_v46, %v2552_v7  ;;  %v2553_v59 = vadd.f32 %v2547_v58, %v2381_v50  ;;  %v8720_v46 = vld [vmem:[#allocation15 + $0x60] ss:$16 sps:$4 sm:$0xff]   ;;  %v8728_v50 = vld [vmem:[#allocation15 + $0x44] ss:$16 sps:$4 sm:$0xff]   ;;  %v8731_v7 = vld [vmem:[#allocation15 + $0x4c] ss:$16 sps:$4 sm:$0xff]  }
 0x83b   :  { %v2549_v61 = vpop.f32.mrf.mxu0  ;;  %v8729_v58 = vld [vmem:[#allocation15 + $0x48] ss:$16 sps:$4 sm:$0xff]  }
 0x83c   :  { %2569 = vst [vmem:[#allocation3 + $0x10] sm:$0xff] %v2566_v47  ;;  %v2567_v62 = vadd.f32 %v2563_v8, %v2553_v59  ;;  %v8726_v8 = vld [vmem:[#allocation15 + $0x40] ss:$16 sps:$4 sm:$0xff]   ;;  %v8734_v47 = vld [vmem:[#allocation15 + $0x24] ss:$16 sps:$4 sm:$0xff]  }
 0x83d   :  { %v2550_v53 = vpop.f32.mrf.mxu0  ;;  %v8737_v59 = vld [vmem:[#allocation15 + $0x2c] ss:$16 sps:$4 sm:$0xff]   ;;  %v8732_v61 = vld [vmem:[#allocation15 + $0x20] ss:$16 sps:$4 sm:$0xff]  }
 0x83e   :  { %2570 = vst [vmem:[#allocation3 + $0x18] sm:$0xff] %v2567_v62  ;;  %v8735_v62 = vld [vmem:[#allocation15 + $0x28] ss:$16 sps:$4 sm:$0xff]   ;;  %v8740_v53 = vld [vmem:[#allocation15 + $0x4] ss:$16 sps:$4 sm:$0xff]  }
 0x845   :  { %v2667_v2 = vld [vmem:[#allocation3 + $0x11] ss:$8 sm:$0x3]  ;;  %v10342_v4 = vld [vmem:[#allocation3 + $0x10] ss:$8 sm:$0x3] }
 0x846   :  { %v2681_v10 = vrot.slane %v2667_v2, %v9996_v28  ;;  %v2685_v22 = vrot.slane %v2667_v2, %v10000_v30  ;;  %v2591_v48 = vrot.slane %v10342_v4, %v10000_v30  ;;  %v8746_v2 = vld [vmem:[#allocation15 + $0x1e4] ss:$16 sps:$4 sm:$0xff]  }
 0x848   :  { %v2692_v54 = vpack.c.bf16 %v2681_v10, %v2681_v10  ;;  %v2693_v31 = vpack.c.bf16 %v2685_v22, %v2685_v22  ;;  %v2599_v55 = vpack.c.bf16 %v2591_v48, %v2591_v48  ;;  %v8744_v10 = vld [vmem:[#allocation15 + $0x1e0] ss:$16 sps:$4 sm:$0xff]   ;;  %v8747_v22 = vld [vmem:[#allocation15 + $0x1e8] ss:$16 sps:$4 sm:$0xff]   ;;  %v8752_v48 = vld [vmem:[#allocation15 + $0x1c4] ss:$16 sps:$4 sm:$0xff]  }
 0x84a   :  { %v2765_v34 = vunpack.c.l.b16 %v2693_v31  ;;  %v2764_v35 = vunpack.c.l.b16 %v2692_v54  ;;  %v3184_v26 = vunpack.c.l.b16 %v2599_v55  ;;  %v8753_v54 = vld [vmem:[#allocation15 + $0x1c8] ss:$16 sps:$4 sm:$0xff]   ;;  %v8758_v31 = vld [vmem:[#allocation15 + $0x1a4] ss:$16 sps:$4 sm:$0xff]   ;;  %v8761_v55 = vld [vmem:[#allocation15 + $0x1ac] ss:$16 sps:$4 sm:$0xff]  }
 0x84c   :  { %v2769_v13 = vrot.slane %v2765_v34, 7  ;;  %v2766_v57 = vrot.slane %v2764_v35, 7  ;;  %v3187_v19 = vrot.slane %v3184_v26, 7  ;;  %v8759_v34 = vld [vmem:[#allocation15 + $0x1a8] ss:$16 sps:$4 sm:$0xff]  }
 0x84d   :  { %v8764_v35 = vld [vmem:[#allocation15 + $0x184] ss:$16 sps:$4 sm:$0xff]   ;;  %v8767_v26 = vld [vmem:[#allocation15 + $0x18c] ss:$16 sps:$4 sm:$0xff]  }
 0x84e   :  { %v2770_v20 = vsel %vm2767_vm5, %v2769_v13, %v2763_v12  ;;  %v2768_v36 = vsel %vm2767_vm5, %v2766_v57, %v2762_v17  ;;  %v3188_v45 = vsel %vm2767_vm5, %v3187_v19, %v3182_v15  ;;  %v8762_v12 = vld [vmem:[#allocation15 + $0x180] ss:$16 sps:$4 sm:$0xff]   ;;  %v8765_v13 = vld [vmem:[#allocation15 + $0x188] ss:$16 sps:$4 sm:$0xff]   ;;  %v8770_v57 = vld [vmem:[#allocation15 + $0x164] ss:$16 sps:$4 sm:$0xff]   ;;  %v2587_v15 = vrot.slane %v10342_v4, %v9996_v28 }
 0x84f   :  { %v2772_v38 = vpack.c.b16 %v2770_v20, %v2770_v20  ;;  %v2771_v42 = vpack.c.b16 %v2768_v36, %v2768_v36  ;;  %v3190_v9 = vpack.c.b16 %v3188_v45, %v3188_v45  ;;  %v10353_v17 = vld [vmem:[#allocation3 + $0x12] ss:$8 sm:$0x3]  ;;  %v8768_v36 = vld [vmem:[#allocation15 + $0x160] ss:$16 sps:$4 sm:$0xff]  }
 0x850   :  { %v8773_v19 = vld [vmem:[#allocation15 + $0x16c] ss:$16 sps:$4 sm:$0xff]   ;;  %v3616_v20 = vrot.slane %v10353_v17, %v10000_v30  ;;  %v8774_v4 = vld [vmem:[#allocation15 + $0x140] ss:$16 sps:$4 sm:$0xff]  }
 0x851   :  { %3127 = vmatprep.mubr.bf16.mxu1 %v2772_v38  ;;  %3168 = vmatprep.mubr.bf16.mxu0 %v2772_v38  ;;  %v8771_v38 = vld [vmem:[#allocation15 + $0x168] ss:$16 sps:$4 sm:$0xff]   ;;  %v10359_v45 = vld [vmem:[#allocation3 + $0x2] ss:$8 sm:$0x3] }
 0x852   :  { %3128 = vmatmul.mubr.bf16.vlgmr.msra.gmra.mxu1 %v2771_v42  ;;  %3169 = vmatmul.mubr.bf16.vlgmr.msra.gmra.mxu0 %v2771_v42  ;;  %v2598_v42 = vpack.c.bf16 %v2587_v15, %v2587_v15  ;;  %v8830_v15 = vld [vmem:[#allocation15 + $0x424] ss:$16 sps:$4 sm:$0xff]  }
 0x853   :  { %3514 = vmatpush1.bf16.msra.mxu1 %v8696_v56  ;;  %3555 = vmatpush1.bf16.msra.mxu0 %v8699_v41  ;;  %v8776_v56 = vld [vmem:[#allocation15 + $0x144] ss:$16 sps:$4 sm:$0xff]   ;;  %v8779_v41 = vld [vmem:[#allocation15 + $0x14c] ss:$16 sps:$4 sm:$0xff]  }
 0x854   :  { %3545 = vmatprep.mubr.bf16.mxu1 %v3190_v9  ;;  %3586 = vmatprep.mubr.bf16.mxu0 %v3190_v9  ;;  %v8777_v9 = vld [vmem:[#allocation15 + $0x148] ss:$16 sps:$4 sm:$0xff]  }
 0x855   :  { %3515 = vmatprep.subr.bf16.mxu1 %v8704_v39  ;;  %3556 = vmatprep.subr.bf16.mxu0 %v8707_v60  ;;  %v3624_v39 = vpack.c.bf16 %v3616_v20, %v3616_v20  ;;  %v2579_v60 = vrot.slane %v10338_v63, %v9996_v28  ;;  %v8788_v63 = vld [vmem:[#allocation15 + $0x104] ss:$16 sps:$4 sm:$0xff]   ;;  %v8833_v20 = vld [vmem:[#allocation15 + $0x42c] ss:$16 sps:$4 sm:$0xff]  }
 0x857   :  { %3516 = vmatpush1.bf16.msra.mxu1 %v8702_v51  ;;  %3557 = vmatpush1.bf16.msra.mxu0 %v8705_v24  ;;  %v8782_v51 = vld [vmem:[#allocation15 + $0x124] ss:$16 sps:$4 sm:$0xff]   ;;  %v8785_v24 = vld [vmem:[#allocation15 + $0x12c] ss:$16 sps:$4 sm:$0xff]  }
 0x858   :  { %3517 = vmatprep.subr.bf16.mxu1 %v8710_v18  ;;  %3558 = vmatprep.subr.bf16.mxu0 %v8713_v43  ;;  %v3608_v18 = vrot.slane %v10359_v45, %v10000_v30  ;;  %v3183_v43 = vunpack.c.l.b16 %v2598_v42  ;;  %v8834_v42 = vld [vmem:[#allocation15 + $0x400] ss:$16 sps:$4 sm:$0xff]  }
 0x85b   :  { %3518 = vmatpush1.bf16.msra.mxu1 %v8708_v32  ;;  %3559 = vmatpush1.bf16.msra.mxu0 %v8711_v37  ;;  %v3696_v32 = vunpack.c.l.b16 %v3624_v39  ;;  %v2596_v37 = vpack.c.bf16 %v2579_v60, %v2579_v60  ;;  %v8837_v39 = vld [vmem:[#allocation15 + $0x408] ss:$16 sps:$4 sm:$0xff]   ;;  %v8842_v60 = vld [vmem:[#allocation15 + $0x5e4] ss:$16 sps:$4 sm:$0xff]  }
 0x85c   :  { %3519 = vmatprep.subr.bf16.mxu1 %v8716_v49  ;;  %3560 = vmatprep.subr.bf16.mxu0 %v8719_v40  ;;  %v8780_v49 = vld [vmem:[#allocation15 + $0x120] ss:$16 sps:$4 sm:$0xff]   ;;  %v8783_v40 = vld [vmem:[#allocation15 + $0x128] ss:$16 sps:$4 sm:$0xff]  }
 0x85f   :  { %3520 = vmatpush1.bf16.msra.mxu1 %v8714_v0  ;;  %3561 = vmatpush1.bf16.msra.mxu0 %v8717_v3  ;;  %v8791_v0 = vld [vmem:[#allocation15 + $0x10c] ss:$16 sps:$4 sm:$0xff]   ;;  %v3622_v3 = vpack.c.bf16 %v3608_v18, %v3608_v18 }
 0x860   :  { %3521 = vmatprep.subr.bf16.mxu1 %v8722_v44  ;;  %3562 = vmatprep.subr.bf16.mxu0 %v8725_v5  ;;  %v3185_v44 = vrot.slane %v3183_v43, 7  ;;  %v3699_v5 = vrot.slane %v3696_v32, 7  ;;  %v8851_v18 = vld [vmem:[#allocation15 + $0x5cc] ss:$16 sps:$4 sm:$0xff]   ;;  %v8846_v43 = vld [vmem:[#allocation15 + $0x5c0] ss:$16 sps:$4 sm:$0xff]  }
 0x861   :  { %v8849_v32 = vld [vmem:[#allocation15 + $0x5c8] ss:$16 sps:$4 sm:$0xff]  }
 0x863   :  { %3522 = vmatpush1.bf16.msra.mxu1 %v8720_v46  ;;  %3563 = vmatpush1.bf16.msra.mxu0 %v8723_v6  ;;  %v8786_v46 = vld [vmem:[#allocation15 + $0x100] ss:$16 sps:$4 sm:$0xff]   ;;  %v8789_v6 = vld [vmem:[#allocation15 + $0x108] ss:$16 sps:$4 sm:$0xff]  }
 0x864   :  { %3523 = vmatprep.subr.bf16.mxu1 %v8728_v50  ;;  %3564 = vmatprep.subr.bf16.mxu0 %v8731_v7  ;;  %v3181_v50 = vunpack.c.l.b16 %v2596_v37  ;;  %v8794_v7 = vld [vmem:[#allocation15 + $0x4e4] ss:$16 sps:$4 sm:$0xff]  }
 0x865   :  { %v8854_v37 = vld [vmem:[#allocation15 + $0x5a4] ss:$16 sps:$4 sm:$0xff]  }
 0x867   :  { %3524 = vmatpush1.bf16.msra.mxu1 %v8726_v8  ;;  %3565 = vmatpush1.bf16.msra.mxu0 %v8729_v58  ;;  %v8797_v8 = vld [vmem:[#allocation15 + $0x4ec] ss:$16 sps:$4 sm:$0xff]   ;;  %v3694_v58 = vunpack.c.l.b16 %v3622_v3 }
 0x868   :  { %3525 = vmatprep.subr.bf16.mxu1 %v8734_v47  ;;  %3566 = vmatprep.subr.bf16.mxu0 %v8737_v59  ;;  %v3186_v47 = vsel %vm2767_vm5, %v3185_v44, %v3181_v50  ;;  %v8863_v3 = vld [vmem:[#allocation15 + $0x58c] ss:$16 sps:$4 sm:$0xff]   ;;  %v8858_v44 = vld [vmem:[#allocation15 + $0x580] ss:$16 sps:$4 sm:$0xff]   ;;  %v3612_v50 = vrot.slane %v10353_v17, %v9996_v28 }
 0x869   :  { %v3700_v59 = vsel %vm2767_vm5, %v3699_v5, %v3694_v58  ;;  %v8861_v5 = vld [vmem:[#allocation15 + $0x588] ss:$16 sps:$4 sm:$0xff]   ;;  %v8870_v17 = vld [vmem:[#allocation15 + $0x540] ss:$16 sps:$4 sm:$0xff]  }
 0x86b   :  { %3526 = vmatpush1.bf16.msra.mxu1 %v8732_v61  ;;  %3567 = vmatpush1.bf16.msra.mxu0 %v8735_v62  ;;  %v8792_v61 = vld [vmem:[#allocation15 + $0x4e0] ss:$16 sps:$4 sm:$0xff]   ;;  %v3189_v62 = vpack.c.b16 %v3186_v47, %v3186_v47  ;;  %v8867_v47 = vld [vmem:[#allocation15 + $0x568] ss:$16 sps:$4 sm:$0xff]  }
 0x86c   :  { %3527 = vmatprep.subr.bf16.mxu1 %v8740_v53  ;;  %3568 = vmatprep.subr.bf16.mxu0 %v8743_v14  ;;  %v8795_v53 = vld [vmem:[#allocation15 + $0x4e8] ss:$16 sps:$4 sm:$0xff]   ;;  %v3702_v14 = vpack.c.b16 %v3700_v59, %v3700_v59  ;;  %v8872_v59 = vld [vmem:[#allocation15 + $0x544] ss:$16 sps:$4 sm:$0xff]  }
 0x86f   :  { %3528 = vmatpush1.bf16.msra.mxu1 %v8738_v11  ;;  %3569 = vmatpush1.bf16.msra.mxu0 %v8741_v16  ;;  %v8800_v11 = vld [vmem:[#allocation15 + $0x4c4] ss:$16 sps:$4 sm:$0xff]   ;;  %v8803_v16 = vld [vmem:[#allocation15 + $0x4cc] ss:$16 sps:$4 sm:$0xff]  }
 0x870   :  { %3529 = vmatprep.subr.bf16.mxu1 %v8746_v2  ;;  %3570 = vmatprep.subr.bf16.mxu0 %v8749_v23  ;;  %v8798_v2 = vld [vmem:[#allocation15 + $0x4c0] ss:$16 sps:$4 sm:$0xff]   ;;  %v8801_v23 = vld [vmem:[#allocation15 + $0x4c8] ss:$16 sps:$4 sm:$0xff]  }
 0x873   :  { %3530 = vmatpush2.bf16.msra.mxu1 %v8744_v10  ;;  %3571 = vmatpush2.bf16.msra.mxu0 %v8747_v22  ;;  %v8806_v10 = vld [vmem:[#allocation15 + $0x4a4] ss:$16 sps:$4 sm:$0xff]   ;;  %v8809_v22 = vld [vmem:[#allocation15 + $0x4ac] ss:$16 sps:$4 sm:$0xff]  }
 0x874   :  { %3531 = vmatprep.subr.bf16.mxu1 %v8752_v48  ;;  %3572 = vmatprep.subr.bf16.mxu0 %v8755_v21  ;;  %v8804_v48 = vld [vmem:[#allocation15 + $0x4a0] ss:$16 sps:$4 sm:$0xff]   ;;  %v8807_v21 = vld [vmem:[#allocation15 + $0x4a8] ss:$16 sps:$4 sm:$0xff]  }
 0x877   :  { %3532 = vmatpush2.bf16.msra.mxu1 %v8750_v52  ;;  %3573 = vmatpush2.bf16.msra.mxu0 %v8753_v54  ;;  %v8812_v52 = vld [vmem:[#allocation15 + $0x484] ss:$16 sps:$4 sm:$0xff]   ;;  %v8815_v54 = vld [vmem:[#allocation15 + $0x48c] ss:$16 sps:$4 sm:$0xff]  }
 0x878   :  { %3533 = vmatprep.subr.bf16.mxu1 %v8758_v31  ;;  %3574 = vmatprep.subr.bf16.mxu0 %v8761_v55  ;;  %v8810_v31 = vld [vmem:[#allocation15 + $0x480] ss:$16 sps:$4 sm:$0xff]   ;;  %v8813_v55 = vld [vmem:[#allocation15 + $0x488] ss:$16 sps:$4 sm:$0xff]  }
 0x87b   :  { %3534 = vmatpush2.bf16.msra.mxu1 %v8756_v33  ;;  %3575 = vmatpush2.bf16.msra.mxu0 %v8759_v34  ;;  %v8818_v33 = vld [vmem:[#allocation15 + $0x464] ss:$16 sps:$4 sm:$0xff]   ;;  %v8821_v34 = vld [vmem:[#allocation15 + $0x46c] ss:$16 sps:$4 sm:$0xff]  }
 0x87c   :  { %3535 = vmatprep.subr.bf16.mxu1 %v8764_v35  ;;  %3576 = vmatprep.subr.bf16.mxu0 %v8767_v26  ;;  %v8816_v35 = vld [vmem:[#allocation15 + $0x460] ss:$16 sps:$4 sm:$0xff]   ;;  %v8819_v26 = vld [vmem:[#allocation15 + $0x468] ss:$16 sps:$4 sm:$0xff]  }
 0x87f   :  { %3536 = vmatpush2.bf16.msra.mxu1 %v8762_v12  ;;  %3577 = vmatpush2.bf16.msra.mxu0 %v8765_v13  ;;  %v8824_v12 = vld [vmem:[#allocation15 + $0x444] ss:$16 sps:$4 sm:$0xff]   ;;  %v8827_v13 = vld [vmem:[#allocation15 + $0x44c] ss:$16 sps:$4 sm:$0xff]  }
 0x880   :  { %3537 = vmatprep.subr.bf16.mxu1 %v8770_v57  ;;  %3578 = vmatprep.subr.bf16.mxu0 %v8773_v19  ;;  %v8822_v57 = vld [vmem:[#allocation15 + $0x440] ss:$16 sps:$4 sm:$0xff]   ;;  %v8825_v19 = vld [vmem:[#allocation15 + $0x448] ss:$16 sps:$4 sm:$0xff]  }
 0x883   :  { %3538 = vmatpush2.bf16.msra.mxu1 %v8768_v36  ;;  %3579 = vmatpush2.bf16.msra.mxu0 %v8771_v38  ;;  %v8828_v36 = vld [vmem:[#allocation15 + $0x420] ss:$16 sps:$4 sm:$0xff]   ;;  %v8831_v38 = vld [vmem:[#allocation15 + $0x428] ss:$16 sps:$4 sm:$0xff]  }
 0x884   :  { %3539 = vmatprep.subr.bf16.mxu1 %v8776_v56  ;;  %3580 = vmatprep.subr.bf16.mxu0 %v8779_v41  ;;  %v8836_v56 = vld [vmem:[#allocation15 + $0x404] ss:$16 sps:$4 sm:$0xff]   ;;  %v8839_v41 = vld [vmem:[#allocation15 + $0x40c] ss:$16 sps:$4 sm:$0xff]  }
 0x887   :  { %3540 = vmatpush2.bf16.msra.mxu1 %v8774_v4  ;;  %3581 = vmatpush2.bf16.msra.mxu0 %v8777_v9  ;;  %v8845_v4 = vld [vmem:[#allocation15 + $0x5ec] ss:$16 sps:$4 sm:$0xff]   ;;  %v8840_v9 = vld [vmem:[#allocation15 + $0x5e0] ss:$16 sps:$4 sm:$0xff]  }
 0x888   :  { %3541 = vmatprep.subr.bf16.mxu1 %v8782_v51  ;;  %3582 = vmatprep.subr.bf16.mxu0 %v8785_v24  ;;  %v8843_v51 = vld [vmem:[#allocation15 + $0x5e8] ss:$16 sps:$4 sm:$0xff]   ;;  %v8848_v24 = vld [vmem:[#allocation15 + $0x5c4] ss:$16 sps:$4 sm:$0xff]  }
 0x88b   :  { %3542 = vmatpush2.bf16.msra.mxu1 %v8780_v49  ;;  %3583 = vmatpush2.bf16.msra.mxu0 %v8783_v40  ;;  %v8857_v49 = vld [vmem:[#allocation15 + $0x5ac] ss:$16 sps:$4 sm:$0xff]   ;;  %v8852_v40 = vld [vmem:[#allocation15 + $0x5a0] ss:$16 sps:$4 sm:$0xff]  }
 0x88c   :  { %3543 = vmatprep.subr.bf16.mxu1 %v8788_v63  ;;  %3584 = vmatprep.subr.bf16.mxu0 %v8791_v0  ;;  %v8855_v63 = vld [vmem:[#allocation15 + $0x5a8] ss:$16 sps:$4 sm:$0xff]   ;;  %v8860_v0 = vld [vmem:[#allocation15 + $0x584] ss:$16 sps:$4 sm:$0xff]  }
 0x88f   :  { %3544 = vmatpush2.bf16.msra.mxu1 %v8786_v46  ;;  %3585 = vmatpush2.bf16.msra.mxu0 %v8789_v6  ;;  %v8866_v46 = vld [vmem:[#allocation15 + $0x564] ss:$16 sps:$4 sm:$0xff]   ;;  %v10367_v6 = vld [vmem:[#allocation3 + $0x13] ss:$8 sm:$0x3] }
 0x890   :  { %4025 = vmatprep.subr.bf16.mxu1 %v8794_v7  ;;  %4066 = vmatprep.subr.bf16.mxu0 %v8797_v8  ;;  %v8869_v7 = vld [vmem:[#allocation15 + $0x56c] ss:$16 sps:$4 sm:$0xff]   ;;  %v8864_v8 = vld [vmem:[#allocation15 + $0x560] ss:$16 sps:$4 sm:$0xff]   ;;  %v4132_v58 = vrot.slane %v10367_v6, %v10000_v30 }
 0x892   :  { %3546 = vmatmul.mubr.bf16.vlgmr.msra.gmra.mxu1 %v3189_v62  ;;  %3587 = vmatmul.mubr.bf16.vlgmr.msra.gmra.mxu0 %v3189_v62  ;;  %v8875_v62 = vld [vmem:[#allocation15 + $0x54c] ss:$16 sps:$4 sm:$0xff]  }
 0x893   :  { %4026 = vmatpush1.bf16.msra.mxu1 %v8792_v61  ;;  %4057 = vmatprep.mubr.bf16.mxu1 %v3702_v14  ;;  %v3623_v61 = vpack.c.bf16 %v3612_v50, %v3612_v50  ;;  %v8921_v50 = vld [vmem:[#allocation15 + $0x648] ss:$16 sps:$4 sm:$0xff]  }
 0x894   :  { %4067 = vmatpush1.bf16.msra.mxu0 %v8795_v53  ;;  %4098 = vmatprep.mubr.bf16.mxu0 %v3702_v14  ;;  %v10373_v53 = vld [vmem:[#allocation3 + $0x3] ss:$8 sm:$0x3]  ;;  %v3604_v14 = vrot.slane %v10359_v45, %v9996_v28 }
 0x895   :  { %4027 = vmatprep.subr.bf16.mxu1 %v8800_v11  ;;  %4068 = vmatprep.subr.bf16.mxu0 %v8803_v16  ;;  %v4140_v11 = vpack.c.bf16 %v4132_v58, %v4132_v58  ;;  %v8873_v16 = vld [vmem:[#allocation15 + $0x548] ss:$16 sps:$4 sm:$0xff]   ;;  %v8924_v58 = vld [vmem:[#allocation15 + $0x620] ss:$16 sps:$4 sm:$0xff]  }
 0x896   :  { %v8879_v45 = vld [vmem:[#allocation15 + $0x528] ss:$16 sps:$4 sm:$0xff]  }
 0x897   :  { %4028 = vmatpush1.bf16.msra.mxu1 %v8798_v2  ;;  %v8878_v2 = vld [vmem:[#allocation15 + $0x524] ss:$16 sps:$4 sm:$0xff]  }
 0x898   :  { %4069 = vmatpush1.bf16.msra.mxu0 %v8801_v23  ;;  %4029 = vmatprep.subr.bf16.mxu1 %v8806_v10  ;;  %v8881_v23 = vld [vmem:[#allocation15 + $0x52c] ss:$16 sps:$4 sm:$0xff]   ;;  %v3695_v10 = vunpack.c.l.b16 %v3623_v61 }
 0x899   :  { %4070 = vmatprep.subr.bf16.mxu0 %v8809_v22  ;;  %v4124_v22 = vrot.slane %v10373_v53, %v10000_v30  ;;  %v8935_v61 = vld [vmem:[#allocation15 + $0x60c] ss:$16 sps:$4 sm:$0xff]  }
 0x89b   :  { %4030 = vmatpush1.bf16.msra.mxu1 %v8804_v48  ;;  %v3621_v48 = vpack.c.bf16 %v3604_v14, %v3604_v14  ;;  %v8933_v14 = vld [vmem:[#allocation15 + $0x608] ss:$16 sps:$4 sm:$0xff]  }
 0x89c   :  { %4071 = vmatpush1.bf16.msra.mxu0 %v8807_v21  ;;  %4031 = vmatprep.subr.bf16.mxu1 %v8812_v52  ;;  %v8876_v21 = vld [vmem:[#allocation15 + $0x520] ss:$16 sps:$4 sm:$0xff]   ;;  %v4212_v52 = vunpack.c.l.b16 %v4140_v11  ;;  %v8941_v11 = vld [vmem:[#allocation15 + $0x7ec] ss:$16 sps:$4 sm:$0xff]  }
 0x89d   :  { %4072 = vmatprep.subr.bf16.mxu0 %v8815_v54  ;;  %v8884_v54 = vld [vmem:[#allocation15 + $0x504] ss:$16 sps:$4 sm:$0xff]  }
 0x89f   :  { %4032 = vmatpush1.bf16.msra.mxu1 %v8810_v31  ;;  %v8887_v31 = vld [vmem:[#allocation15 + $0x50c] ss:$16 sps:$4 sm:$0xff]  }
 0x8a0   :  { %4073 = vmatpush1.bf16.msra.mxu0 %v8813_v55  ;;  %4033 = vmatprep.subr.bf16.mxu1 %v8818_v33  ;;  %v3697_v55 = vrot.slane %v3695_v10, 7  ;;  %v4138_v33 = vpack.c.bf16 %v4124_v22, %v4124_v22  ;;  %v8947_v10 = vld [vmem:[#allocation15 + $0x7cc] ss:$16 sps:$4 sm:$0xff]   ;;  %v8942_v22 = vld [vmem:[#allocation15 + $0x7c0] ss:$16 sps:$4 sm:$0xff]  }
 0x8a1   :  { %4074 = vmatprep.subr.bf16.mxu0 %v8821_v34  ;;  %v8882_v34 = vld [vmem:[#allocation15 + $0x500] ss:$16 sps:$4 sm:$0xff]  }
 0x8a3   :  { %4034 = vmatpush1.bf16.msra.mxu1 %v8816_v35  ;;  %v3693_v35 = vunpack.c.l.b16 %v3621_v48  ;;  %v8945_v48 = vld [vmem:[#allocation15 + $0x7c8] ss:$16 sps:$4 sm:$0xff]  }
 0x8a4   :  { %4075 = vmatpush1.bf16.msra.mxu0 %v8819_v26  ;;  %4035 = vmatprep.subr.bf16.mxu1 %v8824_v12  ;;  %v4215_v26 = vrot.slane %v4212_v52, 7  ;;  %v8885_v12 = vld [vmem:[#allocation15 + $0x508] ss:$16 sps:$4 sm:$0xff]   ;;  %v8953_v52 = vld [vmem:[#allocation15 + $0x7ac] ss:$16 sps:$4 sm:$0xff]  }
 0x8a5   :  { %4076 = vmatprep.subr.bf16.mxu0 %v8827_v13  ;;  %v8890_v13 = vld [vmem:[#allocation15 + $0x6e4] ss:$16 sps:$4 sm:$0xff]  }
 0x8a7   :  { %4036 = vmatpush1.bf16.msra.mxu1 %v8822_v57  ;;  %v3698_v57 = vsel %vm2767_vm5, %v3697_v55, %v3693_v35  ;;  %v8959_v55 = vld [vmem:[#allocation15 + $0x78c] ss:$16 sps:$4 sm:$0xff]   ;;  %v8957_v35 = vld [vmem:[#allocation15 + $0x788] ss:$16 sps:$4 sm:$0xff]  }
 0x8a8   :  { %4077 = vmatpush1.bf16.msra.mxu0 %v8825_v19  ;;  %4037 = vmatprep.subr.bf16.mxu1 %v8830_v15  ;;  %v8893_v19 = vld [vmem:[#allocation15 + $0x6ec] ss:$16 sps:$4 sm:$0xff]   ;;  %v4210_v15 = vunpack.c.l.b16 %v4138_v33  ;;  %v8954_v33 = vld [vmem:[#allocation15 + $0x780] ss:$16 sps:$4 sm:$0xff]  }
 0x8a9   :  { %4078 = vmatprep.subr.bf16.mxu0 %v8833_v20  ;;  %v8888_v20 = vld [vmem:[#allocation15 + $0x6e0] ss:$16 sps:$4 sm:$0xff]  }
 0x8ab   :  { %4038 = vmatpush1.bf16.msra.mxu1 %v8828_v36  ;;  %v4216_v36 = vsel %vm2767_vm5, %v4215_v26, %v4210_v15  ;;  %v8962_v26 = vld [vmem:[#allocation15 + $0x764] ss:$16 sps:$4 sm:$0xff]   ;;  %v8963_v15 = vld [vmem:[#allocation15 + $0x768] ss:$16 sps:$4 sm:$0xff]  }
 0x8ac   :  { %4079 = vmatpush1.bf16.msra.mxu0 %v8831_v38  ;;  %4039 = vmatprep.subr.bf16.mxu1 %v8836_v56  ;;  %v3701_v38 = vpack.c.b16 %v3698_v57, %v3698_v57  ;;  %v8891_v56 = vld [vmem:[#allocation15 + $0x6e8] ss:$16 sps:$4 sm:$0xff]   ;;  %v8960_v57 = vld [vmem:[#allocation15 + $0x760] ss:$16 sps:$4 sm:$0xff]  }
 0x8ad   :  { %4080 = vmatprep.subr.bf16.mxu0 %v8839_v41  ;;  %v8896_v41 = vld [vmem:[#allocation15 + $0x6c4] ss:$16 sps:$4 sm:$0xff]  }
 0x8af   :  { %4040 = vmatpush1.bf16.msra.mxu1 %v8834_v42  ;;  %v4218_v42 = vpack.c.b16 %v4216_v36, %v4216_v36 }
 0x8b0   :  { %4081 = vmatpush1.bf16.msra.mxu0 %v8837_v39  ;;  %4041 = vmatprep.subr.bf16.mxu1 %v8842_v60  ;;  %v8899_v39 = vld [vmem:[#allocation15 + $0x6cc] ss:$16 sps:$4 sm:$0xff]   ;;  %v8894_v60 = vld [vmem:[#allocation15 + $0x6c0] ss:$16 sps:$4 sm:$0xff]  }
 0x8b1   :  { %4082 = vmatprep.subr.bf16.mxu0 %v8845_v4  ;;  %v8897_v4 = vld [vmem:[#allocation15 + $0x6c8] ss:$16 sps:$4 sm:$0xff]  }
 0x8b3   :  { %4042 = vmatpush2.bf16.msra.mxu1 %v8840_v9  ;;  %v8902_v9 = vld [vmem:[#allocation15 + $0x6a4] ss:$16 sps:$4 sm:$0xff]  }
 0x8b4   :  { %4083 = vmatpush2.bf16.msra.mxu0 %v8843_v51  ;;  %4043 = vmatprep.subr.bf16.mxu1 %v8848_v24  ;;  %v8905_v51 = vld [vmem:[#allocation15 + $0x6ac] ss:$16 sps:$4 sm:$0xff]   ;;  %v8900_v24 = vld [vmem:[#allocation15 + $0x6a0] ss:$16 sps:$4 sm:$0xff]  }
 0x8b5   :  { %4084 = vmatprep.subr.bf16.mxu0 %v8851_v18  ;;  %v8903_v18 = vld [vmem:[#allocation15 + $0x6a8] ss:$16 sps:$4 sm:$0xff]  }
 0x8b7   :  { %4044 = vmatpush2.bf16.msra.mxu1 %v8846_v43  ;;  %v8908_v43 = vld [vmem:[#allocation15 + $0x684] ss:$16 sps:$4 sm:$0xff]  }
 0x8b8   :  { %4085 = vmatpush2.bf16.msra.mxu0 %v8849_v32  ;;  %4045 = vmatprep.subr.bf16.mxu1 %v8854_v37  ;;  %v8911_v32 = vld [vmem:[#allocation15 + $0x68c] ss:$16 sps:$4 sm:$0xff]   ;;  %v8906_v37 = vld [vmem:[#allocation15 + $0x680] ss:$16 sps:$4 sm:$0xff]  }
 0x8b9   :  { %4086 = vmatprep.subr.bf16.mxu0 %v8857_v49  ;;  %v8909_v49 = vld [vmem:[#allocation15 + $0x688] ss:$16 sps:$4 sm:$0xff]  }
 0x8bb   :  { %4046 = vmatpush2.bf16.msra.mxu1 %v8852_v40  ;;  %v8914_v40 = vld [vmem:[#allocation15 + $0x664] ss:$16 sps:$4 sm:$0xff]  }
 0x8bc   :  { %4087 = vmatpush2.bf16.msra.mxu0 %v8855_v63  ;;  %4047 = vmatprep.subr.bf16.mxu1 %v8860_v0  ;;  %v8917_v63 = vld [vmem:[#allocation15 + $0x66c] ss:$16 sps:$4 sm:$0xff]   ;;  %v8912_v0 = vld [vmem:[#allocation15 + $0x660] ss:$16 sps:$4 sm:$0xff]  }
 0x8bd   :  { %4088 = vmatprep.subr.bf16.mxu0 %v8863_v3  ;;  %v8915_v3 = vld [vmem:[#allocation15 + $0x668] ss:$16 sps:$4 sm:$0xff]  }
 0x8bf   :  { %4048 = vmatpush2.bf16.msra.mxu1 %v8858_v44  ;;  %v8920_v44 = vld [vmem:[#allocation15 + $0x644] ss:$16 sps:$4 sm:$0xff]  }
 0x8c0   :  { %4089 = vmatpush2.bf16.msra.mxu0 %v8861_v5  ;;  %4049 = vmatprep.subr.bf16.mxu1 %v8866_v46  ;;  %v8923_v5 = vld [vmem:[#allocation15 + $0x64c] ss:$16 sps:$4 sm:$0xff]   ;;  %v8918_v46 = vld [vmem:[#allocation15 + $0x640] ss:$16 sps:$4 sm:$0xff]  }
 0x8c1   :  { %4090 = vmatprep.subr.bf16.mxu0 %v8869_v7  ;;  %v8926_v7 = vld [vmem:[#allocation15 + $0x624] ss:$16 sps:$4 sm:$0xff]  }
 0x8c3   :  { %4050 = vmatpush2.bf16.msra.mxu1 %v8864_v8  ;;  %v8929_v8 = vld [vmem:[#allocation15 + $0x62c] ss:$16 sps:$4 sm:$0xff]  }
 0x8c4   :  { %4091 = vmatpush2.bf16.msra.mxu0 %v8867_v47  ;;  %4051 = vmatprep.subr.bf16.mxu1 %v8872_v59  ;;  %v8927_v47 = vld [vmem:[#allocation15 + $0x628] ss:$16 sps:$4 sm:$0xff]   ;;  %v8932_v59 = vld [vmem:[#allocation15 + $0x604] ss:$16 sps:$4 sm:$0xff]  }
 0x8c5   :  { %4092 = vmatprep.subr.bf16.mxu0 %v8875_v62  ;;  %v8930_v62 = vld [vmem:[#allocation15 + $0x600] ss:$16 sps:$4 sm:$0xff]  }
 0x8c7   :  { %4052 = vmatpush2.bf16.msra.mxu1 %v8870_v17  ;;  %v8938_v17 = vld [vmem:[#allocation15 + $0x7e4] ss:$16 sps:$4 sm:$0xff]  }
 0x8c8   :  { %4093 = vmatpush2.bf16.msra.mxu0 %v8873_v16  ;;  %4053 = vmatprep.subr.bf16.mxu1 %v8878_v2  ;;  %v8936_v16 = vld [vmem:[#allocation15 + $0x7e0] ss:$16 sps:$4 sm:$0xff]   ;;  %v8939_v2 = vld [vmem:[#allocation15 + $0x7e8] ss:$16 sps:$4 sm:$0xff]  }
 0x8c9   :  { %4094 = vmatprep.subr.bf16.mxu0 %v8881_v23  ;;  %v8944_v23 = vld [vmem:[#allocation15 + $0x7c4] ss:$16 sps:$4 sm:$0xff]  }
 0x8cb   :  { %4054 = vmatpush2.bf16.msra.mxu1 %v8876_v21  ;;  %v8950_v21 = vld [vmem:[#allocation15 + $0x7a4] ss:$16 sps:$4 sm:$0xff]  }
 0x8cc   :  { %4095 = vmatpush2.bf16.msra.mxu0 %v8879_v45  ;;  %4055 = vmatprep.subr.bf16.mxu1 %v8884_v54  ;;  %v8948_v45 = vld [vmem:[#allocation15 + $0x7a0] ss:$16 sps:$4 sm:$0xff]   ;;  %v8951_v54 = vld [vmem:[#allocation15 + $0x7a8] ss:$16 sps:$4 sm:$0xff]  }
 0x8cd   :  { %4096 = vmatprep.subr.bf16.mxu0 %v8887_v31  ;;  %v8956_v31 = vld [vmem:[#allocation15 + $0x784] ss:$16 sps:$4 sm:$0xff]  }
 0x8cf   :  { %4056 = vmatpush2.bf16.msra.mxu1 %v8882_v34  ;;  %v10381_v34 = vld [vmem:[#allocation3 + $0x14] ss:$8 sm:$0x3] }
 0x8d0   :  { %4097 = vmatpush2.bf16.msra.mxu0 %v8885_v12  ;;  %4541 = vmatprep.subr.bf16.mxu1 %v8890_v13  ;;  %v4128_v12 = vrot.slane %v10367_v6, %v9996_v28  ;;  %v8965_v13 = vld [vmem:[#allocation15 + $0x76c] ss:$16 sps:$4 sm:$0xff]   ;;  %v8966_v6 = vld [vmem:[#allocation15 + $0x740] ss:$16 sps:$4 sm:$0xff]  }
 0x8d1   :  { %4582 = vmatprep.subr.bf16.mxu0 %v8893_v19  ;;  %v4648_v19 = vrot.slane %v10381_v34, %v10000_v30 }
 0x8d2   :  { %4058 = vmatmul.mubr.bf16.vlgmr.msra.gmra.mxu1 %v3701_v38  ;;  %v4139_v36 = vpack.c.bf16 %v4128_v12, %v4128_v12  ;;  %v9005_v12 = vld [vmem:[#allocation15 + $0x888] ss:$16 sps:$4 sm:$0xff]  }
 0x8d3   :  { %4099 = vmatmul.mubr.bf16.vlgmr.msra.gmra.mxu0 %v3701_v38  ;;  %4542 = vmatpush1.bf16.msra.mxu1 %v8888_v20  ;;  %v8968_v20 = vld [vmem:[#allocation15 + $0x744] ss:$16 sps:$4 sm:$0xff]   ;;  %v8971_v38 = vld [vmem:[#allocation15 + $0x74c] ss:$16 sps:$4 sm:$0xff]  }
 0x8d4   :  { %4573 = vmatprep.mubr.bf16.mxu1 %v4218_v42  ;;  %4583 = vmatpush1.bf16.msra.mxu0 %v8891_v56  ;;  %v10387_v56 = vld [vmem:[#allocation3 + $0x4] ss:$8 sm:$0x3] }
 0x8d5   :  { %4614 = vmatprep.mubr.bf16.mxu0 %v4218_v42  ;;  %4543 = vmatprep.subr.bf16.mxu1 %v8896_v41  ;;  %v4120_v41 = vrot.slane %v10373_v53, %v9996_v28  ;;  %v4656_v42 = vpack.c.bf16 %v4648_v19, %v4648_v19  ;;  %v8975_v53 = vld [vmem:[#allocation15 + $0x728] ss:$16 sps:$4 sm:$0xff]   ;;  %v9008_v19 = vld [vmem:[#allocation15 + $0x860] ss:$16 sps:$4 sm:$0xff]  }
 0x8d6   :  { %4584 = vmatprep.subr.bf16.mxu0 %v8899_v39  ;;  %v8969_v39 = vld [vmem:[#allocation15 + $0x748] ss:$16 sps:$4 sm:$0xff]  }
 0x8d7   :  { %4544 = vmatpush1.bf16.msra.mxu1 %v8894_v60  ;;  %v8974_v60 = vld [vmem:[#allocation15 + $0x724] ss:$16 sps:$4 sm:$0xff]  }
 0x8d8   :  { %4585 = vmatpush1.bf16.msra.mxu0 %v8897_v4  ;;  %4545 = vmatprep.subr.bf16.mxu1 %v8902_v9  ;;  %v8977_v4 = vld [vmem:[#allocation15 + $0x72c] ss:$16 sps:$4 sm:$0xff]   ;;  %v4211_v9 = vunpack.c.l.b16 %v4139_v36 }
 0x8d9   :  { %4586 = vmatprep.subr.bf16.mxu0 %v8905_v51  ;;  %v4640_v51 = vrot.slane %v10387_v56, %v10000_v30  ;;  %v9019_v36 = vld [vmem:[#allocation15 + $0x84c] ss:$16 sps:$4 sm:$0xff]  }
 0x8db   :  { %4546 = vmatpush1.bf16.msra.mxu1 %v8900_v24  ;;  %v4137_v24 = vpack.c.bf16 %v4120_v41, %v4120_v41  ;;  %v9017_v41 = vld [vmem:[#allocation15 + $0x848] ss:$16 sps:$4 sm:$0xff]  }
 0x8dc   :  { %4587 = vmatpush1.bf16.msra.mxu0 %v8903_v18  ;;  %4547 = vmatprep.subr.bf16.mxu1 %v8908_v43  ;;  %v8972_v18 = vld [vmem:[#allocation15 + $0x720] ss:$16 sps:$4 sm:$0xff]   ;;  %v4728_v43 = vunpack.c.l.b16 %v4656_v42  ;;  %v9025_v42 = vld [vmem:[#allocation15 + $0x82c] ss:$16 sps:$4 sm:$0xff]  }
 0x8dd   :  { %4588 = vmatprep.subr.bf16.mxu0 %v8911_v32  ;;  %v8980_v32 = vld [vmem:[#allocation15 + $0x704] ss:$16 sps:$4 sm:$0xff]  }
 0x8df   :  { %4548 = vmatpush1.bf16.msra.mxu1 %v8906_v37  ;;  %v8983_v37 = vld [vmem:[#allocation15 + $0x70c] ss:$16 sps:$4 sm:$0xff]  }
 0x8e0   :  { %4589 = vmatpush1.bf16.msra.mxu0 %v8909_v49  ;;  %4549 = vmatprep.subr.bf16.mxu1 %v8914_v40  ;;  %v4213_v49 = vrot.slane %v4211_v9, 7  ;;  %v4654_v40 = vpack.c.bf16 %v4640_v51, %v4640_v51  ;;  %v9031_v9 = vld [vmem:[#allocation15 + $0x80c] ss:$16 sps:$4 sm:$0xff]   ;;  %v9026_v51 = vld [vmem:[#allocation15 + $0x800] ss:$16 sps:$4 sm:$0xff]  }
 0x8e1   :  { %4590 = vmatprep.subr.bf16.mxu0 %v8917_v63  ;;  %v8978_v63 = vld [vmem:[#allocation15 + $0x700] ss:$16 sps:$4 sm:$0xff]  }
 0x8e3   :  { %4550 = vmatpush1.bf16.msra.mxu1 %v8912_v0  ;;  %v4209_v0 = vunpack.c.l.b16 %v4137_v24  ;;  %v9029_v24 = vld [vmem:[#allocation15 + $0x808] ss:$16 sps:$4 sm:$0xff]  }
 0x8e4   :  { %4591 = vmatpush1.bf16.msra.mxu0 %v8915_v3  ;;  %4551 = vmatprep.subr.bf16.mxu1 %v8920_v44  ;;  %v4731_v3 = vrot.slane %v4728_v43, 7  ;;  %v8981_v44 = vld [vmem:[#allocation15 + $0x708] ss:$16 sps:$4 sm:$0xff]   ;;  %v9037_v43 = vld [vmem:[#allocation15 + $0x9ec] ss:$16 sps:$4 sm:$0xff]  }
 0x8e5   :  { %4592 = vmatprep.subr.bf16.mxu0 %v8923_v5  ;;  %v8986_v5 = vld [vmem:[#allocation15 + $0x8e4] ss:$16 sps:$4 sm:$0xff]  }
 0x8e7   :  { %4552 = vmatpush1.bf16.msra.mxu1 %v8918_v46  ;;  %v4214_v46 = vsel %vm2767_vm5, %v4213_v49, %v4209_v0  ;;  %v9043_v49 = vld [vmem:[#allocation15 + $0x9cc] ss:$16 sps:$4 sm:$0xff]   ;;  %v9046_v0 = vld [vmem:[#allocation15 + $0x9a4] ss:$16 sps:$4 sm:$0xff]  }
 0x8e8   :  { %4593 = vmatpush1.bf16.msra.mxu0 %v8921_v50  ;;  %4553 = vmatprep.subr.bf16.mxu1 %v8926_v7  ;;  %v8989_v50 = vld [vmem:[#allocation15 + $0x8ec] ss:$16 sps:$4 sm:$0xff]   ;;  %v4726_v7 = vunpack.c.l.b16 %v4654_v40  ;;  %v9038_v40 = vld [vmem:[#allocation15 + $0x9c0] ss:$16 sps:$4 sm:$0xff]  }
 0x8e9   :  { %4594 = vmatprep.subr.bf16.mxu0 %v8929_v8  ;;  %v8984_v8 = vld [vmem:[#allocation15 + $0x8e0] ss:$16 sps:$4 sm:$0xff]  }
 0x8eb   :  { %4554 = vmatpush1.bf16.msra.mxu1 %v8924_v58  ;;  %v4732_v58 = vsel %vm2767_vm5, %v4731_v3, %v4726_v7  ;;  %v9049_v3 = vld [vmem:[#allocation15 + $0x9ac] ss:$16 sps:$4 sm:$0xff]   ;;  %v9050_v7 = vld [vmem:[#allocation15 + $0x980] ss:$16 sps:$4 sm:$0xff]  }
 0x8ec   :  { %4595 = vmatpush1.bf16.msra.mxu0 %v8927_v47  ;;  %4555 = vmatprep.subr.bf16.mxu1 %v8932_v59  ;;  %v4217_v47 = vpack.c.b16 %v4214_v46, %v4214_v46  ;;  %v8987_v59 = vld [vmem:[#allocation15 + $0x8e8] ss:$16 sps:$4 sm:$0xff]   ;;  %v9052_v46 = vld [vmem:[#allocation15 + $0x984] ss:$16 sps:$4 sm:$0xff]  }
 0x8ed   :  { %4596 = vmatprep.subr.bf16.mxu0 %v8935_v61  ;;  %v8992_v61 = vld [vmem:[#allocation15 + $0x8c4] ss:$16 sps:$4 sm:$0xff]  }
 0x8ef   :  { %4556 = vmatpush1.bf16.msra.mxu1 %v8930_v62 }
 0x8f0   :  { %4597 = vmatpush1.bf16.msra.mxu0 %v8933_v14  ;;  %4557 = vmatprep.subr.bf16.mxu1 %v8938_v17  ;;  %v4734_v17 = vpack.c.b16 %v4732_v58, %v4732_v58  ;;  %v9053_v58 = vld [vmem:[#allocation15 + $0x988] ss:$16 sps:$4 sm:$0xff]  }
 0x8f1   :  { %4598 = vmatprep.subr.bf16.mxu0 %v8941_v11  ;;  %v8995_v11 = vld [vmem:[#allocation15 + $0x8cc] ss:$16 sps:$4 sm:$0xff]  }
 0x8f3   :  { %4558 = vmatpush2.bf16.msra.mxu1 %v8936_v16  ;;  %v8990_v16 = vld [vmem:[#allocation15 + $0x8c0] ss:$16 sps:$4 sm:$0xff]  }
 0x8f4   :  { %4599 = vmatpush2.bf16.msra.mxu0 %v8939_v2  ;;  %4559 = vmatprep.subr.bf16.mxu1 %v8944_v23 }
 0x8f5   :  { %4600 = vmatprep.subr.bf16.mxu0 %v8947_v10  ;;  %v8993_v10 = vld [vmem:[#allocation15 + $0x8c8] ss:$16 sps:$4 sm:$0xff]  }
 0x8f7   :  { %4560 = vmatpush2.bf16.msra.mxu1 %v8942_v22  ;;  %v8998_v22 = vld [vmem:[#allocation15 + $0x8a4] ss:$16 sps:$4 sm:$0xff]  }
 0x8f8   :  { %4601 = vmatpush2.bf16.msra.mxu0 %v8945_v48  ;;  %4561 = vmatprep.subr.bf16.mxu1 %v8950_v21  ;;  %v9001_v48 = vld [vmem:[#allocation15 + $0x8ac] ss:$16 sps:$4 sm:$0xff]  }
 0x8f9   :  { %4602 = vmatprep.subr.bf16.mxu0 %v8953_v52 }
 0x8fb   :  { %4562 = vmatpush2.bf16.msra.mxu1 %v8948_v45  ;;  %v8996_v45 = vld [vmem:[#allocation15 + $0x8a0] ss:$16 sps:$4 sm:$0xff]  }
 0x8fc   :  { %4603 = vmatpush2.bf16.msra.mxu0 %v8951_v54  ;;  %4563 = vmatprep.subr.bf16.mxu1 %v8956_v31 }
 0x8fd   :  { %4604 = vmatprep.subr.bf16.mxu0 %v8959_v55  ;;  %v8999_v55 = vld [vmem:[#allocation15 + $0x8a8] ss:$16 sps:$4 sm:$0xff]  }
 0x8ff   :  { %4564 = vmatpush2.bf16.msra.mxu1 %v8954_v33  ;;  %v9004_v33 = vld [vmem:[#allocation15 + $0x884] ss:$16 sps:$4 sm:$0xff]  }
 0x900   :  { %4605 = vmatpush2.bf16.msra.mxu0 %v8957_v35  ;;  %4565 = vmatprep.subr.bf16.mxu1 %v8962_v26  ;;  %v9007_v35 = vld [vmem:[#allocation15 + $0x88c] ss:$16 sps:$4 sm:$0xff]   ;;  %v9002_v26 = vld [vmem:[#allocation15 + $0x880] ss:$16 sps:$4 sm:$0xff]  }
 0x901   :  { %4606 = vmatprep.subr.bf16.mxu0 %v8965_v13  ;;  %v9010_v13 = vld [vmem:[#allocation15 + $0x864] ss:$16 sps:$4 sm:$0xff]  }
 0x903   :  { %4566 = vmatpush2.bf16.msra.mxu1 %v8960_v57  ;;  %v9013_v57 = vld [vmem:[#allocation15 + $0x86c] ss:$16 sps:$4 sm:$0xff]  }
 0x904   :  { %4607 = vmatpush2.bf16.msra.mxu0 %v8963_v15  ;;  %4567 = vmatprep.subr.bf16.mxu1 %v8968_v20  ;;  %v9011_v15 = vld [vmem:[#allocation15 + $0x868] ss:$16 sps:$4 sm:$0xff]   ;;  %v9016_v20 = vld [vmem:[#allocation15 + $0x844] ss:$16 sps:$4 sm:$0xff]  }
 0x905   :  { %4608 = vmatprep.subr.bf16.mxu0 %v8971_v38  ;;  %v9014_v38 = vld [vmem:[#allocation15 + $0x840] ss:$16 sps:$4 sm:$0xff]  }
 0x907   :  { %4568 = vmatpush2.bf16.msra.mxu1 %v8966_v6  ;;  %v9022_v6 = vld [vmem:[#allocation15 + $0x824] ss:$16 sps:$4 sm:$0xff]  }
 0x908   :  { %4609 = vmatpush2.bf16.msra.mxu0 %v8969_v39  ;;  %4569 = vmatprep.subr.bf16.mxu1 %v8974_v60  ;;  %v9020_v39 = vld [vmem:[#allocation15 + $0x820] ss:$16 sps:$4 sm:$0xff]   ;;  %v9023_v60 = vld [vmem:[#allocation15 + $0x828] ss:$16 sps:$4 sm:$0xff]  }
 0x909   :  { %4610 = vmatprep.subr.bf16.mxu0 %v8977_v4  ;;  %v9028_v4 = vld [vmem:[#allocation15 + $0x804] ss:$16 sps:$4 sm:$0xff]  }
 0x90b   :  { %4570 = vmatpush2.bf16.msra.mxu1 %v8972_v18  ;;  %v9034_v18 = vld [vmem:[#allocation15 + $0x9e4] ss:$16 sps:$4 sm:$0xff]  }
 0x90c   :  { %4611 = vmatpush2.bf16.msra.mxu0 %v8975_v53  ;;  %4571 = vmatprep.subr.bf16.mxu1 %v8980_v32  ;;  %v9032_v53 = vld [vmem:[#allocation15 + $0x9e0] ss:$16 sps:$4 sm:$0xff]   ;;  %v9035_v32 = vld [vmem:[#allocation15 + $0x9e8] ss:$16 sps:$4 sm:$0xff]  }
 0x90d   :  { %4612 = vmatprep.subr.bf16.mxu0 %v8983_v37  ;;  %v9040_v37 = vld [vmem:[#allocation15 + $0x9c4] ss:$16 sps:$4 sm:$0xff]  }
 0x90f   :  { %4572 = vmatpush2.bf16.msra.mxu1 %v8978_v63  ;;  %v9041_v63 = vld [vmem:[#allocation15 + $0x9c8] ss:$16 sps:$4 sm:$0xff]  }
 0x910   :  { %4613 = vmatpush2.bf16.msra.mxu0 %v8981_v44  ;;  %5057 = vmatprep.subr.bf16.mxu1 %v8986_v5  ;;  %v9044_v44 = vld [vmem:[#allocation15 + $0x9a0] ss:$16 sps:$4 sm:$0xff]   ;;  %v9047_v5 = vld [vmem:[#allocation15 + $0x9a8] ss:$16 sps:$4 sm:$0xff]  }
 0x911   :  { %5098 = vmatprep.subr.bf16.mxu0 %v8989_v50  ;;  %v9055_v50 = vld [vmem:[#allocation15 + $0x98c] ss:$16 sps:$4 sm:$0xff]  }
 0x912   :  { %4574 = vmatmul.mubr.bf16.vlgmr.msra.gmra.mxu1 %v4217_v47  ;;  %v10395_v62 = vpop.f32.mrf.mxu1  ;;  %v10397_v14 = vpop.f32.mrf.mxu0 }
 0x913   :  { %4615 = vmatmul.mubr.bf16.vlgmr.msra.gmra.mxu0 %v4217_v47  ;;  %5058 = vmatpush1.bf16.msra.mxu1 %v8984_v8  ;;  %v10403_v8 = vld [vmem:[#allocation3 + $0x15] ss:$8 sm:$0x3]  ;;  %v9058_v47 = vld [vmem:[#allocation15 + $0x964] ss:$16 sps:$4 sm:$0xff]  }
 0x914   :  { %5089 = vmatprep.mubr.bf16.mxu1 %v4734_v17  ;;  %5099 = vmatpush1.bf16.msra.mxu0 %v8987_v59  ;;  %v10399_v2 = vpop.f32.mrf.mxu1  ;;  %v10401_v23 = vpop.f32.mrf.mxu0  ;;  %v4644_v59 = vrot.slane %v10381_v34, %v9996_v28  ;;  %v9062_v34 = vld [vmem:[#allocation15 + $0x940] ss:$16 sps:$4 sm:$0xff]  }
 0x915   :  { %5130 = vmatprep.mubr.bf16.mxu0 %v4734_v17  ;;  %5059 = vmatprep.subr.bf16.mxu1 %v8992_v61  ;;  %v9061_v61 = vld [vmem:[#allocation15 + $0x96c] ss:$16 sps:$4 sm:$0xff]   ;;  %v9056_v17 = vld [vmem:[#allocation15 + $0x960] ss:$16 sps:$4 sm:$0xff]  }
 0x916   :  { %5100 = vmatprep.subr.bf16.mxu0 %v8995_v11  ;;  %v3133_v21 = vpop.f32.mrf.mxu1  ;;  %v3174_v52 = vpop.f32.mrf.mxu0  ;;  %v5164_v11 = vrot.slane %v10403_v8, %v10000_v30 }
 0x917   :  { %5060 = vmatpush1.bf16.msra.mxu1 %v8990_v16  ;;  %v9059_v16 = vld [vmem:[#allocation15 + $0x968] ss:$16 sps:$4 sm:$0xff]   ;;  %v4636_v52 = vrot.slane %v10387_v56, %v9996_v28 }
 0x918   :  { %5101 = vmatpush1.bf16.msra.mxu0 %v8993_v10  ;;  %v3134_v54 = vpop.f32.mrf.mxu1  ;;  %v3175_v31 = vpop.f32.mrf.mxu0  ;;  %5061 = vmatprep.subr.bf16.mxu1 %v8998_v22  ;;  %v9064_v10 = vld [vmem:[#allocation15 + $0x944] ss:$16 sps:$4 sm:$0xff]   ;;  %v4655_v22 = vpack.c.bf16 %v4644_v59, %v4644_v59  ;;  %v10409_v21 = vld [vmem:[#allocation3 + $0x5] ss:$8 sm:$0x3] }
 0x919   :  { %5102 = vmatprep.subr.bf16.mxu0 %v9001_v48  ;;  %v9067_v48 = vld [vmem:[#allocation15 + $0x94c] ss:$16 sps:$4 sm:$0xff]   ;;  %v9065_v54 = vld [vmem:[#allocation15 + $0x948] ss:$16 sps:$4 sm:$0xff]   ;;  %v9070_v31 = vld [vmem:[#allocation15 + $0x924] ss:$16 sps:$4 sm:$0xff]  }
 0x91a   :  { %v9071_v56 = vld [vmem:[#allocation15 + $0x928] ss:$16 sps:$4 sm:$0xff]  }
 0x91b   :  { %5062 = vmatpush1.bf16.msra.mxu1 %v8996_v45  ;;  %v5172_v45 = vpack.c.bf16 %v5164_v11, %v5164_v11  ;;  %v9100_v11 = vld [vmem:[#allocation15 + $0xa84] ss:$16 sps:$4 sm:$0xff]  }
 0x91c   :  { %5103 = vmatpush1.bf16.msra.mxu0 %v8999_v55  ;;  %5063 = vmatprep.subr.bf16.mxu1 %v9004_v33  ;;  %v9073_v55 = vld [vmem:[#allocation15 + $0x92c] ss:$16 sps:$4 sm:$0xff]   ;;  %v4727_v33 = vunpack.c.l.b16 %v4655_v22 }
 0x91d   :  { %5104 = vmatprep.subr.bf16.mxu0 %v9007_v35  ;;  %v5156_v35 = vrot.slane %v10409_v21, %v10000_v30  ;;  %v9109_v22 = vld [vmem:[#allocation15 + $0xa6c] ss:$16 sps:$4 sm:$0xff]  }
 0x91f   :  { %5064 = vmatpush1.bf16.msra.mxu1 %v9002_v26  ;;  %v4653_v26 = vpack.c.bf16 %v4636_v52, %v4636_v52  ;;  %v9107_v52 = vld [vmem:[#allocation15 + $0xa68] ss:$16 sps:$4 sm:$0xff]  }
 0x920   :  { %5105 = vmatpush1.bf16.msra.mxu0 %v9005_v12  ;;  %5065 = vmatprep.subr.bf16.mxu1 %v9010_v13  ;;  %v9068_v12 = vld [vmem:[#allocation15 + $0x920] ss:$16 sps:$4 sm:$0xff]   ;;  %v5244_v13 = vunpack.c.l.b16 %v5172_v45  ;;  %v9115_v45 = vld [vmem:[#allocation15 + $0xa4c] ss:$16 sps:$4 sm:$0xff]  }
 0x921   :  { %5106 = vmatprep.subr.bf16.mxu0 %v9013_v57  ;;  %v9076_v57 = vld [vmem:[#allocation15 + $0x904] ss:$16 sps:$4 sm:$0xff]  }
 0x923   :  { %5066 = vmatpush1.bf16.msra.mxu1 %v9008_v19  ;;  %v9079_v19 = vld [vmem:[#allocation15 + $0x90c] ss:$16 sps:$4 sm:$0xff]  }
 0x924   :  { %5107 = vmatpush1.bf16.msra.mxu0 %v9011_v15  ;;  %5067 = vmatprep.subr.bf16.mxu1 %v9016_v20  ;;  %v4729_v15 = vrot.slane %v4727_v33, 7  ;;  %v5170_v20 = vpack.c.bf16 %v5156_v35, %v5156_v35  ;;  %v9121_v33 = vld [vmem:[#allocation15 + $0xa2c] ss:$16 sps:$4 sm:$0xff]   ;;  %v9116_v35 = vld [vmem:[#allocation15 + $0xa20] ss:$16 sps:$4 sm:$0xff]  }
 0x925   :  { %5108 = vmatprep.subr.bf16.mxu0 %v9019_v36  ;;  %v9074_v36 = vld [vmem:[#allocation15 + $0x900] ss:$16 sps:$4 sm:$0xff]  }
 0x927   :  { %5068 = vmatpush1.bf16.msra.mxu1 %v9014_v38  ;;  %v4725_v38 = vunpack.c.l.b16 %v4653_v26  ;;  %v9119_v26 = vld [vmem:[#allocation15 + $0xa28] ss:$16 sps:$4 sm:$0xff]  }
 0x928   :  { %5109 = vmatpush1.bf16.msra.mxu0 %v9017_v41  ;;  %5069 = vmatprep.subr.bf16.mxu1 %v9022_v6  ;;  %v5247_v41 = vrot.slane %v5244_v13, 7  ;;  %v9077_v6 = vld [vmem:[#allocation15 + $0x908] ss:$16 sps:$4 sm:$0xff]   ;;  %v9127_v13 = vld [vmem:[#allocation15 + $0xa0c] ss:$16 sps:$4 sm:$0xff]  }
 0x929   :  { %5110 = vmatprep.subr.bf16.mxu0 %v9025_v42  ;;  %v9082_v42 = vld [vmem:[#allocation15 + $0xae4] ss:$16 sps:$4 sm:$0xff]  }
 0x92b   :  { %5070 = vmatpush1.bf16.msra.mxu1 %v9020_v39  ;;  %v4730_v39 = vsel %vm2767_vm5, %v4729_v15, %v4725_v38  ;;  %v9133_v15 = vld [vmem:[#allocation15 + $0xbec] ss:$16 sps:$4 sm:$0xff]   ;;  %v9136_v38 = vld [vmem:[#allocation15 + $0xbc4] ss:$16 sps:$4 sm:$0xff]  }
 0x92c   :  { %5111 = vmatpush1.bf16.msra.mxu0 %v9023_v60  ;;  %5071 = vmatprep.subr.bf16.mxu1 %v9028_v4  ;;  %v9085_v60 = vld [vmem:[#allocation15 + $0xaec] ss:$16 sps:$4 sm:$0xff]   ;;  %v5242_v4 = vunpack.c.l.b16 %v5170_v20  ;;  %v9128_v20 = vld [vmem:[#allocation15 + $0xbe0] ss:$16 sps:$4 sm:$0xff]  }
 0x92d   :  { %5112 = vmatprep.subr.bf16.mxu0 %v9031_v9  ;;  %v9080_v9 = vld [vmem:[#allocation15 + $0xae0] ss:$16 sps:$4 sm:$0xff]  }
 0x92f   :  { %5072 = vmatpush1.bf16.msra.mxu1 %v9026_v51  ;;  %v5248_v51 = vsel %vm2767_vm5, %v5247_v41, %v5242_v4  ;;  %v9139_v41 = vld [vmem:[#allocation15 + $0xbcc] ss:$16 sps:$4 sm:$0xff]   ;;  %v9140_v4 = vld [vmem:[#allocation15 + $0xba0] ss:$16 sps:$4 sm:$0xff]  }
 0x930   :  { %5113 = vmatpush1.bf16.msra.mxu0 %v9029_v24  ;;  %5073 = vmatprep.subr.bf16.mxu1 %v9034_v18  ;;  %v4733_v24 = vpack.c.b16 %v4730_v39, %v4730_v39  ;;  %v9083_v18 = vld [vmem:[#allocation15 + $0xae8] ss:$16 sps:$4 sm:$0xff]   ;;  %v9142_v39 = vld [vmem:[#allocation15 + $0xba4] ss:$16 sps:$4 sm:$0xff]  }
 0x931   :  { %5114 = vmatprep.subr.bf16.mxu0 %v9037_v43  ;;  %v9088_v43 = vld [vmem:[#allocation15 + $0xac4] ss:$16 sps:$4 sm:$0xff]  }
 0x933   :  { %5074 = vmatpush2.bf16.msra.mxu1 %v9032_v53 }
 0x934   :  { %5115 = vmatpush2.bf16.msra.mxu0 %v9035_v32  ;;  %5075 = vmatprep.subr.bf16.mxu1 %v9040_v37  ;;  %v5250_v37 = vpack.c.b16 %v5248_v51, %v5248_v51  ;;  %v9148_v51 = vld [vmem:[#allocation15 + $0xb84] ss:$16 sps:$4 sm:$0xff]  }
 0x935   :  { %5116 = vmatprep.subr.bf16.mxu0 %v9043_v49  ;;  %v9091_v49 = vld [vmem:[#allocation15 + $0xacc] ss:$16 sps:$4 sm:$0xff]  }
 0x937   :  { %5076 = vmatpush2.bf16.msra.mxu1 %v9038_v40 }
 0x938   :  { %5117 = vmatpush2.bf16.msra.mxu0 %v9041_v63  ;;  %5077 = vmatprep.subr.bf16.mxu1 %v9046_v0  ;;  %v9086_v0 = vld [vmem:[#allocation15 + $0xac0] ss:$16 sps:$4 sm:$0xff]  }
 0x939   :  { %5118 = vmatprep.subr.bf16.mxu0 %v9049_v3 }
 0x93b   :  { %5078 = vmatpush2.bf16.msra.mxu1 %v9044_v44 }
 0x93c   :  { %5119 = vmatpush2.bf16.msra.mxu0 %v9047_v5  ;;  %5079 = vmatprep.subr.bf16.mxu1 %v9052_v46  ;;  %v9089_v5 = vld [vmem:[#allocation15 + $0xac8] ss:$16 sps:$4 sm:$0xff]   ;;  %v9094_v46 = vld [vmem:[#allocation15 + $0xaa4] ss:$16 sps:$4 sm:$0xff]  }
 0x93d   :  { %5120 = vmatprep.subr.bf16.mxu0 %v9055_v50 }
 0x93f   :  { %5080 = vmatpush2.bf16.msra.mxu1 %v9050_v7 }
 0x940   :  { %5121 = vmatpush2.bf16.msra.mxu0 %v9053_v58  ;;  %5081 = vmatprep.subr.bf16.mxu1 %v9058_v47  ;;  %v9092_v47 = vld [vmem:[#allocation15 + $0xaa0] ss:$16 sps:$4 sm:$0xff]  }
 0x941   :  { %5122 = vmatprep.subr.bf16.mxu0 %v9061_v61 }
 0x943   :  { %5082 = vmatpush2.bf16.msra.mxu1 %v9056_v17  ;;  %v9095_v17 = vld [vmem:[#allocation15 + $0xaa8] ss:$16 sps:$4 sm:$0xff]  }
 0x944   :  { %5123 = vmatpush2.bf16.msra.mxu0 %v9059_v16  ;;  %5083 = vmatprep.subr.bf16.mxu1 %v9064_v10  ;;  %v9103_v16 = vld [vmem:[#allocation15 + $0xa8c] ss:$16 sps:$4 sm:$0xff]   ;;  %v9106_v10 = vld [vmem:[#allocation15 + $0xa64] ss:$16 sps:$4 sm:$0xff]  }
 0x945   :  { %5124 = vmatprep.subr.bf16.mxu0 %v9067_v48  ;;  %v9104_v48 = vld [vmem:[#allocation15 + $0xa60] ss:$16 sps:$4 sm:$0xff]  }
 0x947   :  { %5084 = vmatpush2.bf16.msra.mxu1 %v9062_v34  ;;  %v9112_v34 = vld [vmem:[#allocation15 + $0xa44] ss:$16 sps:$4 sm:$0xff]  }
 0x948   :  { %5125 = vmatpush2.bf16.msra.mxu0 %v9065_v54  ;;  %5085 = vmatprep.subr.bf16.mxu1 %v9070_v31  ;;  %v9110_v54 = vld [vmem:[#allocation15 + $0xa40] ss:$16 sps:$4 sm:$0xff]   ;;  %v9113_v31 = vld [vmem:[#allocation15 + $0xa48] ss:$16 sps:$4 sm:$0xff]  }
 0x949   :  { %5126 = vmatprep.subr.bf16.mxu0 %v9073_v55  ;;  %v9118_v55 = vld [vmem:[#allocation15 + $0xa24] ss:$16 sps:$4 sm:$0xff]  }
 0x94b   :  { %5086 = vmatpush2.bf16.msra.mxu1 %v9068_v12  ;;  %v9124_v12 = vld [vmem:[#allocation15 + $0xa04] ss:$16 sps:$4 sm:$0xff]  }
 0x94c   :  { %5127 = vmatpush2.bf16.msra.mxu0 %v9071_v56  ;;  %5087 = vmatprep.subr.bf16.mxu1 %v9076_v57  ;;  %v9122_v56 = vld [vmem:[#allocation15 + $0xa00] ss:$16 sps:$4 sm:$0xff]   ;;  %v9125_v57 = vld [vmem:[#allocation15 + $0xa08] ss:$16 sps:$4 sm:$0xff]  }
 0x94d   :  { %5128 = vmatprep.subr.bf16.mxu0 %v9079_v19  ;;  %v9130_v19 = vld [vmem:[#allocation15 + $0xbe4] ss:$16 sps:$4 sm:$0xff]  }
 0x94f   :  { %5088 = vmatpush2.bf16.msra.mxu1 %v9074_v36  ;;  %v9131_v36 = vld [vmem:[#allocation15 + $0xbe8] ss:$16 sps:$4 sm:$0xff]  }
 0x950   :  { %5129 = vmatpush2.bf16.msra.mxu0 %v9077_v6  ;;  %5573 = vmatprep.subr.bf16.mxu1 %v9082_v42  ;;  %v9134_v6 = vld [vmem:[#allocation15 + $0xbc0] ss:$16 sps:$4 sm:$0xff]   ;;  %v9137_v42 = vld [vmem:[#allocation15 + $0xbc8] ss:$16 sps:$4 sm:$0xff]  }
 0x951   :  { %5614 = vmatprep.subr.bf16.mxu0 %v9085_v60  ;;  %v9145_v60 = vld [vmem:[#allocation15 + $0xbac] ss:$16 sps:$4 sm:$0xff]  }
 0x952   :  { %v3547_v53 = vpop.f32.mrf.mxu1  ;;  %v3588_v32 = vpop.f32.mrf.mxu0  ;;  %5090 = vmatmul.mubr.bf16.vlgmr.msra.gmra.mxu1 %v4733_v24 }
 0x953   :  { %v10418_v40 = vadd.f32 %v3547_v53, %v10395_v62  ;;  %v10421_v63 = vadd.f32 %v3588_v32, %v10397_v14  ;;  %5131 = vmatmul.mubr.bf16.vlgmr.msra.gmra.mxu0 %v4733_v24  ;;  %5574 = vmatpush1.bf16.msra.mxu1 %v9080_v9  ;;  %v9097_v62 = vld [vmem:[#allocation15 + $0xaac] ss:$16 sps:$4 sm:$0xff]   ;;  %v9143_v9 = vld [vmem:[#allocation15 + $0xba8] ss:$16 sps:$4 sm:$0xff]   ;;  %v9154_v32 = vld [vmem:[#allocation15 + $0xb64] ss:$16 sps:$4 sm:$0xff]  }
 0x954   :  { %5605 = vmatprep.mubr.bf16.mxu1 %v5250_v37  ;;  %5615 = vmatpush1.bf16.msra.mxu0 %v9083_v18  ;;  %v3549_v3 = vpop.f32.mrf.mxu1  ;;  %v3590_v44 = vpop.f32.mrf.mxu0  ;;  %v9151_v24 = vld [vmem:[#allocation15 + $0xb8c] ss:$16 sps:$4 sm:$0xff]   ;;  %v9146_v18 = vld [vmem:[#allocation15 + $0xb80] ss:$16 sps:$4 sm:$0xff]   ;;  %v9149_v53 = vld [vmem:[#allocation15 + $0xb88] ss:$16 sps:$4 sm:$0xff]  }
 0x955   :  { %5646 = vmatprep.mubr.bf16.mxu0 %v5250_v37  ;;  %v10424_v50 = vadd.f32 %v3549_v3, %v10399_v2  ;;  %v10427_v7 = vadd.f32 %v3590_v44, %v10401_v23  ;;  %5575 = vmatprep.subr.bf16.mxu1 %v9088_v43  ;;  %v9098_v2 = vld [vmem:[#allocation15 + $0xa80] ss:$16 sps:$4 sm:$0xff]   ;;  %v9101_v23 = vld [vmem:[#allocation15 + $0xa88] ss:$16 sps:$4 sm:$0xff]   ;;  %v5160_v37 = vrot.slane %v10403_v8, %v9996_v28 }
 0x956   :  { %v3551_v14 = vpop.f32.mrf.mxu1  ;;  %v3592_v58 = vpop.f32.mrf.mxu0  ;;  %5616 = vmatprep.subr.bf16.mxu0 %v9091_v49  ;;  %v10429_v43 = vld [vmem:[#allocation3 + $0x16] ss:$8 sm:$0x3]  ;;  %v9157_v49 = vld [vmem:[#allocation15 + $0xb6c] ss:$16 sps:$4 sm:$0xff]  }
 0x957   :  { %5576 = vmatpush1.bf16.msra.mxu1 %v9086_v0  ;;  %v9152_v0 = vld [vmem:[#allocation15 + $0xb60] ss:$16 sps:$4 sm:$0xff]   ;;  %v5680_v3 = vrot.slane %v10429_v43, %v10000_v30  ;;  %v9155_v44 = vld [vmem:[#allocation15 + $0xb68] ss:$16 sps:$4 sm:$0xff]   ;;  %v5152_v58 = vrot.slane %v10409_v21, %v9996_v28 }
 0x958   :  { %5617 = vmatpush1.bf16.msra.mxu0 %v9089_v5  ;;  %v3552_v59 = vpop.f32.mrf.mxu1  ;;  %v3593_v61 = vpop.f32.mrf.mxu0  ;;  %5577 = vmatprep.subr.bf16.mxu1 %v9094_v46  ;;  %v9160_v5 = vld [vmem:[#allocation15 + $0xb44] ss:$16 sps:$4 sm:$0xff]   ;;  %v5171_v46 = vpack.c.bf16 %v5160_v37, %v5160_v37  ;;  %v10435_v14 = vld [vmem:[#allocation3 + $0x6] ss:$8 sm:$0x3] }
 0x959   :  { %5618 = vmatprep.subr.bf16.mxu0 %v9097_v62  ;;  %v9163_v62 = vld [vmem:[#allocation15 + $0xb4c] ss:$16 sps:$4 sm:$0xff]   ;;  %v9158_v8 = vld [vmem:[#allocation15 + $0xb40] ss:$16 sps:$4 sm:$0xff]   ;;  %v9161_v59 = vld [vmem:[#allocation15 + $0xb48] ss:$16 sps:$4 sm:$0xff]  }
 0x95a   :  { %v9166_v61 = vld [vmem:[#allocation15 + $0xb24] ss:$16 sps:$4 sm:$0xff]   ;;  %v9167_v21 = vld [vmem:[#allocation15 + $0xb28] ss:$16 sps:$4 sm:$0xff]  }
 0x95b   :  { %5578 = vmatpush1.bf16.msra.mxu1 %v9092_v47  ;;  %v5688_v47 = vpack.c.bf16 %v5680_v3, %v5680_v3 }
 0x95c   :  { %5619 = vmatpush1.bf16.msra.mxu0 %v9095_v17  ;;  %5579 = vmatprep.subr.bf16.mxu1 %v9100_v11  ;;  %v9169_v17 = vld [vmem:[#allocation15 + $0xb2c] ss:$16 sps:$4 sm:$0xff]   ;;  %v5243_v11 = vunpack.c.l.b16 %v5171_v46 }
 0x95d   :  { %5620 = vmatprep.subr.bf16.mxu0 %v9103_v16  ;;  %v5672_v16 = vrot.slane %v10435_v14, %v10000_v30  ;;  %v9205_v46 = vld [vmem:[#allocation15 + $0xc6c] ss:$16 sps:$4 sm:$0xff]  }
 0x95f   :  { %5580 = vmatpush1.bf16.msra.mxu1 %v9098_v2  ;;  %v5169_v2 = vpack.c.bf16 %v5152_v58, %v5152_v58  ;;  %v9203_v58 = vld [vmem:[#allocation15 + $0xc68] ss:$16 sps:$4 sm:$0xff]  }
 0x960   :  { %5621 = vmatpush1.bf16.msra.mxu0 %v9101_v23  ;;  %5581 = vmatprep.subr.bf16.mxu1 %v9106_v10  ;;  %v9164_v23 = vld [vmem:[#allocation15 + $0xb20] ss:$16 sps:$4 sm:$0xff]   ;;  %v5760_v10 = vunpack.c.l.b16 %v5688_v47  ;;  %v9211_v47 = vld [vmem:[#allocation15 + $0xc4c] ss:$16 sps:$4 sm:$0xff]  }
 0x961   :  { %5622 = vmatprep.subr.bf16.mxu0 %v9109_v22  ;;  %v9172_v22 = vld [vmem:[#allocation15 + $0xb04] ss:$16 sps:$4 sm:$0xff]  }
 0x963   :  { %5582 = vmatpush1.bf16.msra.mxu1 %v9104_v48  ;;  %v9175_v48 = vld [vmem:[#allocation15 + $0xb0c] ss:$16 sps:$4 sm:$0xff]  }
 0x964   :  { %5623 = vmatpush1.bf16.msra.mxu0 %v9107_v52  ;;  %5583 = vmatprep.subr.bf16.mxu1 %v9112_v34  ;;  %v5245_v52 = vrot.slane %v5243_v11, 7  ;;  %v5686_v34 = vpack.c.bf16 %v5672_v16, %v5672_v16  ;;  %v9217_v11 = vld [vmem:[#allocation15 + $0xc2c] ss:$16 sps:$4 sm:$0xff]   ;;  %v9212_v16 = vld [vmem:[#allocation15 + $0xc20] ss:$16 sps:$4 sm:$0xff]  }
 0x965   :  { %5624 = vmatprep.subr.bf16.mxu0 %v9115_v45  ;;  %v9170_v45 = vld [vmem:[#allocation15 + $0xb00] ss:$16 sps:$4 sm:$0xff]  }
 0x967   :  { %5584 = vmatpush1.bf16.msra.mxu1 %v9110_v54  ;;  %v5241_v54 = vunpack.c.l.b16 %v5169_v2  ;;  %v9215_v2 = vld [vmem:[#allocation15 + $0xc28] ss:$16 sps:$4 sm:$0xff]  }
 0x968   :  { %5625 = vmatpush1.bf16.msra.mxu0 %v9113_v31  ;;  %5585 = vmatprep.subr.bf16.mxu1 %v9118_v55  ;;  %v5763_v31 = vrot.slane %v5760_v10, 7  ;;  %v9173_v55 = vld [vmem:[#allocation15 + $0xb08] ss:$16 sps:$4 sm:$0xff]   ;;  %v9223_v10 = vld [vmem:[#allocation15 + $0xc0c] ss:$16 sps:$4 sm:$0xff]  }
 0x969   :  { %5626 = vmatprep.subr.bf16.mxu0 %v9121_v33  ;;  %v9178_v33 = vld [vmem:[#allocation15 + $0xce4] ss:$16 sps:$4 sm:$0xff]  }
 0x96b   :  { %5586 = vmatpush1.bf16.msra.mxu1 %v9116_v35  ;;  %v5246_v35 = vsel %vm2767_vm5, %v5245_v52, %v5241_v54  ;;  %v9229_v52 = vld [vmem:[#allocation15 + $0xdec] ss:$16 sps:$4 sm:$0xff]   ;;  %v9232_v54 = vld [vmem:[#allocation15 + $0xdc4] ss:$16 sps:$4 sm:$0xff]  }
 0x96c   :  { %5627 = vmatpush1.bf16.msra.mxu0 %v9119_v26  ;;  %5587 = vmatprep.subr.bf16.mxu1 %v9124_v12  ;;  %v9181_v26 = vld [vmem:[#allocation15 + $0xcec] ss:$16 sps:$4 sm:$0xff]   ;;  %v5758_v12 = vunpack.c.l.b16 %v5686_v34  ;;  %v9224_v34 = vld [vmem:[#allocation15 + $0xde0] ss:$16 sps:$4 sm:$0xff]  }
 0x96d   :  { %5628 = vmatprep.subr.bf16.mxu0 %v9127_v13  ;;  %v9176_v13 = vld [vmem:[#allocation15 + $0xce0] ss:$16 sps:$4 sm:$0xff]  }
 0x96f   :  { %5588 = vmatpush1.bf16.msra.mxu1 %v9122_v56  ;;  %v5764_v56 = vsel %vm2767_vm5, %v5763_v31, %v5758_v12  ;;  %v9235_v31 = vld [vmem:[#allocation15 + $0xdcc] ss:$16 sps:$4 sm:$0xff]   ;;  %v9236_v12 = vld [vmem:[#allocation15 + $0xda0] ss:$16 sps:$4 sm:$0xff]  }
 0x970   :  { %5629 = vmatpush1.bf16.msra.mxu0 %v9125_v57  ;;  %5589 = vmatprep.subr.bf16.mxu1 %v9130_v19  ;;  %v5249_v57 = vpack.c.b16 %v5246_v35, %v5246_v35  ;;  %v9179_v19 = vld [vmem:[#allocation15 + $0xce8] ss:$16 sps:$4 sm:$0xff]   ;;  %v9238_v35 = vld [vmem:[#allocation15 + $0xda4] ss:$16 sps:$4 sm:$0xff]  }
 0x971   :  { %5630 = vmatprep.subr.bf16.mxu0 %v9133_v15  ;;  %v9184_v15 = vld [vmem:[#allocation15 + $0xcc4] ss:$16 sps:$4 sm:$0xff]  }
 0x973   :  { %5590 = vmatpush2.bf16.msra.mxu1 %v9128_v20 }
 0x974   :  { %5631 = vmatpush2.bf16.msra.mxu0 %v9131_v36  ;;  %5591 = vmatprep.subr.bf16.mxu1 %v9136_v38  ;;  %v5766_v36 = vpack.c.b16 %v5764_v56, %v5764_v56  ;;  %v9187_v38 = vld [vmem:[#allocation15 + $0xccc] ss:$16 sps:$4 sm:$0xff]   ;;  %v9244_v56 = vld [vmem:[#allocation15 + $0xd84] ss:$16 sps:$4 sm:$0xff]  }
 0x975   :  { %5632 = vmatprep.subr.bf16.mxu0 %v9139_v41 }
 0x977   :  { %5592 = vmatpush2.bf16.msra.mxu1 %v9134_v6 }
 0x978   :  { %5633 = vmatpush2.bf16.msra.mxu0 %v9137_v42  ;;  %5593 = vmatprep.subr.bf16.mxu1 %v9142_v39  ;;  %v9182_v42 = vld [vmem:[#allocation15 + $0xcc0] ss:$16 sps:$4 sm:$0xff]  }
 0x979   :  { %5634 = vmatprep.subr.bf16.mxu0 %v9145_v60 }
 0x97b   :  { %5594 = vmatpush2.bf16.msra.mxu1 %v9140_v4  ;;  %v9185_v4 = vld [vmem:[#allocation15 + $0xcc8] ss:$16 sps:$4 sm:$0xff]  }
 0x97c   :  { %5635 = vmatpush2.bf16.msra.mxu0 %v9143_v9  ;;  %5595 = vmatprep.subr.bf16.mxu1 %v9148_v51  ;;  %v9190_v9 = vld [vmem:[#allocation15 + $0xca4] ss:$16 sps:$4 sm:$0xff]  }
 0x97d   :  { %5636 = vmatprep.subr.bf16.mxu0 %v9151_v24 }
 0x97f   :  { %5596 = vmatpush2.bf16.msra.mxu1 %v9146_v18 }
 0x980   :  { %5637 = vmatpush2.bf16.msra.mxu0 %v9149_v53  ;;  %5597 = vmatprep.subr.bf16.mxu1 %v9154_v32 }
 0x981   :  { %5638 = vmatprep.subr.bf16.mxu0 %v9157_v49  ;;  %v9191_v49 = vld [vmem:[#allocation15 + $0xca8] ss:$16 sps:$4 sm:$0xff]  }
 0x983   :  { %5598 = vmatpush2.bf16.msra.mxu1 %v9152_v0  ;;  %v9196_v0 = vld [vmem:[#allocation15 + $0xc84] ss:$16 sps:$4 sm:$0xff]  }
 0x984   :  { %5639 = vmatpush2.bf16.msra.mxu0 %v9155_v44  ;;  %5599 = vmatprep.subr.bf16.mxu1 %v9160_v5  ;;  %v9194_v44 = vld [vmem:[#allocation15 + $0xc80] ss:$16 sps:$4 sm:$0xff]   ;;  %v9197_v5 = vld [vmem:[#allocation15 + $0xc88] ss:$16 sps:$4 sm:$0xff]  }
 0x985   :  { %5640 = vmatprep.subr.bf16.mxu0 %v9163_v62  ;;  %v9200_v62 = vld [vmem:[#allocation15 + $0xc60] ss:$16 sps:$4 sm:$0xff]  }
 0x987   :  { %5600 = vmatpush2.bf16.msra.mxu1 %v9158_v8  ;;  %v9208_v8 = vld [vmem:[#allocation15 + $0xc44] ss:$16 sps:$4 sm:$0xff]  }
 0x988   :  { %5641 = vmatpush2.bf16.msra.mxu0 %v9161_v59  ;;  %5601 = vmatprep.subr.bf16.mxu1 %v9166_v61  ;;  %v9206_v59 = vld [vmem:[#allocation15 + $0xc40] ss:$16 sps:$4 sm:$0xff]   ;;  %v9209_v61 = vld [vmem:[#allocation15 + $0xc48] ss:$16 sps:$4 sm:$0xff]  }
 0x989   :  { %5642 = vmatprep.subr.bf16.mxu0 %v9169_v17  ;;  %v9214_v17 = vld [vmem:[#allocation15 + $0xc24] ss:$16 sps:$4 sm:$0xff]  }
 0x98b   :  { %5602 = vmatpush2.bf16.msra.mxu1 %v9164_v23  ;;  %v9220_v23 = vld [vmem:[#allocation15 + $0xc04] ss:$16 sps:$4 sm:$0xff]  }
 0x98c   :  { %5643 = vmatpush2.bf16.msra.mxu0 %v9167_v21  ;;  %5603 = vmatprep.subr.bf16.mxu1 %v9172_v22  ;;  %v9218_v21 = vld [vmem:[#allocation15 + $0xc00] ss:$16 sps:$4 sm:$0xff]   ;;  %v9221_v22 = vld [vmem:[#allocation15 + $0xc08] ss:$16 sps:$4 sm:$0xff]  }
 0x98d   :  { %5644 = vmatprep.subr.bf16.mxu0 %v9175_v48  ;;  %v9226_v48 = vld [vmem:[#allocation15 + $0xde4] ss:$16 sps:$4 sm:$0xff]  }
 0x98f   :  { %5604 = vmatpush2.bf16.msra.mxu1 %v9170_v45  ;;  %v9227_v45 = vld [vmem:[#allocation15 + $0xde8] ss:$16 sps:$4 sm:$0xff]  }
 0x990   :  { %5645 = vmatpush2.bf16.msra.mxu0 %v9173_v55  ;;  %6089 = vmatprep.subr.bf16.mxu1 %v9178_v33  ;;  %v9230_v55 = vld [vmem:[#allocation15 + $0xdc0] ss:$16 sps:$4 sm:$0xff]   ;;  %v9233_v33 = vld [vmem:[#allocation15 + $0xdc8] ss:$16 sps:$4 sm:$0xff]  }
 0x991   :  { %6130 = vmatprep.subr.bf16.mxu0 %v9181_v26  ;;  %v9241_v26 = vld [vmem:[#allocation15 + $0xdac] ss:$16 sps:$4 sm:$0xff]  }
 0x992   :  { %v4059_v20 = vpop.f32.mrf.mxu1  ;;  %5606 = vmatmul.mubr.bf16.vlgmr.msra.gmra.mxu1 %v5249_v57 }
 0x993   :  { %v10444_v41 = vadd.f32 %v4059_v20, %v10418_v40  ;;  %v4100_v6 = vpop.f32.mrf.mxu0  ;;  %5647 = vmatmul.mubr.bf16.vlgmr.msra.gmra.mxu0 %v5249_v57  ;;  %6090 = vmatpush1.bf16.msra.mxu1 %v9176_v13  ;;  %v9193_v40 = vld [vmem:[#allocation15 + $0xcac] ss:$16 sps:$4 sm:$0xff]   ;;  %v9239_v13 = vld [vmem:[#allocation15 + $0xda8] ss:$16 sps:$4 sm:$0xff]  }
 0x994   :  { %v10447_v39 = vadd.f32 %v4100_v6, %v10421_v63  ;;  %6121 = vmatprep.mubr.bf16.mxu1 %v5766_v36  ;;  %6131 = vmatpush1.bf16.msra.mxu0 %v9179_v19  ;;  %v4061_v60 = vpop.f32.mrf.mxu1  ;;  %v9188_v63 = vld [vmem:[#allocation15 + $0xca0] ss:$16 sps:$4 sm:$0xff]   ;;  %v9247_v57 = vld [vmem:[#allocation15 + $0xd8c] ss:$16 sps:$4 sm:$0xff]   ;;  %v9245_v20 = vld [vmem:[#allocation15 + $0xd88] ss:$16 sps:$4 sm:$0xff]  }
 0x995   :  { %6162 = vmatprep.mubr.bf16.mxu0 %v5766_v36  ;;  %v10450_v51 = vadd.f32 %v4061_v60, %v10424_v50  ;;  %v4102_v24 = vpop.f32.mrf.mxu0  ;;  %6091 = vmatprep.subr.bf16.mxu1 %v9184_v15  ;;  %v9199_v50 = vld [vmem:[#allocation15 + $0xc8c] ss:$16 sps:$4 sm:$0xff]   ;;  %v9242_v19 = vld [vmem:[#allocation15 + $0xd80] ss:$16 sps:$4 sm:$0xff]   ;;  %v9250_v36 = vld [vmem:[#allocation15 + $0xd64] ss:$16 sps:$4 sm:$0xff]  }
 0x996   :  { %v10453_v18 = vadd.f32 %v4102_v24, %v10427_v7  ;;  %v4063_v53 = vpop.f32.mrf.mxu1  ;;  %6132 = vmatprep.subr.bf16.mxu0 %v9187_v38  ;;  %v9202_v7 = vld [vmem:[#allocation15 + $0xc64] ss:$16 sps:$4 sm:$0xff]   ;;  %v5676_v38 = vrot.slane %v10429_v43, %v9996_v28  ;;  %v9253_v6 = vld [vmem:[#allocation15 + $0xd6c] ss:$16 sps:$4 sm:$0xff]   ;;  %v9254_v43 = vld [vmem:[#allocation15 + $0xd40] ss:$16 sps:$4 sm:$0xff]  }
 0x997   :  { %v4104_v32 = vpop.f32.mrf.mxu0  ;;  %6092 = vmatpush1.bf16.msra.mxu1 %v9182_v42  ;;  %v10455_v15 = vld [vmem:[#allocation3 + $0x17] ss:$8 sm:$0x3]  ;;  %v9248_v42 = vld [vmem:[#allocation15 + $0xd60] ss:$16 sps:$4 sm:$0xff]  }
 0x998   :  { %6133 = vmatpush1.bf16.msra.mxu0 %v9185_v4  ;;  %v4064_v37 = vpop.f32.mrf.mxu1  ;;  %6093 = vmatprep.subr.bf16.mxu1 %v9190_v9  ;;  %v6196_v60 = vrot.slane %v10455_v15, %v10000_v30  ;;  %v9251_v4 = vld [vmem:[#allocation15 + $0xd68] ss:$16 sps:$4 sm:$0xff]   ;;  %v9256_v9 = vld [vmem:[#allocation15 + $0xd44] ss:$16 sps:$4 sm:$0xff]   ;;  %v5687_v24 = vpack.c.bf16 %v5676_v38, %v5676_v38  ;;  %v5668_v32 = vrot.slane %v10435_v14, %v9996_v28 }
 0x999   :  { %v4105_v3 = vpop.f32.mrf.mxu0  ;;  %6134 = vmatprep.subr.bf16.mxu0 %v9193_v40  ;;  %v9259_v40 = vld [vmem:[#allocation15 + $0xd4c] ss:$16 sps:$4 sm:$0xff]   ;;  %v9257_v37 = vld [vmem:[#allocation15 + $0xd48] ss:$16 sps:$4 sm:$0xff]  }
 0x99a   :  { %v10461_v53 = vld [vmem:[#allocation3 + $0x7] ss:$8 sm:$0x3]  ;;  %v5759_v3 = vunpack.c.l.b16 %v5687_v24  ;;  %v9263_v14 = vld [vmem:[#allocation15 + $0xd28] ss:$16 sps:$4 sm:$0xff]  }
 0x99b   :  { %6094 = vmatpush1.bf16.msra.mxu1 %v9188_v63  ;;  %v6204_v63 = vpack.c.bf16 %v6196_v60, %v6196_v60  ;;  %v9301_v24 = vld [vmem:[#allocation15 + $0xe6c] ss:$16 sps:$4 sm:$0xff]  }
 0x99c   :  { %6135 = vmatpush1.bf16.msra.mxu0 %v9191_v49  ;;  %6095 = vmatprep.subr.bf16.mxu1 %v9196_v0  ;;  %v9262_v49 = vld [vmem:[#allocation15 + $0xd24] ss:$16 sps:$4 sm:$0xff]   ;;  %v9265_v0 = vld [vmem:[#allocation15 + $0xd2c] ss:$16 sps:$4 sm:$0xff]  }
 0x99d   :  { %6136 = vmatprep.subr.bf16.mxu0 %v9199_v50  ;;  %v6188_v50 = vrot.slane %v10461_v53, %v10000_v30 }
 0x99f   :  { %6096 = vmatpush1.bf16.msra.mxu1 %v9194_v44  ;;  %v5685_v44 = vpack.c.bf16 %v5668_v32, %v5668_v32  ;;  %v9299_v32 = vld [vmem:[#allocation15 + $0xe68] ss:$16 sps:$4 sm:$0xff]  }
 0x9a0   :  { %6137 = vmatpush1.bf16.msra.mxu0 %v9197_v5  ;;  %6097 = vmatprep.subr.bf16.mxu1 %v9202_v7  ;;  %v9260_v5 = vld [vmem:[#allocation15 + $0xd20] ss:$16 sps:$4 sm:$0xff]   ;;  %v6276_v7 = vunpack.c.l.b16 %v6204_v63  ;;  %v9307_v63 = vld [vmem:[#allocation15 + $0xe4c] ss:$16 sps:$4 sm:$0xff]  }
 0x9a1   :  { %6138 = vmatprep.subr.bf16.mxu0 %v9205_v46  ;;  %v9268_v46 = vld [vmem:[#allocation15 + $0xd04] ss:$16 sps:$4 sm:$0xff]  }
 0x9a3   :  { %6098 = vmatpush1.bf16.msra.mxu1 %v9200_v62  ;;  %v9271_v62 = vld [vmem:[#allocation15 + $0xd0c] ss:$16 sps:$4 sm:$0xff]  }
 0x9a4   :  { %6139 = vmatpush1.bf16.msra.mxu0 %v9203_v58  ;;  %6099 = vmatprep.subr.bf16.mxu1 %v9208_v8  ;;  %v5761_v58 = vrot.slane %v5759_v3, 7  ;;  %v6202_v8 = vpack.c.bf16 %v6188_v50, %v6188_v50  ;;  %v9313_v3 = vld [vmem:[#allocation15 + $0xe2c] ss:$16 sps:$4 sm:$0xff]   ;;  %v9308_v50 = vld [vmem:[#allocation15 + $0xe20] ss:$16 sps:$4 sm:$0xff]  }
 0x9a5   :  { %6140 = vmatprep.subr.bf16.mxu0 %v9211_v47  ;;  %v9266_v47 = vld [vmem:[#allocation15 + $0xd00] ss:$16 sps:$4 sm:$0xff]  }
 0x9a7   :  { %6100 = vmatpush1.bf16.msra.mxu1 %v9206_v59  ;;  %v5757_v59 = vunpack.c.l.b16 %v5685_v44  ;;  %v9311_v44 = vld [vmem:[#allocation15 + $0xe28] ss:$16 sps:$4 sm:$0xff]  }
 0x9a8   :  { %6141 = vmatpush1.bf16.msra.mxu0 %v9209_v61  ;;  %6101 = vmatprep.subr.bf16.mxu1 %v9214_v17  ;;  %v6279_v61 = vrot.slane %v6276_v7, 7  ;;  %v9269_v17 = vld [vmem:[#allocation15 + $0xd08] ss:$16 sps:$4 sm:$0xff]   ;;  %v9319_v7 = vld [vmem:[#allocation15 + $0xe0c] ss:$16 sps:$4 sm:$0xff]  }
 0x9a9   :  { %6142 = vmatprep.subr.bf16.mxu0 %v9217_v11  ;;  %v9274_v11 = vld [vmem:[#allocation15 + $0xee4] ss:$16 sps:$4 sm:$0xff]  }
 0x9ab   :  { %6102 = vmatpush1.bf16.msra.mxu1 %v9212_v16  ;;  %v5762_v16 = vsel %vm2767_vm5, %v5761_v58, %v5757_v59  ;;  %v9325_v58 = vld [vmem:[#allocation15 + $0xfec] ss:$16 sps:$4 sm:$0xff]   ;;  %v9328_v59 = vld [vmem:[#allocation15 + $0xfc4] ss:$16 sps:$4 sm:$0xff]  }
 0x9ac   :  { %6143 = vmatpush1.bf16.msra.mxu0 %v9215_v2  ;;  %6103 = vmatprep.subr.bf16.mxu1 %v9220_v23  ;;  %v9277_v2 = vld [vmem:[#allocation15 + $0xeec] ss:$16 sps:$4 sm:$0xff]   ;;  %v6274_v23 = vunpack.c.l.b16 %v6202_v8  ;;  %v9320_v8 = vld [vmem:[#allocation15 + $0xfe0] ss:$16 sps:$4 sm:$0xff]  }
 0x9ad   :  { %6144 = vmatprep.subr.bf16.mxu0 %v9223_v10  ;;  %v9272_v10 = vld [vmem:[#allocation15 + $0xee0] ss:$16 sps:$4 sm:$0xff]  }
 0x9af   :  { %6104 = vmatpush1.bf16.msra.mxu1 %v9218_v21  ;;  %v6280_v21 = vsel %vm2767_vm5, %v6279_v61, %v6274_v23  ;;  %v9331_v61 = vld [vmem:[#allocation15 + $0xfcc] ss:$16 sps:$4 sm:$0xff]   ;;  %v9332_v23 = vld [vmem:[#allocation15 + $0xfa0] ss:$16 sps:$4 sm:$0xff]  }
 0x9b0   :  { %6145 = vmatpush1.bf16.msra.mxu0 %v9221_v22  ;;  %6105 = vmatprep.subr.bf16.mxu1 %v9226_v48  ;;  %v5765_v22 = vpack.c.b16 %v5762_v16, %v5762_v16  ;;  %v9275_v48 = vld [vmem:[#allocation15 + $0xee8] ss:$16 sps:$4 sm:$0xff]   ;;  %v9334_v16 = vld [vmem:[#allocation15 + $0xfa4] ss:$16 sps:$4 sm:$0xff]  }
 0x9b1   :  { %6146 = vmatprep.subr.bf16.mxu0 %v9229_v52  ;;  %v9280_v52 = vld [vmem:[#allocation15 + $0xec4] ss:$16 sps:$4 sm:$0xff]  }
 0x9b3   :  { %6106 = vmatpush2.bf16.msra.mxu1 %v9224_v34 }
 0x9b4   :  { %6147 = vmatpush2.bf16.msra.mxu0 %v9227_v45  ;;  %6107 = vmatprep.subr.bf16.mxu1 %v9232_v54  ;;  %v6282_v45 = vpack.c.b16 %v6280_v21, %v6280_v21  ;;  %v9283_v54 = vld [vmem:[#allocation15 + $0xecc] ss:$16 sps:$4 sm:$0xff]   ;;  %v9340_v21 = vld [vmem:[#allocation15 + $0xf84] ss:$16 sps:$4 sm:$0xff]  }
 0x9b5   :  { %6148 = vmatprep.subr.bf16.mxu0 %v9235_v31 }
 0x9b7   :  { %6108 = vmatpush2.bf16.msra.mxu1 %v9230_v55 }
 0x9b8   :  { %6149 = vmatpush2.bf16.msra.mxu0 %v9233_v33  ;;  %6109 = vmatprep.subr.bf16.mxu1 %v9238_v35  ;;  %v9278_v33 = vld [vmem:[#allocation15 + $0xec0] ss:$16 sps:$4 sm:$0xff]  }
 0x9b9   :  { %6150 = vmatprep.subr.bf16.mxu0 %v9241_v26 }
 0x9bb   :  { %6110 = vmatpush2.bf16.msra.mxu1 %v9236_v12  ;;  %v9281_v12 = vld [vmem:[#allocation15 + $0xec8] ss:$16 sps:$4 sm:$0xff]  }
 0x9bc   :  { %6151 = vmatpush2.bf16.msra.mxu0 %v9239_v13  ;;  %6111 = vmatprep.subr.bf16.mxu1 %v9244_v56  ;;  %v9286_v13 = vld [vmem:[#allocation15 + $0xea4] ss:$16 sps:$4 sm:$0xff]  }
 0x9bd   :  { %6152 = vmatprep.subr.bf16.mxu0 %v9247_v57 }
 0x9bf   :  { %6112 = vmatpush2.bf16.msra.mxu1 %v9242_v19 }
 0x9c0   :  { %6153 = vmatpush2.bf16.msra.mxu0 %v9245_v20  ;;  %6113 = vmatprep.subr.bf16.mxu1 %v9250_v36 }
 0x9c1   :  { %6154 = vmatprep.subr.bf16.mxu0 %v9253_v6  ;;  %v9287_v6 = vld [vmem:[#allocation15 + $0xea8] ss:$16 sps:$4 sm:$0xff]  }
 0x9c3   :  { %6114 = vmatpush2.bf16.msra.mxu1 %v9248_v42  ;;  %v9292_v42 = vld [vmem:[#allocation15 + $0xe84] ss:$16 sps:$4 sm:$0xff]  }
 0x9c4   :  { %6155 = vmatpush2.bf16.msra.mxu0 %v9251_v4  ;;  %6115 = vmatprep.subr.bf16.mxu1 %v9256_v9  ;;  %v9290_v4 = vld [vmem:[#allocation15 + $0xe80] ss:$16 sps:$4 sm:$0xff]   ;;  %v9293_v9 = vld [vmem:[#allocation15 + $0xe88] ss:$16 sps:$4 sm:$0xff]  }
 0x9c5   :  { %6156 = vmatprep.subr.bf16.mxu0 %v9259_v40  ;;  %v9296_v40 = vld [vmem:[#allocation15 + $0xe60] ss:$16 sps:$4 sm:$0xff]  }
 0x9c7   :  { %6116 = vmatpush2.bf16.msra.mxu1 %v9254_v43  ;;  %v9304_v43 = vld [vmem:[#allocation15 + $0xe44] ss:$16 sps:$4 sm:$0xff]  }
 0x9c8   :  { %6157 = vmatpush2.bf16.msra.mxu0 %v9257_v37  ;;  %6117 = vmatprep.subr.bf16.mxu1 %v9262_v49  ;;  %v9302_v37 = vld [vmem:[#allocation15 + $0xe40] ss:$16 sps:$4 sm:$0xff]   ;;  %v9305_v49 = vld [vmem:[#allocation15 + $0xe48] ss:$16 sps:$4 sm:$0xff]  }
 0x9c9   :  { %6158 = vmatprep.subr.bf16.mxu0 %v9265_v0  ;;  %v9310_v0 = vld [vmem:[#allocation15 + $0xe24] ss:$16 sps:$4 sm:$0xff]  }
 0x9cb   :  { %6118 = vmatpush2.bf16.msra.mxu1 %v9260_v5  ;;  %v9316_v5 = vld [vmem:[#allocation15 + $0xe04] ss:$16 sps:$4 sm:$0xff]  }
 0x9cc   :  { %6159 = vmatpush2.bf16.msra.mxu0 %v9263_v14  ;;  %6119 = vmatprep.subr.bf16.mxu1 %v9268_v46  ;;  %v9314_v14 = vld [vmem:[#allocation15 + $0xe00] ss:$16 sps:$4 sm:$0xff]   ;;  %v9317_v46 = vld [vmem:[#allocation15 + $0xe08] ss:$16 sps:$4 sm:$0xff]  }
 0x9cd   :  { %6160 = vmatprep.subr.bf16.mxu0 %v9271_v62  ;;  %v9322_v62 = vld [vmem:[#allocation15 + $0xfe4] ss:$16 sps:$4 sm:$0xff]  }
 0x9cf   :  { %6120 = vmatpush2.bf16.msra.mxu1 %v9266_v47  ;;  %v9323_v47 = vld [vmem:[#allocation15 + $0xfe8] ss:$16 sps:$4 sm:$0xff]  }
 0x9d0   :  { %6161 = vmatpush2.bf16.msra.mxu0 %v9269_v17  ;;  %6605 = vmatprep.subr.bf16.mxu1 %v9274_v11  ;;  %v9326_v17 = vld [vmem:[#allocation15 + $0xfc0] ss:$16 sps:$4 sm:$0xff]   ;;  %v9329_v11 = vld [vmem:[#allocation15 + $0xfc8] ss:$16 sps:$4 sm:$0xff]  }
 0x9d1   :  { %6646 = vmatprep.subr.bf16.mxu0 %v9277_v2  ;;  %v9337_v2 = vld [vmem:[#allocation15 + $0xfac] ss:$16 sps:$4 sm:$0xff]  }
 0x9d2   :  { %v4575_v34 = vpop.f32.mrf.mxu1  ;;  %6122 = vmatmul.mubr.bf16.vlgmr.msra.gmra.mxu1 %v5765_v22 }
 0x9d3   :  { %v10470_v31 = vadd.f32 %v4575_v34, %v10444_v41  ;;  %v4616_v55 = vpop.f32.mrf.mxu0  ;;  %6163 = vmatmul.mubr.bf16.vlgmr.msra.gmra.mxu0 %v5765_v22  ;;  %6606 = vmatpush1.bf16.msra.mxu1 %v9272_v10  ;;  %v9289_v41 = vld [vmem:[#allocation15 + $0xeac] ss:$16 sps:$4 sm:$0xff]   ;;  %v9335_v10 = vld [vmem:[#allocation15 + $0xfa8] ss:$16 sps:$4 sm:$0xff]   ;;  %v9346_v34 = vld [vmem:[#allocation15 + $0xf64] ss:$16 sps:$4 sm:$0xff]  }
 0x9d4   :  { %v10473_v35 = vadd.f32 %v4616_v55, %v10447_v39  ;;  %6637 = vmatprep.mubr.bf16.mxu1 %v6282_v45  ;;  %6647 = vmatpush1.bf16.msra.mxu0 %v9275_v48  ;;  %v4577_v26 = vpop.f32.mrf.mxu1  ;;  %v9284_v39 = vld [vmem:[#allocation15 + $0xea0] ss:$16 sps:$4 sm:$0xff]   ;;  %v9343_v22 = vld [vmem:[#allocation15 + $0xf8c] ss:$16 sps:$4 sm:$0xff]  }
 0x9d5   :  { %6678 = vmatprep.mubr.bf16.mxu0 %v6282_v45  ;;  %v10476_v56 = vadd.f32 %v4577_v26, %v10450_v51  ;;  %v4618_v57 = vpop.f32.mrf.mxu0  ;;  %6607 = vmatprep.subr.bf16.mxu1 %v9280_v52  ;;  %v9295_v51 = vld [vmem:[#allocation15 + $0xe8c] ss:$16 sps:$4 sm:$0xff]   ;;  %v9338_v48 = vld [vmem:[#allocation15 + $0xf80] ss:$16 sps:$4 sm:$0xff]   ;;  %v9341_v52 = vld [vmem:[#allocation15 + $0xf88] ss:$16 sps:$4 sm:$0xff]   ;;  %v6192_v45 = vrot.slane %v10455_v15, %v9996_v28 }
 0x9d6   :  { %v10479_v19 = vadd.f32 %v4618_v57, %v10453_v18  ;;  %v4579_v20 = vpop.f32.mrf.mxu1  ;;  %6648 = vmatprep.subr.bf16.mxu0 %v9283_v54  ;;  %v9298_v18 = vld [vmem:[#allocation15 + $0xe64] ss:$16 sps:$4 sm:$0xff]   ;;  %v9349_v54 = vld [vmem:[#allocation15 + $0xf6c] ss:$16 sps:$4 sm:$0xff]   ;;  %v9344_v55 = vld [vmem:[#allocation15 + $0xf60] ss:$16 sps:$4 sm:$0xff]   ;;  %v6184_v57 = vrot.slane %v10461_v53, %v9996_v28 }
 0x9d7   :  { %v4620_v36 = vpop.f32.mrf.mxu0  ;;  %6608 = vmatpush1.bf16.msra.mxu1 %v9278_v33  ;;  %v9347_v33 = vld [vmem:[#allocation15 + $0xf68] ss:$16 sps:$4 sm:$0xff]   ;;  %v9352_v26 = vld [vmem:[#allocation15 + $0xf44] ss:$16 sps:$4 sm:$0xff]   ;;  %v9362_v53 = vld [vmem:[#allocation15 + $0xf00] ss:$16 sps:$4 sm:$0xff]  }
 0x9d8   :  { %6649 = vmatpush1.bf16.msra.mxu0 %v9281_v12  ;;  %v4580_v38 = vpop.f32.mrf.mxu1  ;;  %6609 = vmatprep.subr.bf16.mxu1 %v9286_v13  ;;  %v6203_v12 = vpack.c.bf16 %v6192_v45, %v6192_v45  ;;  %v9355_v13 = vld [vmem:[#allocation15 + $0xf4c] ss:$16 sps:$4 sm:$0xff]   ;;  %v9353_v20 = vld [vmem:[#allocation15 + $0xf48] ss:$16 sps:$4 sm:$0xff]   ;;  %v9358_v15 = vld [vmem:[#allocation15 + $0xf24] ss:$16 sps:$4 sm:$0xff]  }
 0x9d9   :  { %v4621_v60 = vpop.f32.mrf.mxu0  ;;  %6650 = vmatprep.subr.bf16.mxu0 %v9289_v41  ;;  %v9350_v41 = vld [vmem:[#allocation15 + $0xf40] ss:$16 sps:$4 sm:$0xff]   ;;  %v9361_v36 = vld [vmem:[#allocation15 + $0xf2c] ss:$16 sps:$4 sm:$0xff]   ;;  %v6201_v38 = vpack.c.bf16 %v6184_v57, %v6184_v57 }
 0x9da   :  { %v9364_v60 = vld [vmem:[#allocation15 + $0xf04] ss:$16 sps:$4 sm:$0xff]   ;;  %v9406_v57 = vld [vmem:[#allocation18 + $0x14] ss:$8 sps:$4 sm:$0xff]  }
 0x9db   :  { %6610 = vmatpush1.bf16.msra.mxu1 %v9284_v39  ;;  %v6275_v39 = vunpack.c.l.b16 %v6203_v12  ;;  %v9395_v45 = vld [vmem:[#allocation18 + $0x130] ss:$8 sps:$4 sm:$0xff]   ;;  %v9398_v12 = vld [vmem:[#allocation18 + $0x20] ss:$8 sps:$4 sm:$0xff]  }
 0x9dc   :  { %6651 = vmatpush1.bf16.msra.mxu0 %v9287_v6  ;;  %6611 = vmatprep.subr.bf16.mxu1 %v9292_v42  ;;  %v9356_v6 = vld [vmem:[#allocation15 + $0xf20] ss:$16 sps:$4 sm:$0xff]   ;;  %v9359_v42 = vld [vmem:[#allocation15 + $0xf28] ss:$16 sps:$4 sm:$0xff]  }
 0x9dd   :  { %6652 = vmatprep.subr.bf16.mxu0 %v9295_v51  ;;  %v9367_v51 = vld [vmem:[#allocation15 + $0xf0c] ss:$16 sps:$4 sm:$0xff]  }
 0x9df   :  { %6612 = vmatpush1.bf16.msra.mxu1 %v9290_v4  ;;  %v6277_v4 = vrot.slane %v6275_v39, 7  ;;  %v9413_v39 = vld [vmem:[#allocation18 + $0x100] ss:$8 sps:$4 sm:$0xff]  }
 0x9e0   :  { %6653 = vmatpush1.bf16.msra.mxu0 %v9293_v9  ;;  %6613 = vmatprep.subr.bf16.mxu1 %v9298_v18  ;;  %v6273_v9 = vunpack.c.l.b16 %v6201_v38  ;;  %v9365_v18 = vld [vmem:[#allocation15 + $0xf08] ss:$16 sps:$4 sm:$0xff]   ;;  %v9410_v38 = vld [vmem:[#allocation18] ss:$8 sps:$4 sm:$0xff]  }
 0x9e1   :  { %6654 = vmatprep.subr.bf16.mxu0 %v9301_v24 }
 0x9e2   :  { %v6278_v24 = vsel %vm2767_vm5, %v6277_v4, %v6273_v9  ;;  %v9427_v4 = vld [vmem:[#allocation18 + $0x1e4] ss:$8 sps:$4 sm:$0xff]   ;;  %v9425_v9 = vld [vmem:[#allocation18 + $0x1e0] ss:$8 sps:$4 sm:$0xff]  }
 0x9e3   :  { %6614 = vmatpush1.bf16.msra.mxu1 %v9296_v40  ;;  %v6281_v40 = vpack.c.b16 %v6278_v24, %v6278_v24  ;;  %v9433_v24 = vld [vmem:[#allocation18 + $0x1d4] ss:$8 sps:$4 sm:$0xff]  }
 0x9e4   :  { %6655 = vmatpush1.bf16.msra.mxu0 %v9299_v32  ;;  %6615 = vmatprep.subr.bf16.mxu1 %v9304_v43 }
 0x9e5   :  { %6656 = vmatprep.subr.bf16.mxu0 %v9307_v63 }
 0x9e7   :  { %6616 = vmatpush1.bf16.msra.mxu1 %v9302_v37 }
 0x9e8   :  { %6657 = vmatpush1.bf16.msra.mxu0 %v9305_v49  ;;  %6617 = vmatprep.subr.bf16.mxu1 %v9310_v0 }
 0x9e9   :  { %6658 = vmatprep.subr.bf16.mxu0 %v9313_v3 }
 0x9eb   :  { %6618 = vmatpush1.bf16.msra.mxu1 %v9308_v50 }
 0x9ec   :  { %6659 = vmatpush1.bf16.msra.mxu0 %v9311_v44  ;;  %6619 = vmatprep.subr.bf16.mxu1 %v9316_v5  ;;  %v8267_v5 = vld.sshfl [vmem:[#allocation19] sm:$0x33 pattern:$0x76325410] }
 0x9ed   :  { %6660 = vmatprep.subr.bf16.mxu0 %v9319_v7 }
 0x9ef   :  { %6620 = vmatpush1.bf16.msra.mxu1 %v9314_v14  ;;  %v6806_v14 = vsel %vm308_vm0, %v8267_v5, 0 }
 0x9f0   :  { %6661 = vmatpush1.bf16.msra.mxu0 %v9317_v46  ;;  %6621 = vmatprep.subr.bf16.mxu1 %v9322_v62 }
 0x9f1   :  { %6662 = vmatprep.subr.bf16.mxu0 %v9325_v58  ;;  %v9370_v58 = vld [vmem:[#allocation18 + $0x74] ss:$8 sps:$4 sm:$0xff]  }
 0x9f3   :  { %6622 = vmatpush2.bf16.msra.mxu1 %v9320_v8  ;;  %v9371_v8 = vld [vmem:[#allocation18 + $0x170] ss:$8 sps:$4 sm:$0xff]  }
 0x9f4   :  { %6663 = vmatpush2.bf16.msra.mxu0 %v9323_v47  ;;  %6623 = vmatprep.subr.bf16.mxu1 %v9328_v59  ;;  %v9373_v47 = vld [vmem:[#allocation18 + $0x174] ss:$8 sps:$4 sm:$0xff]   ;;  %v9379_v59 = vld [vmem:[#allocation18 + $0x164] ss:$8 sps:$4 sm:$0xff]  }
 0x9f5   :  { %6664 = vmatprep.subr.bf16.mxu0 %v9331_v61  ;;  %v9377_v61 = vld [vmem:[#allocation18 + $0x160] ss:$8 sps:$4 sm:$0xff]  }
 0x9f7   :  { %6624 = vmatpush2.bf16.msra.mxu1 %v9326_v17  ;;  %v9374_v17 = vld [vmem:[#allocation18 + $0x60] ss:$8 sps:$4 sm:$0xff]  }
 0x9f8   :  { %6665 = vmatpush2.bf16.msra.mxu0 %v9329_v11  ;;  %6625 = vmatprep.subr.bf16.mxu1 %v9334_v16  ;;  %v9385_v11 = vld [vmem:[#allocation18 + $0x154] ss:$8 sps:$4 sm:$0xff]  }
 0x9f9   :  { %6666 = vmatprep.subr.bf16.mxu0 %v9337_v2  ;;  %v9382_v16 = vld [vmem:[#allocation18 + $0x54] ss:$8 sps:$4 sm:$0xff]   ;;  %v9383_v2 = vld [vmem:[#allocation18 + $0x150] ss:$8 sps:$4 sm:$0xff]  }
 0x9fb   :  { %6626 = vmatpush2.bf16.msra.mxu1 %v9332_v23  ;;  %v9380_v23 = vld [vmem:[#allocation18 + $0x50] ss:$8 sps:$4 sm:$0xff]  }
 0x9fc   :  { %6667 = vmatpush2.bf16.msra.mxu0 %v9335_v10  ;;  %6627 = vmatprep.subr.bf16.mxu1 %v9340_v21  ;;  %v9391_v10 = vld [vmem:[#allocation18 + $0x144] ss:$8 sps:$4 sm:$0xff]  }
 0x9fd   :  { %6668 = vmatprep.subr.bf16.mxu0 %v9343_v22  ;;  %v9388_v21 = vld [vmem:[#allocation18 + $0x44] ss:$8 sps:$4 sm:$0xff]   ;;  %v9389_v22 = vld [vmem:[#allocation18 + $0x140] ss:$8 sps:$4 sm:$0xff]  }
 0x9ff   :  { %6628 = vmatpush2.bf16.msra.mxu1 %v9338_v48  ;;  %v9386_v48 = vld [vmem:[#allocation18 + $0x40] ss:$8 sps:$4 sm:$0xff]  }
 0xa00   :  { %6669 = vmatpush2.bf16.msra.mxu0 %v9341_v52  ;;  %6629 = vmatprep.subr.bf16.mxu1 %v9346_v34  ;;  %v9397_v52 = vld [vmem:[#allocation18 + $0x134] ss:$8 sps:$4 sm:$0xff]  }
 0xa01   :  { %6670 = vmatprep.subr.bf16.mxu0 %v9349_v54  ;;  %v9394_v34 = vld [vmem:[#allocation18 + $0x34] ss:$8 sps:$4 sm:$0xff]   ;;  %v9392_v54 = vld [vmem:[#allocation18 + $0x30] ss:$8 sps:$4 sm:$0xff]  }
 0xa03   :  { %6630 = vmatpush2.bf16.msra.mxu1 %v9344_v55  ;;  %v9403_v55 = vld [vmem:[#allocation18 + $0x124] ss:$8 sps:$4 sm:$0xff]  }
 0xa04   :  { %6671 = vmatpush2.bf16.msra.mxu0 %v9347_v33  ;;  %6631 = vmatprep.subr.bf16.mxu1 %v9352_v26  ;;  %v9400_v33 = vld [vmem:[#allocation18 + $0x24] ss:$8 sps:$4 sm:$0xff]   ;;  %v9401_v26 = vld [vmem:[#allocation18 + $0x120] ss:$8 sps:$4 sm:$0xff]  }
 0xa05   :  { %6672 = vmatprep.subr.bf16.mxu0 %v9355_v13  ;;  %v9409_v13 = vld [vmem:[#allocation18 + $0x114] ss:$8 sps:$4 sm:$0xff]  }
 0xa07   :  { %6632 = vmatpush2.bf16.msra.mxu1 %v9350_v41  ;;  %v9407_v41 = vld [vmem:[#allocation18 + $0x110] ss:$8 sps:$4 sm:$0xff]  }
 0xa08   :  { %6673 = vmatpush2.bf16.msra.mxu0 %v9353_v20  ;;  %6633 = vmatprep.subr.bf16.mxu1 %v9358_v15  ;;  %v9404_v20 = vld [vmem:[#allocation18 + $0x10] ss:$8 sps:$4 sm:$0xff]   ;;  %v9415_v15 = vld [vmem:[#allocation18 + $0x104] ss:$8 sps:$4 sm:$0xff]  }
 0xa09   :  { %6674 = vmatprep.subr.bf16.mxu0 %v9361_v36  ;;  %v9412_v36 = vld [vmem:[#allocation18 + $0x4] ss:$8 sps:$4 sm:$0xff]  }
 0xa0b   :  { %6634 = vmatpush2.bf16.msra.mxu1 %v9356_v6  ;;  %v9421_v6 = vld [vmem:[#allocation18 + $0x1f4] ss:$8 sps:$4 sm:$0xff]  }
 0xa0c   :  { %6675 = vmatpush2.bf16.msra.mxu0 %v9359_v42  ;;  %6635 = vmatprep.subr.bf16.mxu1 %v9364_v60  ;;  %v9418_v42 = vld [vmem:[#allocation18 + $0xf4] ss:$8 sps:$4 sm:$0xff]   ;;  %v9419_v60 = vld [vmem:[#allocation18 + $0x1f0] ss:$8 sps:$4 sm:$0xff]  }
 0xa0d   :  { %6676 = vmatprep.subr.bf16.mxu0 %v9367_v51  ;;  %v9416_v51 = vld [vmem:[#allocation18 + $0xf0] ss:$8 sps:$4 sm:$0xff]  }
 0xa0f   :  { %6636 = vmatpush2.bf16.msra.mxu1 %v9362_v53  ;;  %v9424_v53 = vld [vmem:[#allocation18 + $0xe4] ss:$8 sps:$4 sm:$0xff]  }
 0xa10   :  { %6677 = vmatpush2.bf16.msra.mxu0 %v9365_v18  ;;  %v9422_v18 = vld [vmem:[#allocation18 + $0xe0] ss:$8 sps:$4 sm:$0xff]  }
 0xa11   :  { %7213 = vmatprep.subr.bf16.mxu0 %v9373_v47 }
 0xa12   :  { %v5091_v32 = vpop.f32.mrf.mxu1  ;;  %6638 = vmatmul.mubr.bf16.vlgmr.msra.gmra.mxu1 %v6281_v40 }
 0xa13   :  { %v10487_v43 = vadd.f32 %v5091_v32, %v10470_v31  ;;  %v5132_v63 = vpop.f32.mrf.mxu0  ;;  %6679 = vmatmul.mubr.bf16.vlgmr.msra.gmra.mxu0 %v6281_v40  ;;  %6843 = vmatprep.mubr.bf16.mxu1 %v9837_v1  ;;  %v6800_v31 = vcombine.high %v8267_v5, %v8267_v5  ;;  %v6789_v1 = vld [vmem:[#allocation7] sm:$0x3]  ;;  %v9430_v40 = vld [vmem:[#allocation18 + $0xd4] ss:$8 sps:$4 sm:$0xff]   ;;  %v9431_v32 = vld [vmem:[#allocation18 + $0x1d0] ss:$8 sps:$4 sm:$0xff]  }
 0xa14   :  { %v10491_v37 = vadd.f32 %v5132_v63, %v10473_v35  ;;  %v5093_v49 = vpop.f32.mrf.mxu1  ;;  %v9368_v35 = vld [vmem:[#allocation18 + $0x70] ss:$8 sps:$4 sm:$0xff]   ;;  %7214 = vmatpush1.bf16.msra.mxu0 %v9371_v8  ;;  %v9434_v5 = vld [vmem:[#allocation18 + $0xc0] ss:$8 sps:$4 sm:$0xff]  }
 0xa15   :  { %v10494_v0 = vadd.f32 %v5093_v49, %v10476_v56  ;;  %v5134_v3 = vpop.f32.mrf.mxu0  ;;  %8268 = vmatprep.subr.msk.bf16.mxu1 %vm308_vm0, %v6800_v31  ;;  %v6790_v56 = vpack.c.bf16 %v6789_v1, %v6789_v1  ;;  %7215 = vmatprep.subr.bf16.mxu0 %v9379_v59  ;;  %v9428_v63 = vld [vmem:[#allocation18 + $0xd0] ss:$8 sps:$4 sm:$0xff]   ;;  %v9439_v49 = vld [vmem:[#allocation18 + $0x1c4] ss:$8 sps:$4 sm:$0xff]   ;;  %v9442_v31 = vld [vmem:[#allocation18 + $0xb4] ss:$8 sps:$4 sm:$0xff]  }
 0xa16   :  { %v10497_v50 = vadd.f32 %v5134_v3, %v10479_v19  ;;  %v5095_v44 = vpop.f32.mrf.mxu1  ;;  %6826 = vmatpush1.bf16.msra.mxu1 %v6806_v14  ;;  %v9376_v19 = vld [vmem:[#allocation18 + $0x64] ss:$8 sps:$4 sm:$0xff]   ;;  %v9443_v14 = vld [vmem:[#allocation18 + $0x1b0] ss:$8 sps:$4 sm:$0xff]  }
 0xa17   :  { %v5136_v7 = vpop.f32.mrf.mxu0  ;;  %7172 = vmatprep.subr.bf16.mxu1 %v9370_v58  ;;  %v9436_v3 = vld [vmem:[#allocation18 + $0xc4] ss:$8 sps:$4 sm:$0xff]   ;;  %v9437_v44 = vld [vmem:[#allocation18 + $0x1c0] ss:$8 sps:$4 sm:$0xff]  }
 0xa18   :  { %v5096_v46 = vpop.f32.mrf.mxu1  ;;  %7216 = vmatpush1.bf16.msra.mxu0 %v9377_v61  ;;  %v9445_v7 = vld [vmem:[#allocation18 + $0x1b4] ss:$8 sps:$4 sm:$0xff]  }
 0xa19   :  { %v5137_v62 = vpop.f32.mrf.mxu0  ;;  %7217 = vmatprep.subr.bf16.mxu0 %v9385_v11  ;;  %v9440_v46 = vld [vmem:[#allocation18 + $0xb0] ss:$8 sps:$4 sm:$0xff]  }
 0xa1a   :  { %8269 = vmatmul.mubr.msk.bf16.vlgmr.msra.gmra.mxu1 %vm6801_vm6, %v6790_v56 }
 0xa1b   :  { %7173 = vmatpush1.bf16.msra.mxu1 %v9368_v35 }
 0xa1c   :  { %7174 = vmatprep.subr.bf16.mxu1 %v9376_v19  ;;  %7218 = vmatpush1.bf16.msra.mxu0 %v9383_v2  ;;  %v9448_v2 = vld [vmem:[#allocation18 + $0xa4] ss:$8 sps:$4 sm:$0xff]  }
 0xa1d   :  { %7219 = vmatprep.subr.bf16.mxu0 %v9391_v10  ;;  %v9451_v10 = vld [vmem:[#allocation18 + $0x1a4] ss:$8 sps:$4 sm:$0xff]  }
 0xa1f   :  { %7175 = vmatpush1.bf16.msra.mxu1 %v9374_v17 }
 0xa20   :  { %7176 = vmatprep.subr.bf16.mxu1 %v9382_v16  ;;  %7220 = vmatpush1.bf16.msra.mxu0 %v9389_v22  ;;  %v9446_v16 = vld [vmem:[#allocation18 + $0xa0] ss:$8 sps:$4 sm:$0xff]   ;;  %v9460_v22 = vld [vmem:[#allocation18 + $0x84] ss:$8 sps:$4 sm:$0xff]  }
 0xa21   :  { %7221 = vmatprep.subr.bf16.mxu0 %v9397_v52  ;;  %v9461_v52 = vld [vmem:[#allocation18 + $0x180] ss:$8 sps:$4 sm:$0xff]  }
 0xa23   :  { %7177 = vmatpush1.bf16.msra.mxu1 %v9380_v23  ;;  %v9449_v23 = vld [vmem:[#allocation18 + $0x1a0] ss:$8 sps:$4 sm:$0xff]  }
 0xa24   :  { %7178 = vmatprep.subr.bf16.mxu1 %v9388_v21  ;;  %7222 = vmatpush1.bf16.msra.mxu0 %v9395_v45  ;;  %v9454_v21 = vld [vmem:[#allocation18 + $0x94] ss:$8 sps:$4 sm:$0xff]  }
 0xa25   :  { %7223 = vmatprep.subr.bf16.mxu0 %v9403_v55 }
 0xa27   :  { %7179 = vmatpush1.bf16.msra.mxu1 %v9386_v48  ;;  %v9458_v48 = vld [vmem:[#allocation18 + $0x80] ss:$8 sps:$4 sm:$0xff]  }
 0xa28   :  { %7180 = vmatprep.subr.bf16.mxu1 %v9394_v34  ;;  %7224 = vmatpush1.bf16.msra.mxu0 %v9401_v26  ;;  %v9466_v34 = vld [vmem:[#allocation22 + $0x74] ss:$8 sps:$4 sm:$0xff]  }
 0xa29   :  { %7225 = vmatprep.subr.bf16.mxu0 %v9409_v13 }
 0xa2b   :  { %7181 = vmatpush1.bf16.msra.mxu1 %v9392_v54 }
 0xa2c   :  { %7182 = vmatprep.subr.bf16.mxu1 %v9400_v33  ;;  %7226 = vmatpush1.bf16.msra.mxu0 %v9407_v41 }
 0xa2d   :  { %7227 = vmatprep.subr.bf16.mxu0 %v9415_v15  ;;  %v6691_v15 = vld [vmem:[#allocation16] sm:$0xf] }
 0xa2f   :  { %7183 = vmatpush1.bf16.msra.mxu1 %v9398_v12 }
 0xa30   :  { %7184 = vmatprep.subr.bf16.mxu1 %v9406_v57  ;;  %7228 = vmatpush1.bf16.msra.mxu0 %v9413_v39 }
 0xa31   :  { %7229 = vmatprep.subr.bf16.mxu0 %v9421_v6 }
 0xa33   :  { %7185 = vmatpush1.bf16.msra.mxu1 %v9404_v20 }
 0xa34   :  { %7186 = vmatprep.subr.bf16.mxu1 %v9412_v36  ;;  %7230 = vmatpush2.bf16.msra.mxu0 %v9419_v60  ;;  %v6696_v36 = vrot.slane %v6691_v15, %v9996_v28 }
 0xa35   :  { %7231 = vmatprep.subr.bf16.mxu0 %v9427_v4 }
 0xa37   :  { %7187 = vmatpush1.bf16.msra.mxu1 %v9410_v38  ;;  %v6704_v38 = vrot.slane %v6691_v15, %v239_v27 }
 0xa38   :  { %7188 = vmatprep.subr.bf16.mxu1 %v9418_v42  ;;  %7232 = vmatpush2.bf16.msra.mxu0 %v9425_v9 }
 0xa39   :  { %7233 = vmatprep.subr.bf16.mxu0 %v9433_v24 }
 0xa3b   :  { %7189 = vmatpush2.bf16.msra.mxu1 %v9416_v51  ;;  %v6700_v51 = vrot.slane %v6691_v15, %v10000_v30 }
 0xa3c   :  { %7190 = vmatprep.subr.bf16.mxu1 %v9424_v53  ;;  %7234 = vmatpush2.bf16.msra.mxu0 %v9431_v32 }
 0xa3d   :  { %7235 = vmatprep.subr.bf16.mxu0 %v9439_v49 }
 0xa3f   :  { %7191 = vmatpush2.bf16.msra.mxu1 %v9422_v18  ;;  %v6708_v18 = vrot.slane %v6691_v15, %v243_v29  ;;  %v9469_v29 = vld [vmem:[#allocation22 + $0x64] ss:$8 sps:$4 sm:$0xff]   ;;  %v9508_v15 = vld [vmem:[#allocation22 + $0x94] ss:$8 sps:$4 sm:$0xff]  }
 0xa40   :  { %7192 = vmatprep.subr.bf16.mxu1 %v9430_v40  ;;  %7236 = vmatpush2.bf16.msra.mxu0 %v9437_v44 }
 0xa41   :  { %7237 = vmatprep.subr.bf16.mxu0 %v9445_v7 }
 0xa43   :  { %7193 = vmatpush2.bf16.msra.mxu1 %v9428_v63 }
 0xa44   :  { %7194 = vmatprep.subr.bf16.mxu1 %v9436_v3  ;;  %7238 = vmatpush2.bf16.msra.mxu0 %v9443_v14 }
 0xa45   :  { %7239 = vmatprep.subr.bf16.mxu0 %v9451_v10  ;;  %v9478_v10 = vld [vmem:[#allocation22 + $0x34] ss:$8 sps:$4 sm:$0xff]  }
 0xa47   :  { %7195 = vmatpush2.bf16.msra.mxu1 %v9434_v5 }
 0xa48   :  { %7196 = vmatprep.subr.bf16.mxu1 %v9442_v31  ;;  %7240 = vmatpush2.bf16.msra.mxu0 %v9449_v23  ;;  %v9473_v23 = vld [vmem:[#allocation22 + $0x40] ss:$8 sps:$4 sm:$0xff]  }
 0xa4b   :  { %7197 = vmatpush2.bf16.msra.mxu1 %v9440_v46 }
 0xa4c   :  { %7198 = vmatprep.subr.bf16.mxu1 %v9448_v2  ;;  %v9475_v2 = vld [vmem:[#allocation22 + $0x44] ss:$8 sps:$4 sm:$0xff]  }
 0xa4f   :  { %7199 = vmatpush2.bf16.msra.mxu1 %v9446_v16  ;;  %v9470_v16 = vld [vmem:[#allocation22 + $0x50] ss:$8 sps:$4 sm:$0xff]  }
 0xa50   :  { %7200 = vmatprep.subr.bf16.mxu1 %v9454_v21  ;;  %v9476_v21 = vld [vmem:[#allocation22 + $0x30] ss:$8 sps:$4 sm:$0xff]  }
 0xa52   :  { %v5607_v62 = vpop.f32.mrf.mxu1 }
 0xa53   :  { %v5655_v1 = vadd.f32 %v5607_v62, %v10487_v43  ;;  %v5648_v35 = vpop.f32.mrf.mxu0  ;;  %v9452_v43 = vld [vmem:[#allocation18 + $0x90] ss:$8 sps:$4 sm:$0xff]  }
 0xa54   :  { %v5657_v56 = vadd.f32 %v5648_v35, %v10491_v37  ;;  %v5609_v58 = vpop.f32.mrf.mxu1  ;;  %v9457_v37 = vld [vmem:[#allocation18 + $0x194] ss:$8 sps:$4 sm:$0xff]   ;;  %7201 = vmatpush2.bf16.msra.mxu1 %v9452_v43 }
 0xa55   :  { %v5656_v8 = vadd.f32 %v5609_v58, %v10494_v0  ;;  %v5650_v47 = vpop.f32.mrf.mxu0  ;;  %v9455_v0 = vld [vmem:[#allocation18 + $0x190] ss:$8 sps:$4 sm:$0xff]   ;;  %7241 = vmatprep.subr.bf16.mxu0 %v9457_v37  ;;  %7202 = vmatprep.subr.bf16.mxu1 %v9460_v22 }
 0xa56   :  { %v5658_v19 = vadd.f32 %v5650_v47, %v10497_v50  ;;  %v5611_v59 = vpop.f32.mrf.mxu1  ;;  %v9463_v50 = vld [vmem:[#allocation18 + $0x184] ss:$8 sps:$4 sm:$0xff]   ;;  %7242 = vmatpush2.bf16.msra.mxu0 %v9455_v0  ;;  %v9482_v22 = vld [vmem:[#allocation22 + $0x10] ss:$8 sps:$4 sm:$0xff]  }
 0xa57   :  { %v5652_v61 = vpop.f32.mrf.mxu0  ;;  %7243 = vmatprep.subr.bf16.mxu0 %v9463_v50  ;;  %v9467_v59 = vld [vmem:[#allocation22 + $0x60] ss:$8 sps:$4 sm:$0xff]   ;;  %v9481_v43 = vld [vmem:[#allocation22 + $0x24] ss:$8 sps:$4 sm:$0xff]   ;;  %v9484_v0 = vld [vmem:[#allocation22 + $0x14] ss:$8 sps:$4 sm:$0xff]  }
 0xa58   :  { %v5612_v17 = vpop.f32.mrf.mxu1  ;;  %7203 = vmatpush2.bf16.msra.mxu1 %v9458_v48  ;;  %v9472_v61 = vld [vmem:[#allocation22 + $0x54] ss:$8 sps:$4 sm:$0xff]   ;;  %v9479_v37 = vld [vmem:[#allocation22 + $0x20] ss:$8 sps:$4 sm:$0xff]   ;;  %v9487_v50 = vld [vmem:[#allocation22 + $0x4] ss:$8 sps:$4 sm:$0xff]  }
 0xa59   :  { %v5653_v11 = vpop.f32.mrf.mxu0  ;;  %7476 = vmatprep.subr.bf16.mxu1 %v9466_v34  ;;  %v9485_v48 = vld [vmem:[#allocation22] ss:$8 sps:$4 sm:$0xff]   ;;  %v9488_v34 = vld [vmem:[#allocation22 + $0xf0] ss:$8 sps:$4 sm:$0xff]  }
 0xa5a   :  { %7244 = vmatpush2.bf16.msra.mxu0 %v9461_v52  ;;  %v9490_v52 = vld [vmem:[#allocation22 + $0xf4] ss:$8 sps:$4 sm:$0xff]  }
 0xa92   :  { %v6123_v45 = vpop.f32.mrf.mxu1 }
 0xa93   :  { %v6171_v54 = vadd.f32 %v6123_v45, %v5655_v1  ;;  %v6164_v55 = vpop.f32.mrf.mxu0  ;;  %v9493_v45 = vld [vmem:[#allocation22 + $0xe4] ss:$8 sps:$4 sm:$0xff]  }
 0xa94   :  { %v6173_v33 = vadd.f32 %v6164_v55, %v5657_v56  ;;  %v6125_v26 = vpop.f32.mrf.mxu1  ;;  %v9464_v56 = vld [vmem:[#allocation22 + $0x70] ss:$8 sps:$4 sm:$0xff]   ;;  %v9496_v55 = vld [vmem:[#allocation22 + $0xd4] ss:$8 sps:$4 sm:$0xff]  }
 0xa95   :  { %v6166_v12 = vpop.f32.mrf.mxu0  ;;  %v6172_v6 = vadd.f32 %v6125_v26, %v5656_v8  ;;  %v9499_v26 = vld [vmem:[#allocation22 + $0xc4] ss:$8 sps:$4 sm:$0xff]  }
 0xa96   :  { %v6127_v13 = vpop.f32.mrf.mxu1  ;;  %v6174_v4 = vadd.f32 %v6166_v12, %v5658_v19  ;;  %v9497_v12 = vld [vmem:[#allocation22 + $0xc0] ss:$8 sps:$4 sm:$0xff]  }
 0xa97   :  { %v6168_v57 = vpop.f32.mrf.mxu0  ;;  %v9502_v13 = vld [vmem:[#allocation22 + $0xb4] ss:$8 sps:$4 sm:$0xff]  }
 0xa98   :  { %v6128_v41 = vpop.f32.mrf.mxu1  ;;  %v9500_v57 = vld [vmem:[#allocation22 + $0xb0] ss:$8 sps:$4 sm:$0xff]  }
 0xa99   :  { %v6169_v20 = vpop.f32.mrf.mxu0  ;;  %v9503_v41 = vld [vmem:[#allocation22 + $0xa0] ss:$8 sps:$4 sm:$0xff]  }
 0xa9a   :  { %v9505_v20 = vld [vmem:[#allocation22 + $0xa4] ss:$8 sps:$4 sm:$0xff]  }
 0xad2   :  { %v6639_v39 = vpop.f32.mrf.mxu1 }
 0xad3   :  { %v6687_v42 = vadd.f32 %v6639_v39, %v6171_v54  ;;  %v6680_v60 = vpop.f32.mrf.mxu0  ;;  %v9491_v54 = vld [vmem:[#allocation22 + $0xe0] ss:$8 sps:$4 sm:$0xff]  }
 0xad4   :  { %v6689_v53 = vadd.f32 %v6680_v60, %v6173_v33  ;;  %v6641_v9 = vpop.f32.mrf.mxu1  ;;  %v9494_v33 = vld [vmem:[#allocation22 + $0xd0] ss:$8 sps:$4 sm:$0xff]   ;;  %v7533_v60 = vld [vmem:[%s10633_s13 + $0x70] sm:$0xff] }
 0xad5   :  { %v6713_v24 = vadd.f32 %v6696_v36, %v6687_v42  ;;  %v6688_v40 = vadd.f32 %v6641_v9, %v6172_v6  ;;  %v6682_v32 = vpop.f32.mrf.mxu0  ;;  %v9506_v36 = vld [vmem:[#allocation22 + $0x90] ss:$8 sps:$4 sm:$0xff]   ;;  %v7549_v6 = vld [vmem:[%s10633_s13 + $0xf0] sm:$0xff] }
 0xad6   :  { %v6715_v63 = vadd.f32 %v6704_v38, %v6689_v53  ;;  %v6690_v49 = vadd.f32 %v6682_v32, %v6174_v4  ;;  %v6643_v3 = vpop.f32.mrf.mxu1  ;;  %v7550_v39 = vld [vmem:[%s10633_s13 + $0xf8] sm:$0xff]  ;;  %v7532_v4 = vld [vmem:[%s10633_s13 + $0x68] sm:$0xff]  ;;  %v7547_v9 = vld [vmem:[%s10633_s13 + $0xe0] sm:$0xff] }
 0xad7   :  { %v6714_v44 = vadd.f32 %v6700_v51, %v6688_v40  ;;  %v6684_v5 = vpop.f32.mrf.mxu0  ;;  %v6717_v27 = vmax.f32 %v6713_v24, 0.0  ;;  %v7534_v38 = vld [vmem:[%s10633_s13 + $0x78] sm:$0xff]  ;;  %8399 = vmatprep.subr.mxu0 %v7550_v39  ;;  %v7548_v51 = vld [vmem:[%s10633_s13 + $0xe8] sm:$0xff]  ;;  %v7545_v32 = vld [vmem:[%s10633_s13 + $0xd0] sm:$0xff] }
 0xad8   :  { %v6716_v7 = vadd.f32 %v6708_v18, %v6690_v49  ;;  %v6644_v31 = vpop.f32.mrf.mxu1  ;;  %v6719_v14 = vmax.f32 %v6715_v63, 0.0  ;;  %v9511_v42 = vld [vmem:[#allocation22 + $0x84] ss:$8 sps:$4 sm:$0xff]   ;;  %v9509_v53 = vld [vmem:[#allocation22 + $0x80] ss:$8 sps:$4 sm:$0xff]   ;;  %v7531_v18 = vld [vmem:[%s10633_s13 + $0x60] sm:$0xff] }
 0xad9   :  { %v6718_v46 = vmax.f32 %v6714_v44, 0.0  ;;  %v6685_v62 = vpop.f32.mrf.mxu0  ;;  %v6721_v58 = vpack.c.bf16 %v6717_v27, %v6717_v27  ;;  %v7546_v24 = vld [vmem:[%s10633_s13 + $0xd8] sm:$0xff]  ;;  %v7529_v63 = vld [vmem:[%s10633_s13 + $0x50] sm:$0xff]  ;;  %v7544_v49 = vld [vmem:[%s10633_s13 + $0xc8] sm:$0xff] }
 0xada   :  { %v6720_v1 = vmax.f32 %v6716_v7, 0.0  ;;  %v6723_v8 = vpack.c.bf16 %v6719_v14, %v6719_v14  ;;  %v10511_v47 = vpop.f32.mrf.mxu1  ;;  %v7530_v40 = vld [vmem:[%s10633_s13 + $0x58] sm:$0xff]  ;;  %v7528_v3 = vld [vmem:[%s10633_s13 + $0x48] sm:$0xff]  ;;  %v7543_v44 = vld [vmem:[%s10633_s13 + $0xc0] sm:$0xff] }
 0xadb   :  { %v6722_v35 = vpack.c.bf16 %v6718_v46, %v6718_v46  ;;  %v7527_v5 = vld [vmem:[%s10633_s13 + $0x40] sm:$0xff]  ;;  %v7542_v27 = vld [vmem:[%s10633_s13 + $0xb8] sm:$0xff]  ;;  %v7541_v31 = vld [vmem:[%s10633_s13 + $0xb0] sm:$0xff] }
 0xadc   :  { %v6724_v25 = vpack.c.bf16 %v6720_v1, %v6720_v1  ;;  %v10513_v19 = vpop.f32.mrf.mxu1  ;;  %v7526_v7 = vld [vmem:[%s10633_s13 + $0x38] sm:$0xff]  ;;  %v7525_v14 = vld [vmem:[%s10633_s13 + $0x30] sm:$0xff]  ;;  %v7540_v46 = vld [vmem:[%s10633_s13 + $0xa8] sm:$0xff] }
 0xadd   :  { %7204 = vmatprep.mubr.bf16.mxu1 %v6722_v35  ;;  %v7524_v62 = vld [vmem:[%s10633_s13 + $0x28] sm:$0xff]  ;;  %v7539_v1 = vld [vmem:[%s10633_s13 + $0xa0] sm:$0xff] }
 0xade   :  { %7245 = vmatprep.mubr.bf16.mxu0 %v6724_v25  ;;  %7205 = vmatmul.mubr.bf16.vlgmr.msra.gmra.mxu1 %v6721_v58  ;;  %v6849_v17 = vpop.f32.mrf.mxu1  ;;  %v7523_v35 = vld [vmem:[%s10633_s13 + $0x20] sm:$0xff] }
 0xadf   :  { %7246 = vmatmul.mubr.bf16.vlgmr.msra.gmra.mxu0 %v6723_v8  ;;  %7477 = vmatpush1.bf16.msra.mxu1 %v9464_v56  ;;  %v7254_v56 = vld [vmem:[#allocation21] sm:$0x3] }
 0xae0   :  { %7478 = vmatprep.subr.bf16.mxu1 %v9469_v29  ;;  %v6850_v11 = vpop.f32.mrf.mxu1  ;;  %8400 = vmatpush3.msra.mxu0 %v7534_v38  ;;  %v7259_v8 = vrot.slane %v7254_v56, %v9996_v28 }
 0xae1   :  { %8401 = vmatprep.subr.mxu0 %v7549_v6 }
 0xae2   :  { %8402 = vmatpush3.msra.mxu0 %v7533_v60 }
 0xae3   :  { %7479 = vmatpush1.bf16.msra.mxu1 %v9467_v59  ;;  %8403 = vmatprep.subr.mxu0 %v7548_v51  ;;  %v8366_v51 = vld [vmem:[#allocation4] ss:$0 sm:$0xff] }
 0xae4   :  { %7480 = vmatprep.subr.bf16.mxu1 %v9472_v61  ;;  %8404 = vmatpush3.msra.mxu0 %v7532_v4 }
 0xae5   :  { %8405 = vmatprep.subr.mxu0 %v7547_v9 }
 0xae6   :  { %8406 = vmatpush3.msra.mxu0 %v7531_v18 }
 0xae7   :  { %7481 = vmatpush1.bf16.msra.mxu1 %v9470_v16  ;;  %8407 = vmatprep.subr.mxu0 %v7546_v24  ;;  %v7263_v16 = vrot.slane %v7254_v56, %v10000_v30 }
 0xae8   :  { %7482 = vmatprep.subr.bf16.mxu1 %v9475_v2  ;;  %8408 = vmatpush3.msra.mxu0 %v7530_v40 }
 0xae9   :  { %8409 = vmatprep.subr.mxu0 %v7545_v32 }
 0xaea   :  { %8410 = vmatpush3.msra.mxu0 %v7529_v63 }
 0xaeb   :  { %7483 = vmatpush1.bf16.msra.mxu1 %v9473_v23  ;;  %8411 = vmatprep.subr.mxu0 %v7544_v49 }
 0xaec   :  { %7484 = vmatprep.subr.bf16.mxu1 %v9478_v10  ;;  %8412 = vmatpush3.msra.mxu0 %v7528_v3 }
 0xaed   :  { %8413 = vmatprep.subr.mxu0 %v7543_v44 }
 0xaee   :  { %8414 = vmatpush3.msra.mxu0 %v7527_v5 }
 0xaef   :  { %7485 = vmatpush1.bf16.msra.mxu1 %v9476_v21  ;;  %8415 = vmatprep.subr.mxu0 %v7542_v27 }
 0xaf0   :  { %7486 = vmatprep.subr.bf16.mxu1 %v9481_v43  ;;  %8416 = vmatpush3.msra.mxu0 %v7526_v7 }
 0xaf1   :  { %8417 = vmatprep.subr.mxu0 %v7541_v31 }
 0xaf2   :  { %8418 = vmatpush3.msra.mxu0 %v7525_v14 }
 0xaf3   :  { %7487 = vmatpush1.bf16.msra.mxu1 %v9479_v37  ;;  %8419 = vmatprep.subr.mxu0 %v7540_v46 }
 0xaf4   :  { %7488 = vmatprep.subr.bf16.mxu1 %v9484_v0  ;;  %8420 = vmatpush3.msra.mxu0 %v7524_v62 }
 0xaf5   :  { %8421 = vmatprep.subr.mxu0 %v7539_v1 }
 0xaf6   :  { %8422 = vmatpush3.msra.mxu0 %v7523_v35 }
 0xaf7   :  { %7489 = vmatpush1.bf16.msra.mxu1 %v9482_v22 }
 0xaf8   :  { %7490 = vmatprep.subr.bf16.mxu1 %v9487_v50 }
 0xafb   :  { %7491 = vmatpush1.bf16.msra.mxu1 %v9485_v48 }
 0xafc   :  { %7492 = vmatprep.subr.bf16.mxu1 %v9490_v52  ;;  %v7522_v52 = vld [vmem:[%s10633_s13 + $0x18] sm:$0xff] }
 0xaff   :  { %7493 = vmatpush2.bf16.msra.mxu1 %v9488_v34  ;;  %v7537_v34 = vld [vmem:[%s10633_s13 + $0x90] sm:$0xff] }
 0xb00   :  { %7494 = vmatprep.subr.bf16.mxu1 %v9493_v45  ;;  %v7521_v45 = vld [vmem:[%s10633_s13 + $0x10] sm:$0xff] }
 0xb03   :  { %7495 = vmatpush2.bf16.msra.mxu1 %v9491_v54  ;;  %v7536_v54 = vld [vmem:[%s10633_s13 + $0x88] sm:$0xff] }
 0xb04   :  { %7496 = vmatprep.subr.bf16.mxu1 %v9496_v55  ;;  %v7520_v55 = vld [vmem:[%s10633_s13 + $0x8] sm:$0xff] }
 0xb07   :  { %7497 = vmatpush2.bf16.msra.mxu1 %v9494_v33  ;;  %v7535_v33 = vld [vmem:[%s10633_s13 + $0x80] sm:$0xff] }
 0xb08   :  { %7498 = vmatprep.subr.bf16.mxu1 %v9499_v26  ;;  %v7519_v26 = vld [vmem:[%s10633_s13] sm:$0xff] }
 0xb0b   :  { %7499 = vmatpush2.bf16.msra.mxu1 %v9497_v12  ;;  %v7304_v12 = vld [vmem:[#allocation24] sm:$0x3] }
 0xb0c   :  { %7500 = vmatprep.subr.bf16.mxu1 %v9502_v13  ;;  %v7309_v13 = vrot.slane %v7304_v12, %v9996_v28 }
 0xb0f   :  { %7501 = vmatpush2.bf16.msra.mxu1 %v9500_v57  ;;  %v7313_v57 = vrot.slane %v7304_v12, %v10000_v30 }
 0xb10   :  { %7502 = vmatprep.subr.bf16.mxu1 %v9505_v20 }
 0xb13   :  { %7503 = vmatpush2.bf16.msra.mxu1 %v9503_v41 }
 0xb14   :  { %7504 = vmatprep.subr.bf16.mxu1 %v9508_v15 }
 0xb17   :  { %7505 = vmatpush2.bf16.msra.mxu1 %v9506_v36 }
 0xb18   :  { %7506 = vmatprep.subr.bf16.mxu1 %v9511_v42 }
 0xb1b   :  { %7507 = vmatpush2.bf16.msra.mxu1 %v9509_v53 }
 0xb9e   :  { %v7206_v58 = vpop.f32.mrf.mxu1 }
 0xb9f   :  { %v7207_v25 = vadd.f32 %v7206_v58, %v10511_v47  ;;  %v7247_v29 = vpop.f32.mrf.mxu0 }
 0xba0   :  { %v7208_v59 = vpop.f32.mrf.mxu1 }
 0xba1   :  { %v7248_v61 = vadd.f32 %v7247_v29, %v7207_v25  ;;  %v7209_v17 = vadd.f32 %v7208_v59, %v10513_v19  ;;  %v7249_v11 = vpop.f32.mrf.mxu0  ;;  %v7538_v19 = vld [vmem:[%s10633_s13 + $0x98] sm:$0xff] }
 0xba2   :  { %v7210_v2 = vpop.f32.mrf.mxu1  ;;  %8423 = vmatprep.subr.mxu0 %v7538_v19 }
 0xba3   :  { %v7266_v23 = vadd.f32 %v7259_v8, %v7248_v61  ;;  %v7250_v10 = vadd.f32 %v7249_v11, %v7209_v17  ;;  %v7251_v21 = vpop.f32.mrf.mxu0  ;;  %8424 = vmatpush3.msra.mxu0 %v7522_v52 }
 0xba4   :  { %v7211_v43 = vpop.f32.mrf.mxu1  ;;  %8425 = vmatprep.subr.mxu0 %v7537_v34 }
 0xba5   :  { %v7267_v37 = vadd.f32 %v7263_v16, %v7250_v10  ;;  %v7252_v0 = vpop.f32.mrf.mxu0  ;;  %v7268_v22 = vmax.f32 %v7266_v23, 0.0  ;;  %8426 = vmatpush3.msra.mxu0 %v7521_v45 }
 0xba6   :  { %8427 = vmatprep.subr.mxu0 %v7536_v54 }
 0xba7   :  { %v7269_v50 = vmax.f32 %v7267_v37, 0.0  ;;  %v7270_v48 = vpack.c.bf16 %v7268_v22, %v7268_v22  ;;  %8428 = vmatpush3.msra.mxu0 %v7520_v55 }
 0xba8   :  { %8429 = vmatprep.subr.mxu0 %v7535_v33 }
 0xba9   :  { %v7271_v47 = vpack.c.bf16 %v7269_v50, %v7269_v50  ;;  %8430 = vmatpush3.msra.mxu0 %v7519_v26 }
 0xbab   :  { %7508 = vmatprep.mubr.bf16.mxu1 %v7271_v47 }
 0xbac   :  { %7509 = vmatmul.mubr.bf16.vlgmr.msra.gmra.mxu1 %v7270_v48 }
 0xc6c   :  { %v7510_v41 = vpop.f32.mrf.mxu1 }
 0xc6d   :  { %v7511_v20 = vadd.f32 %v7510_v41, %v7309_v13 }
 0xc6e   :  { %v7512_v15 = vpop.f32.mrf.mxu1 }
 0xc6f   :  { %v7513_v36 = vadd.f32 %v7512_v15, %v7313_v57  ;;  %v7517_v6 = vmax.f32 %v7511_v20, 0.0 }
 0xc70   :  { %v7514_v39 = vpop.f32.mrf.mxu1 }
 0xc71   :  { %v7518_v38 = vmax.f32 %v7513_v36, 0.0 }
 0xc72   :  { %v7515_v42 = vpop.f32.mrf.mxu1 }
 0xc73   :  { %7622 = vmatprep.mubr.f32.mxu0 %v7518_v38 }
 0xc74   :  { %7623 = vmatmul.mubr.f32.vlgmr.msra.gmra.mxu0 %v7517_v6 }
 0xd34   :  { %v8431_v60 = vpop.f32.mrf.mxu0 }
 0xd36   :  { %v8432_v4 = vpop.f32.mrf.mxu0 }
 0xd37   :  { %v8433_v53 = vadd.f32 %v8432_v4, %v8431_v60 }
 0xd39   :  { %v7625_v9 = vadd.f32 %v8433_v53, %v8366_v51 }
 0xd3b   :  { %7629 = vst.msk [vmem:[%s10635_s15] sm:$0x3] %vm7628_vm7, %v7625_v9 }
 0xd3c   :  { %7634 = vsyncpa [#allocation6], 1 }
 0xd3d   :  { %7635 = vsyncpa [#allocation8], 1 }
 0xd3e   :  { %7636 = vsyncpa [#allocation11], 1 }
 0xd3f   :  { %7637 = vsyncpa [#allocation14], 1 }
 0xd40   :  { %7638 = vsyncpa [#allocation17], 1 }
 0xd41   :  { %7639 = vsyncpa [#allocation20], 1 }
 0xd42   :  { %7640 = vsyncpa [#allocation23], 1 }

</bundles_post_ra>
